<compile_context>
chip_gen: v6e
topology: v6e:2x2x1
jax: 0.10.0
libtpu: 0.0.40
codegen_flags: <defaults>
</compile_context>

<pallas_src>
import functools

import jax
import jax.numpy as jnp
from jax.experimental import pallas as pl
from jax.experimental.pallas import tpu as pltpu


def _round_up(x, m):
    return ((x + m - 1) // m) * m


# ----------------------------------------------------------------------------
# Tiled, pipelined matmul (bf16 on the MXU, fp32 accumulation)
# ----------------------------------------------------------------------------
def _matmul_kernel(x_ref, w_ref, o_ref, acc_ref):
    @pl.when(pl.program_id(2) == 0)
    def _():
        acc_ref[...] = jnp.zeros_like(acc_ref)

    acc_ref[...] += jnp.dot(x_ref[...], w_ref[...],
                            preferred_element_type=jnp.float32)

    @pl.when(pl.program_id(2) == pl.num_programs(2) - 1)
    def _():
        o_ref[...] = acc_ref[...].astype(o_ref.dtype)


def pallas_matmul(x, w, out_dtype=jnp.float32, tm=512, tn=512, tk=512):
    """y = x @ w with a tiled/pipelined grid; operands cast to bf16."""
    M, K = x.shape
    K2, N = w.shape
    assert K == K2
    x = x.astype(jnp.bfloat16)
    w = w.astype(jnp.bfloat16)
    tm = min(tm, _round_up(M, 8))
    tn = min(tn, _round_up(N, 128))
    tk = min(tk, _round_up(K, 128))
    Mp, Kp, Np = _round_up(M, tm), _round_up(K, tk), _round_up(N, tn)
    if (Mp, Kp) != (M, K):
        x = jnp.pad(x, ((0, Mp - M), (0, Kp - K)))
    if (Kp, Np) != (K, N):
        w = jnp.pad(w, ((0, Kp - K), (0, Np - N)))

    out = pl.pallas_call(
        _matmul_kernel,
        grid=(Mp // tm, Np // tn, Kp // tk),
        in_specs=[pl.BlockSpec((tm, tk), lambda i, j, k: (i, k)),
                  pl.BlockSpec((tk, tn), lambda i, j, k: (k, j))],
        out_specs=pl.BlockSpec((tm, tn), lambda i, j, k: (i, j)),
        out_shape=jax.ShapeDtypeStruct((Mp, Np), out_dtype),
        scratch_shapes=[pltpu.VMEM((tm, tn), jnp.float32)],
        compiler_params=pltpu.CompilerParams(
            dimension_semantics=("parallel", "parallel", "arbitrary"),
            vmem_limit_bytes=48 * 1024 * 1024),
    )(x, w)
    if (Mp, Np) != (M, N):
        out = out[:M, :N]
    return out


# ----------------------------------------------------------------------------
# Fused channels-last Conv3d pooler (kernel (1, KH, KW), valid, no bias)
# ----------------------------------------------------------------------------
def _conv_pool_kernel(x_ref, w_ref, o_ref, acc_ref, *, KW, Wo):
    @pl.when(pl.program_id(2) == 0)
    def _():
        acc_ref[...] = jnp.zeros_like(acc_ref)

    xb = x_ref[...]                       # (G, 1, W, c_in)       bf16
    wb = w_ref[...]                       # (1, KW, c_in, c_out)  bf16
    G = xb.shape[0]

    acc = acc_ref[...]                    # (G, 1, Wo, c_out)     f32
    for kw in range(KW):
        tap = xb[:, 0, kw:kw + Wo, :]                                # (G, Wo, ci)
        wk = jnp.broadcast_to(wb[0, kw][None], (G,) + wb.shape[2:])  # (G, ci, co)
        r = jax.lax.dot_general(
            tap, wk, (((2,), (1,)), ((0,), (0,))),
            preferred_element_type=jnp.float32)                      # (G, Wo, co)
        acc = acc + r[:, None]
    acc_ref[...] = acc

    @pl.when(pl.program_id(2) == pl.num_programs(2) - 1)
    def _():
        o_ref[...] = acc_ref[...].astype(o_ref.dtype)


def conv_pool(x, w_torch, rows_per_block=8):
    """x: (B*heads*T, H, W, c_in) channels-last; w_torch: (co, ci, 1, KH, KW)."""
    BNT, H, W, ci = x.shape
    co, ci2, kt, KH, KW = w_torch.shape
    assert ci == ci2 and kt == 1
    Ho, Wo = H - KH + 1, W - KW + 1
    # (co, ci, 1, KH, KW) -> (KH, KW, ci, co)
    wk = jnp.transpose(w_torch[:, :, 0], (2, 3, 1, 0)).astype(jnp.bfloat16)
    x = x.astype(jnp.bfloat16)

    G = min(rows_per_block, BNT)
    BNTp = _round_up(BNT, G)
    if BNTp != BNT:
        x = jnp.pad(x, ((0, BNTp - BNT), (0, 0), (0, 0), (0, 0)))

    kernel = functools.partial(_conv_pool_kernel, KW=KW, Wo=Wo)
    out = pl.pallas_call(
        kernel,
        grid=(BNTp // G, Ho, KH),
        in_specs=[
            # H-dim block size is 1, so the block index is the element index
            # and (ho + kh) selects the shifted input row for this tap.
            pl.BlockSpec((G, 1, W, ci), lambda i, ho, kh: (i, ho + kh, 0, 0)),
            pl.BlockSpec((1, KW, ci, co), lambda i, ho, kh: (kh, 0, 0, 0)),
        ],
        out_specs=pl.BlockSpec((G, 1, Wo, co), lambda i, ho, kh: (i, ho, 0, 0)),
        out_shape=jax.ShapeDtypeStruct((BNTp, Ho, Wo, co), jnp.bfloat16),
        scratch_shapes=[pltpu.VMEM((G, 1, Wo, co), jnp.float32)],
        compiler_params=pltpu.CompilerParams(
            dimension_semantics=("parallel", "parallel", "arbitrary"),
            vmem_limit_bytes=32 * 1024 * 1024),
    )(x, wk)
    return out[:BNT]


# ----------------------------------------------------------------------------
# Fused attention: LN(q/k/v) + scores + temporal rel-pos + softmax + AV + res
# ----------------------------------------------------------------------------
def _attn_kernel(q_ref, k_ref, v_ref, rt_ref,
                 gq_ref, bq_ref, gk_ref, bk_ref, gv_ref, bv_ref,
                 x_ref, attn_ref, *, eps):
    def ln(xb, g_ref, b_ref):
        x = xb.astype(jnp.float32)
        mu = jnp.mean(x, axis=-1, keepdims=True)
        xc = x - mu
        var = jnp.mean(xc * xc, axis=-1, keepdims=True)
        return xc * jax.lax.rsqrt(var + eps) * g_ref[...] + b_ref[...]

    q = ln(q_ref[...], gq_ref, bq_ref)        # (G, t, c) f32, unscaled
    k = ln(k_ref[...], gk_ref, bk_ref)        # softmax scale pre-folded in g/b
    v = ln(v_ref[...], gv_ref, bv_ref)

    # scores on the MXU (bf16 in, fp32 accumulate):  s = (q*scale) @ k^T
    s = jax.lax.dot_general(
        q.astype(jnp.bfloat16), k.astype(jnp.bfloat16),
        (((2,), (2,)), ((0,), (0,))),
        preferred_element_type=jnp.float32)                           # (G, t, t)

    # temporal relative positional bias: rel[g,i,j] = q[g,i,:] . Rt[i,j,:]
    # TODO(synk): for large t, replace with qr = q @ rel_tab^T ((t, 2t-1) MXU
    # matmul) plus a diagonal skew, so the (t,t,c) Rt block never exists.
    rt = rt_ref[...].astype(jnp.float32)                              # (t, t, c)
    rel = jnp.sum(q[:, :, None, :] * rt[None, :, :, :], axis=-1)      # (G, t, t)
    s = s + rel

    s = s - jnp.max(s, axis=-1, keepdims=True)
    p = jnp.exp(s)
    p = p * pl.reciprocal(jnp.sum(p, axis=-1, keepdims=True), approx=True)

    o = jax.lax.dot_general(
        p.astype(jnp.bfloat16), v.astype(jnp.bfloat16),
        (((2,), (1,)), ((0,), (0,))),
        preferred_element_type=jnp.float32)                           # (G, t, c)
    o = o + q                                                         # residual (post-LN q)

    x_ref[...] = o.astype(x_ref.dtype)
    attn_ref[...] = p.astype(attn_ref.dtype)


def pooled_attention(q, k, v, rt, ln_params, scale, eps=1e-5,
                     heads_per_block=8):
    """q, k, v: (B*heads, t, c);  rt: (t, t, c);  ln_params: 6 x (1, c)."""
    BN, t, c = q.shape
    gq, bq, gk, bk, gv, bv = [p.astype(jnp.float32).reshape(1, c)
                              for p in ln_params]
    # fold the 1/sqrt(c) scale into LN(k)'s affine params so q stays unscaled
    # (the rel-pos bias and the residual both use the unscaled normalized q).
    gk = gk * scale
    bk = bk * scale

    G = min(heads_per_block, BN)
    BNp = _round_up(BN, G)
    if BNp != BN:
        pad = ((0, BNp - BN), (0, 0), (0, 0))
        q, k, v = jnp.pad(q, pad), jnp.pad(k, pad), jnp.pad(v, pad)
    q = q.astype(jnp.bfloat16)
    k = k.astype(jnp.bfloat16)
    v = v.astype(jnp.bfloat16)
    rt = rt.astype(jnp.bfloat16)

    kernel = functools.partial(_attn_kernel, eps=eps)
    blk = pl.BlockSpec((G, t, c), lambda i: (i, 0, 0))
    par = pl.BlockSpec((1, c), lambda i: (0, 0))
    # TODO(synk): for large t, tile the KV axis flash-style (online softmax)
    # and make the (BN, t, t) attention-probability output optional.
    x, attn = pl.pallas_call(
        kernel,
        grid=(BNp // G,),
        in_specs=[blk, blk, blk,
                  pl.BlockSpec((t, t, c), lambda i: (0, 0, 0)),
                  par, par, par, par, par, par],
        out_specs=(pl.BlockSpec((G, t, c), lambda i: (i, 0, 0)),
                   pl.BlockSpec((G, t, t), lambda i: (i, 0, 0))),
        out_shape=(jax.ShapeDtypeStruct((BNp, t, c), jnp.bfloat16),
                   jax.ShapeDtypeStruct((BNp, t, t), jnp.float32)),
        compiler_params=pltpu.CompilerParams(
            dimension_semantics=("parallel",),
            vmem_limit_bytes=32 * 1024 * 1024),
    )(q, k, v, rt, gq, bq, gk, bk, gv, bv)
    return x[:BN], attn[:BN]


# ----------------------------------------------------------------------------
# Glue (plain JAX)
# ----------------------------------------------------------------------------
def get_rel_pos(rel_pos, d):
    """1-D linear interpolation of the (L, C) table to (d, C),
    matching F.interpolate(mode='linear', align_corners=False)."""
    L, _ = rel_pos.shape
    if L == d:
        return rel_pos
    scale = L / d
    src = (jnp.arange(d, dtype=jnp.float32) + 0.5) * scale - 0.5
    src = jnp.clip(src, 0.0, float(L - 1))
    lo = jnp.floor(src).astype(jnp.int32)
    hi = jnp.minimum(lo + 1, L - 1)
    w = (src - lo.astype(jnp.float32))[:, None]
    return rel_pos[lo] * (1.0 - w) + rel_pos[hi] * w


def adaptive_pool_attention_forward(x, params, num_heads):
    """Returns (y, attn) matching the PyTorch module's forward.
       x: (B, T, H, W, input_dim)."""
    B, T, H, W, Cin = x.shape
    w_qkv = params["w_qkv"]                       # (Cin, 3*base_dim)
    base_dim = w_qkv.shape[1] // 3
    n = num_heads
    c = base_dim // n
    scale = c ** (-0.5)
    _, _, _, KH, KW = params["w_pool_q"].shape
    Ho, Wo = H - KH + 1, W - KW + 1

    # ---- qkv Linear (tiled bf16 Pallas matmul), qkv_bias=False ----
    qkv = pallas_matmul(x.reshape(-1, Cin), w_qkv,
                        out_dtype=jnp.bfloat16)             # (B*T*H*W, 3*bd)
    qkv = qkv.reshape(B, T, H, W, 3, n, c)
    # channels-last head split: -> (3, B, n, T, H, W, c)   (c stays the lane dim)
    qkv = qkv.transpose(4, 0, 5, 1, 2, 3, 6).reshape(3, B * n * T, H, W, c)

    # ---- fused Conv3d poolers (no XLA im2col) ----
    q = conv_pool(qkv[0], params["w_pool_q"])               # (B*n*T, Ho, Wo, c)
    k = conv_pool(qkv[1], params["w_pool_k"])
    v = conv_pool(qkv[2], params["w_pool_v"])
    t = T * Ho * Wo
    q = q.reshape(B * n, t, c)
    k = k.reshape(B * n, t, c)
    v = v.reshape(B * n, t, c)

    # ---- temporal relative positional table (cheap glue) ----
    rel_tab = get_rel_pos(params["rel_pos_t"].astype(jnp.float32), 2 * t - 1)
    dist = jnp.arange(t)[:, None] - jnp.arange(t)[None, :] + (t - 1)
    Rt = rel_tab[dist]                                      # (t, t, c)

    # ---- fused LN + attention + rel-pos bias + softmax + AV + residual ----
    xh, attn = pooled_attention(
        q, k, v, Rt,
        (params["g_q"], params["b_q"],
         params["g_k"], params["b_k"],
         params["g_v"], params["b_v"]),
        scale)

    # ---- output projection: 'b n t c -> b t (n c)' then Linear ----
    xh = xh.reshape(B, n, t, c).transpose(0, 2, 1, 3).reshape(B * t, n * c)
    y = pallas_matmul(xh, params["w_proj"], out_dtype=jnp.float32)
    y = (y + params["b_proj"][None, :]).reshape(B, t, base_dim)
    # drop_rate = 0.0 in this config -> no dropout in the forward path.
    return y, attn.reshape(B, n, t, t)


def init_params(key, input_dim, base_dim, num_heads):
    c = base_dim // num_heads
    ks = jax.random.split(key, 6)
    return {
        "w_qkv": 0.02 * jax.random.normal(ks[0], (input_dim, 3 * base_dim),
                                          jnp.float32),
        # conv weights in PyTorch layout (Cout, Cin, kT, kH, kW)
        "w_pool_q": 0.02 * jax.random.normal(ks[1], (c, c, 1, 7, 7), jnp.float32),
        "w_pool_k": 0.02 * jax.random.normal(ks[2], (c, c, 1, 7, 7), jnp.float32),
        "w_pool_v": 0.02 * jax.random.normal(ks[3], (c, c, 1, 7, 7), jnp.float32),
        # LayerNorm affine params (PyTorch default init: ones / zeros)
        "g_q": jnp.ones((1, c), jnp.float32), "b_q": jnp.zeros((1, c), jnp.float32),
        "g_k": jnp.ones((1, c), jnp.float32), "b_k": jnp.zeros((1, c), jnp.float32),
        "g_v": jnp.ones((1, c), jnp.float32), "b_v": jnp.zeros((1, c), jnp.float32),
        # proj Linear stored as (in, out) so forward uses x @ w_proj + b
        "w_proj": 0.02 * jax.random.normal(ks[4], (base_dim, base_dim),
                                           jnp.float32),
        "b_proj": jnp.zeros((base_dim,), jnp.float32),
        # nn.Parameter(torch.zeros(127, head_dim)); small random here so the
        # rel-pos path is actually exercised.
        "rel_pos_t": 0.02 * jax.random.normal(ks[5], (2 * 64 - 1, c),
                                              jnp.float32),
    }


if __name__ == "__main__":
    B, T, H, W = 2, 4, 7, 7          # H=W=7 so the 7x7 pooler reduces to 1x1
    input_dim, base_dim, num_heads = 32, 32, 4

    key = jax.random.PRNGKey(0)
    kx, kp = jax.random.split(key)
    x = jax.random.normal(kx, (B, T, H, W, input_dim), jnp.float32)
    params = init_params(kp, input_dim, base_dim, num_heads)

    fwd = jax.jit(functools.partial(adaptive_pool_attention_forward,
                                    num_heads=num_heads))
    y, attn = fwd(x, params)
    jax.block_until_ready((y, attn))

    t = T * (H - 6) * (W - 6)
    assert y.shape == (B, t, base_dim)
    assert attn.shape == (B, num_heads, t, t)
    print("KERNEL_OK")
</pallas_src>

<mosaic_0001>
module attributes {stable_mosaic.version = 11 : i64} {
  func.func @_matmul_kernel(%arg0: i32, %arg1: i32, %arg2: i32, %arg3: memref<392x128xbf16, #tpu.memory_space<vmem>>, %arg4: memref<128x128xbf16, #tpu.memory_space<vmem>>, %arg5: memref<392x128xbf16, #tpu.memory_space<vmem>>, %arg6: memref<392x128xf32, #tpu.memory_space<vmem>>) attributes {dimension_semantics = [#tpu.dimension_semantics<parallel>, #tpu.dimension_semantics<parallel>, #tpu.dimension_semantics<arbitrary>], iteration_bounds = array<i64: 1, 1, 1>, scalar_prefetch = 0 : i64, scratch_operands = 1 : i64, tpu.core_type = #tpu.core_type<tc>, window_params = [{transform_indices = @transform_0, window_bounds = array<i64: 392, 128>}, {transform_indices = @transform_1, window_bounds = array<i64: 128, 128>}, {transform_indices = @transform_2, window_bounds = array<i64: 392, 128>}]} {
    %c0_i32 = arith.constant 0 : i32
    %0 = arith.cmpi eq, %arg2, %c0_i32 : i32
    %1 = arith.extui %0 : i1 to i32
    %c0_i32_0 = arith.constant 0 : i32
    %2 = arith.cmpi ne, %1, %c0_i32_0 : i32
    scf.if %2 {
      %cst_10 = arith.constant 0.000000e+00 : f32
      %12 = vector.broadcast %cst_10 : f32 to vector<392x128xf32>
      %c0_11 = arith.constant 0 : index
      %c0_12 = arith.constant 0 : index
      %13 = vector.load %arg6[%c0_11, %c0_12] : memref<392x128xf32, #tpu.memory_space<vmem>>, vector<392x128xf32>
      tpu.vector_store %arg6[%c0_11, %c0_12], %12 {strides = array<i32>} : memref<392x128xf32, #tpu.memory_space<vmem>>, vector<392x128xf32>,
    } else {
    }
    %c0 = arith.constant 0 : index
    %c0_1 = arith.constant 0 : index
    %3 = vector.load %arg6[%c0, %c0_1] : memref<392x128xf32, #tpu.memory_space<vmem>>, vector<392x128xf32>
    %c0_2 = arith.constant 0 : index
    %c0_3 = arith.constant 0 : index
    %4 = vector.load %arg3[%c0_2, %c0_3] : memref<392x128xbf16, #tpu.memory_space<vmem>>, vector<392x128xbf16>
    %c0_4 = arith.constant 0 : index
    %c0_5 = arith.constant 0 : index
    %5 = vector.load %arg4[%c0_4, %c0_5] : memref<128x128xbf16, #tpu.memory_space<vmem>>, vector<128x128xbf16>
    %cst = arith.constant dense<0.000000e+00> : vector<392x128xf32>
    %6 = tpu.matmul %4, %5, %cst {dimension_numbers = #tpu.dot_dimension_numbers<[1], [0], [0], [1], [0, 0, 1, 1], [], []>} : vector<392x128xbf16>, vector<128x128xbf16>, vector<392x128xf32> -> vector<392x128xf32>
    %7 = arith.addf %3, %6 : vector<392x128xf32>
    %c0_6 = arith.constant 0 : index
    %c0_7 = arith.constant 0 : index
    %8 = vector.load %arg6[%c0_6, %c0_7] : memref<392x128xf32, #tpu.memory_space<vmem>>, vector<392x128xf32>
    tpu.vector_store %arg6[%c0_6, %c0_7], %7 {strides = array<i32>} : memref<392x128xf32, #tpu.memory_space<vmem>>, vector<392x128xf32>,
    %c0_i32_8 = arith.constant 0 : i32
    %9 = arith.cmpi eq, %arg2, %c0_i32_8 : i32
    %10 = arith.extui %9 : i1 to i32
    %c0_i32_9 = arith.constant 0 : i32
    %11 = arith.cmpi ne, %10, %c0_i32_9 : i32
    scf.if %11 {
      %c0_10 = arith.constant 0 : index
      %c0_11 = arith.constant 0 : index
      %12 = vector.load %arg6[%c0_10, %c0_11] : memref<392x128xf32, #tpu.memory_space<vmem>>, vector<392x128xf32>
      %13 = arith.truncf %12 : vector<392x128xf32> to vector<392x128xbf16>
      %c0_12 = arith.constant 0 : index
      %c0_13 = arith.constant 0 : index
      %14 = vector.load %arg5[%c0_12, %c0_13] : memref<392x128xbf16, #tpu.memory_space<vmem>>, vector<392x128xbf16>
      tpu.vector_store %arg5[%c0_12, %c0_13], %13 {strides = array<i32>} : memref<392x128xbf16, #tpu.memory_space<vmem>>, vector<392x128xbf16>,
    } else {
    }
    return
  }
  func.func @transform_0(%arg0: i32, %arg1: i32, %arg2: i32) -> (i32, i32) {
    %c0_i32 = arith.constant 0 : i32
    return %arg0, %arg2 : i32, i32
  }
  func.func @transform_1(%arg0: i32, %arg1: i32, %arg2: i32) -> (i32, i32) {
    %c0_i32 = arith.constant 0 : i32
    return %arg2, %arg1 : i32, i32
  }
  func.func @transform_2(%arg0: i32, %arg1: i32, %arg2: i32) -> (i32, i32) {
    %c0_i32 = arith.constant 0 : i32
    return %arg0, %arg1 : i32, i32
  }
}

module attributes {stable_mosaic.version = 11 : i64} {
  func.func @_conv_pool_kernel(%arg0: i32, %arg1: i32, %arg2: i32, %arg3: memref<8x1x7x8xbf16, #tpu.memory_space<vmem>>, %arg4: memref<1x7x8x8xbf16, #tpu.memory_space<vmem>>, %arg5: memref<8x1x1x8xbf16, #tpu.memory_space<vmem>>, %arg6: memref<8x1x1x8xf32, #tpu.memory_space<vmem>>) attributes {dimension_semantics = [#tpu.dimension_semantics<parallel>, #tpu.dimension_semantics<parallel>, #tpu.dimension_semantics<arbitrary>], iteration_bounds = array<i64: 4, 1, 7>, scalar_prefetch = 0 : i64, scratch_operands = 1 : i64, tpu.core_type = #tpu.core_type<tc>, window_params = [{transform_indices = @transform_0, window_bounds = array<i64: 8, 1, 7, 8>}, {transform_indices = @transform_1, window_bounds = array<i64: 1, 7, 8, 8>}, {transform_indices = @transform_2, window_bounds = array<i64: 8, 1, 1, 8>}]} {
    %c0_i32 = arith.constant 0 : i32
    %0 = arith.cmpi eq, %arg2, %c0_i32 : i32
    %1 = arith.extui %0 : i1 to i32
    %c0_i32_0 = arith.constant 0 : i32
    %2 = arith.cmpi ne, %1, %c0_i32_0 : i32
    scf.if %2 {
      %cst_23 = arith.constant 0.000000e+00 : f32
      %80 = vector.broadcast %cst_23 : f32 to vector<8x1x1x8xf32>
      %c0_24 = arith.constant 0 : index
      %c0_25 = arith.constant 0 : index
      %c0_26 = arith.constant 0 : index
      %c0_27 = arith.constant 0 : index
      %81 = vector.load %arg6[%c0_24, %c0_25, %c0_26, %c0_27] : memref<8x1x1x8xf32, #tpu.memory_space<vmem>>, vector<8x1x1x8xf32>
      tpu.vector_store %arg6[%c0_24, %c0_25, %c0_26, %c0_27], %80 {strides = array<i32>} : memref<8x1x1x8xf32, #tpu.memory_space<vmem>>, vector<8x1x1x8xf32>,
    } else {
    }
    %c0 = arith.constant 0 : index
    %c0_1 = arith.constant 0 : index
    %c0_2 = arith.constant 0 : index
    %c0_3 = arith.constant 0 : index
    %3 = vector.load %arg3[%c0, %c0_1, %c0_2, %c0_3] : memref<8x1x7x8xbf16, #tpu.memory_space<vmem>>, vector<8x1x7x8xbf16>
    %c0_4 = arith.constant 0 : index
    %c0_5 = arith.constant 0 : index
    %c0_6 = arith.constant 0 : index
    %c0_7 = arith.constant 0 : index
    %4 = vector.load %arg4[%c0_4, %c0_5, %c0_6, %c0_7] : memref<1x7x8x8xbf16, #tpu.memory_space<vmem>>, vector<1x7x8x8xbf16>
    %c0_8 = arith.constant 0 : index
    %c0_9 = arith.constant 0 : index
    %c0_10 = arith.constant 0 : index
    %c0_11 = arith.constant 0 : index
    %5 = vector.load %arg6[%c0_8, %c0_9, %c0_10, %c0_11] : memref<8x1x1x8xf32, #tpu.memory_space<vmem>>, vector<8x1x1x8xf32>
    %6 = vector.extract_strided_slice %3 {offsets = [0, 0, 0, 0], sizes = [8, 1, 1, 8], strides = [1, 1, 1, 1]} : vector<8x1x7x8xbf16> to vector<8x1x1x8xbf16>
    %7 = vector.shape_cast %6 : vector<8x1x1x8xbf16> to vector<8x1x8xbf16>
    %8 = vector.extract_strided_slice %4 {offsets = [0, 0, 0, 0], sizes = [1, 1, 8, 8], strides = [1, 1, 1, 1]} : vector<1x7x8x8xbf16> to vector<1x1x8x8xbf16>
    %9 = vector.shape_cast %8 : vector<1x1x8x8xbf16> to vector<8x8xbf16>
    %10 = vector.shape_cast %9 : vector<8x8xbf16> to vector<1x8x8xbf16>
    %11 = vector.shape_cast %10 : vector<1x8x8xbf16> to vector<1x8x8xbf16>
    %12 = vector.broadcast %11 : vector<1x8x8xbf16> to vector<8x8x8xbf16>
    %cst = arith.constant dense<0.000000e+00> : vector<8x1x8xf32>
    %13 = tpu.matmul %7, %12, %cst {dimension_numbers = #tpu.dot_dimension_numbers<[2], [1], [1], [2], [0, 0, 0, 1, 1, 2], [0], [0]>} : vector<8x1x8xbf16>, vector<8x8x8xbf16>, vector<8x1x8xf32> -> vector<8x1x8xf32>
    %14 = vector.shape_cast %13 : vector<8x1x8xf32> to vector<8x1x1x8xf32>
    %15 = arith.addf %5, %14 : vector<8x1x1x8xf32>
    %16 = vector.extract_strided_slice %3 {offsets = [0, 0, 1, 0], sizes = [8, 1, 1, 8], strides = [1, 1, 1, 1]} : vector<8x1x7x8xbf16> to vector<8x1x1x8xbf16>
    %17 = vector.shape_cast %16 : vector<8x1x1x8xbf16> to vector<8x1x8xbf16>
    %18 = vector.extract_strided_slice %4 {offsets = [0, 1, 0, 0], sizes = [1, 1, 8, 8], strides = [1, 1, 1, 1]} : vector<1x7x8x8xbf16> to vector<1x1x8x8xbf16>
    %19 = vector.shape_cast %18 : vector<1x1x8x8xbf16> to vector<8x8xbf16>
    %20 = vector.shape_cast %19 : vector<8x8xbf16> to vector<1x8x8xbf16>
    %21 = vector.shape_cast %20 : vector<1x8x8xbf16> to vector<1x8x8xbf16>
    %22 = vector.broadcast %21 : vector<1x8x8xbf16> to vector<8x8x8xbf16>
    %cst_12 = arith.constant dense<0.000000e+00> : vector<8x1x8xf32>
    %23 = tpu.matmul %17, %22, %cst_12 {dimension_numbers = #tpu.dot_dimension_numbers<[2], [1], [1], [2], [0, 0, 0, 1, 1, 2], [0], [0]>} : vector<8x1x8xbf16>, vector<8x8x8xbf16>, vector<8x1x8xf32> -> vector<8x1x8xf32>
    %24 = vector.shape_cast %23 : vector<8x1x8xf32> to vector<8x1x1x8xf32>
    %25 = arith.addf %15, %24 : vector<8x1x1x8xf32>
    %26 = vector.extract_strided_slice %3 {offsets = [0, 0, 2, 0], sizes = [8, 1, 1, 8], strides = [1, 1, 1, 1]} : vector<8x1x7x8xbf16> to vector<8x1x1x8xbf16>
    %27 = vector.shape_cast %26 : vector<8x1x1x8xbf16> to vector<8x1x8xbf16>
    %28 = vector.extract_strided_slice %4 {offsets = [0, 2, 0, 0], sizes = [1, 1, 8, 8], strides = [1, 1, 1, 1]} : vector<1x7x8x8xbf16> to vector<1x1x8x8xbf16>
    %29 = vector.shape_cast %28 : vector<1x1x8x8xbf16> to vector<8x8xbf16>
    %30 = vector.shape_cast %29 : vector<8x8xbf16> to vector<1x8x8xbf16>
    %31 = vector.shape_cast %30 : vector<1x8x8xbf16> to vector<1x8x8xbf16>
    %32 = vector.broadcast %31 : vector<1x8x8xbf16> to vector<8x8x8xbf16>
    %cst_13 = arith.constant dense<0.000000e+00> : vector<8x1x8xf32>
    %33 = tpu.matmul %27, %32, %cst_13 {dimension_numbers = #tpu.dot_dimension_numbers<[2], [1], [1], [2], [0, 0, 0, 1, 1, 2], [0], [0]>} : vector<8x1x8xbf16>, vector<8x8x8xbf16>, vector<8x1x8xf32> -> vector<8x1x8xf32>
    %34 = vector.shape_cast %33 : vector<8x1x8xf32> to vector<8x1x1x8xf32>
    %35 = arith.addf %25, %34 : vector<8x1x1x8xf32>
    %36 = vector.extract_strided_slice %3 {offsets = [0, 0, 3, 0], sizes = [8, 1, 1, 8], strides = [1, 1, 1, 1]} : vector<8x1x7x8xbf16> to vector<8x1x1x8xbf16>
    %37 = vector.shape_cast %36 : vector<8x1x1x8xbf16> to vector<8x1x8xbf16>
    %38 = vector.extract_strided_slice %4 {offsets = [0, 3, 0, 0], sizes = [1, 1, 8, 8], strides = [1, 1, 1, 1]} : vector<1x7x8x8xbf16> to vector<1x1x8x8xbf16>
    %39 = vector.shape_cast %38 : vector<1x1x8x8xbf16> to vector<8x8xbf16>
    %40 = vector.shape_cast %39 : vector<8x8xbf16> to vector<1x8x8xbf16>
    %41 = vector.shape_cast %40 : vector<1x8x8xbf16> to vector<1x8x8xbf16>
    %42 = vector.broadcast %41 : vector<1x8x8xbf16> to vector<8x8x8xbf16>
    %cst_14 = arith.constant dense<0.000000e+00> : vector<8x1x8xf32>
    %43 = tpu.matmul %37, %42, %cst_14 {dimension_numbers = #tpu.dot_dimension_numbers<[2], [1], [1], [2], [0, 0, 0, 1, 1, 2], [0], [0]>} : vector<8x1x8xbf16>, vector<8x8x8xbf16>, vector<8x1x8xf32> -> vector<8x1x8xf32>
    %44 = vector.shape_cast %43 : vector<8x1x8xf32> to vector<8x1x1x8xf32>
    %45 = arith.addf %35, %44 : vector<8x1x1x8xf32>
    %46 = vector.extract_strided_slice %3 {offsets = [0, 0, 4, 0], sizes = [8, 1, 1, 8], strides = [1, 1, 1, 1]} : vector<8x1x7x8xbf16> to vector<8x1x1x8xbf16>
    %47 = vector.shape_cast %46 : vector<8x1x1x8xbf16> to vector<8x1x8xbf16>
    %48 = vector.extract_strided_slice %4 {offsets = [0, 4, 0, 0], sizes = [1, 1, 8, 8], strides = [1, 1, 1, 1]} : vector<1x7x8x8xbf16> to vector<1x1x8x8xbf16>
    %49 = vector.shape_cast %48 : vector<1x1x8x8xbf16> to vector<8x8xbf16>
    %50 = vector.shape_cast %49 : vector<8x8xbf16> to vector<1x8x8xbf16>
    %51 = vector.shape_cast %50 : vector<1x8x8xbf16> to vector<1x8x8xbf16>
    %52 = vector.broadcast %51 : vector<1x8x8xbf16> to vector<8x8x8xbf16>
    %cst_15 = arith.constant dense<0.000000e+00> : vector<8x1x8xf32>
    %53 = tpu.matmul %47, %52, %cst_15 {dimension_numbers = #tpu.dot_dimension_numbers<[2], [1], [1], [2], [0, 0, 0, 1, 1, 2], [0], [0]>} : vector<8x1x8xbf16>, vector<8x8x8xbf16>, vector<8x1x8xf32> -> vector<8x1x8xf32>
    %54 = vector.shape_cast %53 : vector<8x1x8xf32> to vector<8x1x1x8xf32>
    %55 = arith.addf %45, %54 : vector<8x1x1x8xf32>
    %56 = vector.extract_strided_slice %3 {offsets = [0, 0, 5, 0], sizes = [8, 1, 1, 8], strides = [1, 1, 1, 1]} : vector<8x1x7x8xbf16> to vector<8x1x1x8xbf16>
    %57 = vector.shape_cast %56 : vector<8x1x1x8xbf16> to vector<8x1x8xbf16>
    %58 = vector.extract_strided_slice %4 {offsets = [0, 5, 0, 0], sizes = [1, 1, 8, 8], strides = [1, 1, 1, 1]} : vector<1x7x8x8xbf16> to vector<1x1x8x8xbf16>
    %59 = vector.shape_cast %58 : vector<1x1x8x8xbf16> to vector<8x8xbf16>
    %60 = vector.shape_cast %59 : vector<8x8xbf16> to vector<1x8x8xbf16>
    %61 = vector.shape_cast %60 : vector<1x8x8xbf16> to vector<1x8x8xbf16>
    %62 = vector.broadcast %61 : vector<1x8x8xbf16> to vector<8x8x8xbf16>
    %cst_16 = arith.constant dense<0.000000e+00> : vector<8x1x8xf32>
    %63 = tpu.matmul %57, %62, %cst_16 {dimension_numbers = #tpu.dot_dimension_numbers<[2], [1], [1], [2], [0, 0, 0, 1, 1, 2], [0], [0]>} : vector<8x1x8xbf16>, vector<8x8x8xbf16>, vector<8x1x8xf32> -> vector<8x1x8xf32>
    %64 = vector.shape_cast %63 : vector<8x1x8xf32> to vector<8x1x1x8xf32>
    %65 = arith.addf %55, %64 : vector<8x1x1x8xf32>
    %66 = vector.extract_strided_slice %3 {offsets = [0, 0, 6, 0], sizes = [8, 1, 1, 8], strides = [1, 1, 1, 1]} : vector<8x1x7x8xbf16> to vector<8x1x1x8xbf16>
    %67 = vector.shape_cast %66 : vector<8x1x1x8xbf16> to vector<8x1x8xbf16>
    %68 = vector.extract_strided_slice %4 {offsets = [0, 6, 0, 0], sizes = [1, 1, 8, 8], strides = [1, 1, 1, 1]} : vector<1x7x8x8xbf16> to vector<1x1x8x8xbf16>
    %69 = vector.shape_cast %68 : vector<1x1x8x8xbf16> to vector<8x8xbf16>
    %70 = vector.shape_cast %69 : vector<8x8xbf16> to vector<1x8x8xbf16>
    %71 = vector.shape_cast %70 : vector<1x8x8xbf16> to vector<1x8x8xbf16>
    %72 = vector.broadcast %71 : vector<1x8x8xbf16> to vector<8x8x8xbf16>
    %cst_17 = arith.constant dense<0.000000e+00> : vector<8x1x8xf32>
    %73 = tpu.matmul %67, %72, %cst_17 {dimension_numbers = #tpu.dot_dimension_numbers<[2], [1], [1], [2], [0, 0, 0, 1, 1, 2], [0], [0]>} : vector<8x1x8xbf16>, vector<8x8x8xbf16>, vector<8x1x8xf32> -> vector<8x1x8xf32>
    %74 = vector.shape_cast %73 : vector<8x1x8xf32> to vector<8x1x1x8xf32>
    %75 = arith.addf %65, %74 : vector<8x1x1x8xf32>
    %c0_18 = arith.constant 0 : index
    %c0_19 = arith.constant 0 : index
    %c0_20 = arith.constant 0 : index
    %c0_21 = arith.constant 0 : index
    %76 = vector.load %arg6[%c0_18, %c0_19, %c0_20, %c0_21] : memref<8x1x1x8xf32, #tpu.memory_space<vmem>>, vector<8x1x1x8xf32>
    tpu.vector_store %arg6[%c0_18, %c0_19, %c0_20, %c0_21], %75 {strides = array<i32>} : memref<8x1x1x8xf32, #tpu.memory_space<vmem>>, vector<8x1x1x8xf32>,
    %c6_i32 = arith.constant 6 : i32
    %77 = arith.cmpi eq, %arg2, %c6_i32 : i32
    %78 = arith.extui %77 : i1 to i32
    %c0_i32_22 = arith.constant 0 : i32
    %79 = arith.cmpi ne, %78, %c0_i32_22 : i32
    scf.if %79 {
      %c0_23 = arith.constant 0 : index
      %c0_24 = arith.constant 0 : index
      %c0_25 = arith.constant 0 : index
      %c0_26 = arith.constant 0 : index
      %80 = vector.load %arg6[%c0_23, %c0_24, %c0_25, %c0_26] : memref<8x1x1x8xf32, #tpu.memory_space<vmem>>, vector<8x1x1x8xf32>
      %81 = arith.truncf %80 : vector<8x1x1x8xf32> to vector<8x1x1x8xbf16>
      %c0_27 = arith.constant 0 : index
      %c0_28 = arith.constant 0 : index
      %c0_29 = arith.constant 0 : index
      %c0_30 = arith.constant 0 : index
      %82 = vector.load %arg5[%c0_27, %c0_28, %c0_29, %c0_30] : memref<8x1x1x8xbf16, #tpu.memory_space<vmem>>, vector<8x1x1x8xbf16>
      tpu.vector_store %arg5[%c0_27, %c0_28, %c0_29, %c0_30], %81 {strides = array<i32>} : memref<8x1x1x8xbf16, #tpu.memory_space<vmem>>, vector<8x1x1x8xbf16>,
    } else {
    }
    return
  }
  func.func @transform_0(%arg0: i32, %arg1: i32, %arg2: i32) -> (i32, i32, i32, i32) {
    %0 = arith.addi %arg1, %arg2 : i32
    %c0_i32 = arith.constant 0 : i32
    %c0_i32_0 = arith.constant 0 : i32
    %c0_i32_1 = arith.constant 0 : i32
    return %arg0, %0, %c0_i32, %c0_i32_0 : i32, i32, i32, i32
  }
  func.func @transform_1(%arg0: i32, %arg1: i32, %arg2: i32) -> (i32, i32, i32, i32) {
    %c0_i32 = arith.constant 0 : i32
    %c0_i32_0 = arith.constant 0 : i32
    %c0_i32_1 = arith.constant 0 : i32
    %c0_i32_2 = arith.constant 0 : i32
    return %arg2, %c0_i32, %c0_i32_0, %c0_i32_1 : i32, i32, i32, i32
  }
  func.func @transform_2(%arg0: i32, %arg1: i32, %arg2: i32) -> (i32, i32, i32, i32) {
    %c0_i32 = arith.constant 0 : i32
    %c0_i32_0 = arith.constant 0 : i32
    %c0_i32_1 = arith.constant 0 : i32
    return %arg0, %arg1, %c0_i32, %c0_i32_0 : i32, i32, i32, i32
  }
}

module attributes {stable_mosaic.version = 11 : i64} {
  func.func @_attn_kernel(%arg0: i32, %arg1: memref<8x4x8xbf16, #tpu.memory_space<vmem>>, %arg2: memref<8x4x8xbf16, #tpu.memory_space<vmem>>, %arg3: memref<8x4x8xbf16, #tpu.memory_space<vmem>>, %arg4: memref<4x4x8xbf16, #tpu.memory_space<vmem>>, %arg5: memref<1x8xf32, #tpu.memory_space<vmem>>, %arg6: memref<1x8xf32, #tpu.memory_space<vmem>>, %arg7: memref<1x8xf32, #tpu.memory_space<vmem>>, %arg8: memref<1x8xf32, #tpu.memory_space<vmem>>, %arg9: memref<1x8xf32, #tpu.memory_space<vmem>>, %arg10: memref<1x8xf32, #tpu.memory_space<vmem>>, %arg11: memref<8x4x8xbf16, #tpu.memory_space<vmem>>, %arg12: memref<8x4x4xf32, #tpu.memory_space<vmem>>) attributes {dimension_semantics = [#tpu.dimension_semantics<parallel>], iteration_bounds = array<i64: 1>, scalar_prefetch = 0 : i64, scratch_operands = 0 : i64, tpu.core_type = #tpu.core_type<tc>, window_params = [{transform_indices = @transform_0, window_bounds = array<i64: 8, 4, 8>}, {transform_indices = @transform_1, window_bounds = array<i64: 8, 4, 8>}, {transform_indices = @transform_2, window_bounds = array<i64: 8, 4, 8>}, {pipeline_mode = #tpu.pipeline_mode<synchronous>, transform_indices = @transform_3, window_bounds = array<i64: 4, 4, 8>}, {pipeline_mode = #tpu.pipeline_mode<synchronous>, transform_indices = @transform_4, window_bounds = array<i64: 1, 8>}, {pipeline_mode = #tpu.pipeline_mode<synchronous>, transform_indices = @transform_5, window_bounds = array<i64: 1, 8>}, {pipeline_mode = #tpu.pipeline_mode<synchronous>, transform_indices = @transform_6, window_bounds = array<i64: 1, 8>}, {pipeline_mode = #tpu.pipeline_mode<synchronous>, transform_indices = @transform_7, window_bounds = array<i64: 1, 8>}, {pipeline_mode = #tpu.pipeline_mode<synchronous>, transform_indices = @transform_8, window_bounds = array<i64: 1, 8>}, {pipeline_mode = #tpu.pipeline_mode<synchronous>, transform_indices = @transform_9, window_bounds = array<i64: 1, 8>}, {transform_indices = @transform_10, window_bounds = array<i64: 8, 4, 8>}, {transform_indices = @transform_11, window_bounds = array<i64: 8, 4, 4>}]} {
    %c0 = arith.constant 0 : index
    %c0_0 = arith.constant 0 : index
    %c0_1 = arith.constant 0 : index
    %0 = vector.load %arg1[%c0, %c0_0, %c0_1] : memref<8x4x8xbf16, #tpu.memory_space<vmem>>, vector<8x4x8xbf16>
    %1 = arith.extf %0 : vector<8x4x8xbf16> to vector<8x4x8xf32>
    %cst = arith.constant dense<0.000000e+00> : vector<8x4xf32>
    %2 = vector.multi_reduction <add>, %1, %cst [2] : vector<8x4x8xf32> to vector<8x4xf32>
    %3 = vector.shape_cast %2 : vector<8x4xf32> to vector<8x4x1xf32>
    %cst_2 = arith.constant 8.000000e+00 : f32
    %4 = vector.broadcast %cst_2 : f32 to vector<8x4x1xf32>
    %5 = arith.divf %3, %4 : vector<8x4x1xf32>
    %6 = vector.broadcast %5 : vector<8x4x1xf32> to vector<8x4x8xf32>
    %7 = arith.subf %1, %6 : vector<8x4x8xf32>
    %8 = arith.mulf %7, %7 : vector<8x4x8xf32>
    %cst_3 = arith.constant dense<0.000000e+00> : vector<8x4xf32>
    %9 = vector.multi_reduction <add>, %8, %cst_3 [2] : vector<8x4x8xf32> to vector<8x4xf32>
    %10 = vector.shape_cast %9 : vector<8x4xf32> to vector<8x4x1xf32>
    %cst_4 = arith.constant 8.000000e+00 : f32
    %11 = vector.broadcast %cst_4 : f32 to vector<8x4x1xf32>
    %12 = arith.divf %10, %11 : vector<8x4x1xf32>
    %cst_5 = arith.constant 9.99999974E-6 : f32
    %13 = vector.broadcast %cst_5 : f32 to vector<8x4x1xf32>
    %14 = arith.addf %12, %13 : vector<8x4x1xf32>
    %15 = math.rsqrt %14 : vector<8x4x1xf32>
    %16 = vector.broadcast %15 : vector<8x4x1xf32> to vector<8x4x8xf32>
    %17 = arith.mulf %7, %16 : vector<8x4x8xf32>
    %c0_6 = arith.constant 0 : index
    %c0_7 = arith.constant 0 : index
    %18 = vector.load %arg5[%c0_6, %c0_7] : memref<1x8xf32, #tpu.memory_space<vmem>>, vector<1x8xf32>
    %19 = vector.shape_cast %18 : vector<1x8xf32> to vector<1x1x8xf32>
    %20 = vector.broadcast %19 : vector<1x1x8xf32> to vector<8x4x8xf32>
    %21 = arith.mulf %17, %20 : vector<8x4x8xf32>
    %c0_8 = arith.constant 0 : index
    %c0_9 = arith.constant 0 : index
    %22 = vector.load %arg6[%c0_8, %c0_9] : memref<1x8xf32, #tpu.memory_space<vmem>>, vector<1x8xf32>
    %23 = vector.shape_cast %22 : vector<1x8xf32> to vector<1x1x8xf32>
    %24 = vector.broadcast %23 : vector<1x1x8xf32> to vector<8x4x8xf32>
    %25 = arith.addf %21, %24 : vector<8x4x8xf32>
    %c0_10 = arith.constant 0 : index
    %c0_11 = arith.constant 0 : index
    %c0_12 = arith.constant 0 : index
    %26 = vector.load %arg2[%c0_10, %c0_11, %c0_12] : memref<8x4x8xbf16, #tpu.memory_space<vmem>>, vector<8x4x8xbf16>
    %27 = arith.extf %26 : vector<8x4x8xbf16> to vector<8x4x8xf32>
    %cst_13 = arith.constant dense<0.000000e+00> : vector<8x4xf32>
    %28 = vector.multi_reduction <add>, %27, %cst_13 [2] : vector<8x4x8xf32> to vector<8x4xf32>
    %29 = vector.shape_cast %28 : vector<8x4xf32> to vector<8x4x1xf32>
    %cst_14 = arith.constant 8.000000e+00 : f32
    %30 = vector.broadcast %cst_14 : f32 to vector<8x4x1xf32>
    %31 = arith.divf %29, %30 : vector<8x4x1xf32>
    %32 = vector.broadcast %31 : vector<8x4x1xf32> to vector<8x4x8xf32>
    %33 = arith.subf %27, %32 : vector<8x4x8xf32>
    %34 = arith.mulf %33, %33 : vector<8x4x8xf32>
    %cst_15 = arith.constant dense<0.000000e+00> : vector<8x4xf32>
    %35 = vector.multi_reduction <add>, %34, %cst_15 [2] : vector<8x4x8xf32> to vector<8x4xf32>
    %36 = vector.shape_cast %35 : vector<8x4xf32> to vector<8x4x1xf32>
    %cst_16 = arith.constant 8.000000e+00 : f32
    %37 = vector.broadcast %cst_16 : f32 to vector<8x4x1xf32>
    %38 = arith.divf %36, %37 : vector<8x4x1xf32>
    %cst_17 = arith.constant 9.99999974E-6 : f32
    %39 = vector.broadcast %cst_17 : f32 to vector<8x4x1xf32>
    %40 = arith.addf %38, %39 : vector<8x4x1xf32>
    %41 = math.rsqrt %40 : vector<8x4x1xf32>
    %42 = vector.broadcast %41 : vector<8x4x1xf32> to vector<8x4x8xf32>
    %43 = arith.mulf %33, %42 : vector<8x4x8xf32>
    %c0_18 = arith.constant 0 : index
    %c0_19 = arith.constant 0 : index
    %44 = vector.load %arg7[%c0_18, %c0_19] : memref<1x8xf32, #tpu.memory_space<vmem>>, vector<1x8xf32>
    %45 = vector.shape_cast %44 : vector<1x8xf32> to vector<1x1x8xf32>
    %46 = vector.broadcast %45 : vector<1x1x8xf32> to vector<8x4x8xf32>
    %47 = arith.mulf %43, %46 : vector<8x4x8xf32>
    %c0_20 = arith.constant 0 : index
    %c0_21 = arith.constant 0 : index
    %48 = vector.load %arg8[%c0_20, %c0_21] : memref<1x8xf32, #tpu.memory_space<vmem>>, vector<1x8xf32>
    %49 = vector.shape_cast %48 : vector<1x8xf32> to vector<1x1x8xf32>
    %50 = vector.broadcast %49 : vector<1x1x8xf32> to vector<8x4x8xf32>
    %51 = arith.addf %47, %50 : vector<8x4x8xf32>
    %c0_22 = arith.constant 0 : index
    %c0_23 = arith.constant 0 : index
    %c0_24 = arith.constant 0 : index
    %52 = vector.load %arg3[%c0_22, %c0_23, %c0_24] : memref<8x4x8xbf16, #tpu.memory_space<vmem>>, vector<8x4x8xbf16>
    %53 = arith.extf %52 : vector<8x4x8xbf16> to vector<8x4x8xf32>
    %cst_25 = arith.constant dense<0.000000e+00> : vector<8x4xf32>
    %54 = vector.multi_reduction <add>, %53, %cst_25 [2] : vector<8x4x8xf32> to vector<8x4xf32>
    %55 = vector.shape_cast %54 : vector<8x4xf32> to vector<8x4x1xf32>
    %cst_26 = arith.constant 8.000000e+00 : f32
    %56 = vector.broadcast %cst_26 : f32 to vector<8x4x1xf32>
    %57 = arith.divf %55, %56 : vector<8x4x1xf32>
    %58 = vector.broadcast %57 : vector<8x4x1xf32> to vector<8x4x8xf32>
    %59 = arith.subf %53, %58 : vector<8x4x8xf32>
    %60 = arith.mulf %59, %59 : vector<8x4x8xf32>
    %cst_27 = arith.constant dense<0.000000e+00> : vector<8x4xf32>
    %61 = vector.multi_reduction <add>, %60, %cst_27 [2] : vector<8x4x8xf32> to vector<8x4xf32>
    %62 = vector.shape_cast %61 : vector<8x4xf32> to vector<8x4x1xf32>
    %cst_28 = arith.constant 8.000000e+00 : f32
    %63 = vector.broadcast %cst_28 : f32 to vector<8x4x1xf32>
    %64 = arith.divf %62, %63 : vector<8x4x1xf32>
    %cst_29 = arith.constant 9.99999974E-6 : f32
    %65 = vector.broadcast %cst_29 : f32 to vector<8x4x1xf32>
    %66 = arith.addf %64, %65 : vector<8x4x1xf32>
    %67 = math.rsqrt %66 : vector<8x4x1xf32>
    %68 = vector.broadcast %67 : vector<8x4x1xf32> to vector<8x4x8xf32>
    %69 = arith.mulf %59, %68 : vector<8x4x8xf32>
    %c0_30 = arith.constant 0 : index
    %c0_31 = arith.constant 0 : index
    %70 = vector.load %arg9[%c0_30, %c0_31] : memref<1x8xf32, #tpu.memory_space<vmem>>, vector<1x8xf32>
    %71 = vector.shape_cast %70 : vector<1x8xf32> to vector<1x1x8xf32>
    %72 = vector.broadcast %71 : vector<1x1x8xf32> to vector<8x4x8xf32>
    %73 = arith.mulf %69, %72 : vector<8x4x8xf32>
    %c0_32 = arith.constant 0 : index
    %c0_33 = arith.constant 0 : index
    %74 = vector.load %arg10[%c0_32, %c0_33] : memref<1x8xf32, #tpu.memory_space<vmem>>, vector<1x8xf32>
    %75 = vector.shape_cast %74 : vector<1x8xf32> to vector<1x1x8xf32>
    %76 = vector.broadcast %75 : vector<1x1x8xf32> to vector<8x4x8xf32>
    %77 = arith.addf %73, %76 : vector<8x4x8xf32>
    %78 = arith.truncf %25 : vector<8x4x8xf32> to vector<8x4x8xbf16>
    %79 = arith.truncf %51 : vector<8x4x8xf32> to vector<8x4x8xbf16>
    %cst_34 = arith.constant dense<0.000000e+00> : vector<8x4x4xf32>
    %80 = tpu.matmul %78, %79, %cst_34 {dimension_numbers = #tpu.dot_dimension_numbers<[2], [2], [1], [1], [0, 0, 0, 1, 1, 1], [0], [0]>} : vector<8x4x8xbf16>, vector<8x4x8xbf16>, vector<8x4x4xf32> -> vector<8x4x4xf32>
    %c0_35 = arith.constant 0 : index
    %c0_36 = arith.constant 0 : index
    %c0_37 = arith.constant 0 : index
    %81 = vector.load %arg4[%c0_35, %c0_36, %c0_37] : memref<4x4x8xbf16, #tpu.memory_space<vmem>>, vector<4x4x8xbf16>
    %82 = arith.extf %81 : vector<4x4x8xbf16> to vector<4x4x8xf32>
    %83 = vector.shape_cast %25 : vector<8x4x8xf32> to vector<8x4x1x8xf32>
    %84 = vector.shape_cast %82 : vector<4x4x8xf32> to vector<1x4x4x8xf32>
    %85 = vector.broadcast %83 : vector<8x4x1x8xf32> to vector<8x4x4x8xf32>
    %86 = vector.broadcast %84 : vector<1x4x4x8xf32> to vector<8x4x4x8xf32>
    %87 = arith.mulf %85, %86 : vector<8x4x4x8xf32>
    %cst_38 = arith.constant dense<0.000000e+00> : vector<8x4x4xf32>
    %88 = vector.multi_reduction <add>, %87, %cst_38 [3] : vector<8x4x4x8xf32> to vector<8x4x4xf32>
    %89 = arith.addf %80, %88 : vector<8x4x4xf32>
    %cst_39 = arith.constant dense<0xFF800000> : vector<8x4xf32>
    %90 = vector.multi_reduction <maximumf>, %89, %cst_39 [2] : vector<8x4x4xf32> to vector<8x4xf32>
    %91 = vector.shape_cast %90 : vector<8x4xf32> to vector<8x4x1xf32>
    %92 = vector.broadcast %91 : vector<8x4x1xf32> to vector<8x4x4xf32>
    %93 = arith.subf %89, %92 : vector<8x4x4xf32>
    %94 = math.exp %93 : vector<8x4x4xf32>
    %cst_40 = arith.constant dense<0.000000e+00> : vector<8x4xf32>
    %95 = vector.multi_reduction <add>, %94, %cst_40 [2] : vector<8x4x4xf32> to vector<8x4xf32>
    %96 = vector.shape_cast %95 : vector<8x4xf32> to vector<8x4x1xf32>
    %97 = tpu.reciprocal %96 {approx = true} : vector<8x4x1xf32> -> vector<8x4x1xf32>
    %98 = vector.broadcast %97 : vector<8x4x1xf32> to vector<8x4x4xf32>
    %99 = arith.mulf %94, %98 : vector<8x4x4xf32>
    %100 = arith.truncf %99 : vector<8x4x4xf32> to vector<8x4x4xbf16>
    %101 = arith.truncf %77 : vector<8x4x8xf32> to vector<8x4x8xbf16>
    %cst_41 = arith.constant dense<0.000000e+00> : vector<8x4x8xf32>
    %102 = tpu.matmul %100, %101, %cst_41 {dimension_numbers = #tpu.dot_dimension_numbers<[2], [1], [1], [2], [0, 0, 0, 1, 1, 2], [0], [0]>} : vector<8x4x4xbf16>, vector<8x4x8xbf16>, vector<8x4x8xf32> -> vector<8x4x8xf32>
    %103 = arith.addf %102, %25 : vector<8x4x8xf32>
    %104 = arith.truncf %103 : vector<8x4x8xf32> to vector<8x4x8xbf16>
    %c0_42 = arith.constant 0 : index
    %c0_43 = arith.constant 0 : index
    %c0_44 = arith.constant 0 : index
    %105 = vector.load %arg11[%c0_42, %c0_43, %c0_44] : memref<8x4x8xbf16, #tpu.memory_space<vmem>>, vector<8x4x8xbf16>
    tpu.vector_store %arg11[%c0_42, %c0_43, %c0_44], %104 {strides = array<i32>} : memref<8x4x8xbf16, #tpu.memory_space<vmem>>, vector<8x4x8xbf16>,
    %c0_45 = arith.constant 0 : index
    %c0_46 = arith.constant 0 : index
    %c0_47 = arith.constant 0 : index
    %106 = vector.load %arg12[%c0_45, %c0_46, %c0_47] : memref<8x4x4xf32, #tpu.memory_space<vmem>>, vector<8x4x4xf32>
    tpu.vector_store %arg12[%c0_45, %c0_46, %c0_47], %99 {strides = array<i32>} : memref<8x4x4xf32, #tpu.memory_space<vmem>>, vector<8x4x4xf32>,
    return
  }
  func.func @transform_0(%arg0: i32) -> (i32, i32, i32) {
    %c0_i32 = arith.constant 0 : i32
    %c0_i32_0 = arith.constant 0 : i32
    %c0_i32_1 = arith.constant 0 : i32
    return %arg0, %c0_i32, %c0_i32_0 : i32, i32, i32
  }
  func.func @transform_1(%arg0: i32) -> (i32, i32, i32) {
    %c0_i32 = arith.constant 0 : i32
    %c0_i32_0 = arith.constant 0 : i32
    %c0_i32_1 = arith.constant 0 : i32
    return %arg0, %c0_i32, %c0_i32_0 : i32, i32, i32
  }
  func.func @transform_2(%arg0: i32) -> (i32, i32, i32) {
    %c0_i32 = arith.constant 0 : i32
    %c0_i32_0 = arith.constant 0 : i32
    %c0_i32_1 = arith.constant 0 : i32
    return %arg0, %c0_i32, %c0_i32_0 : i32, i32, i32
  }
  func.func @transform_3(%arg0: i32) -> (i32, i32, i32) {
    %c0_i32 = arith.constant 0 : i32
    %c0_i32_0 = arith.constant 0 : i32
    %c0_i32_1 = arith.constant 0 : i32
    %c0_i32_2 = arith.constant 0 : i32
    return %c0_i32, %c0_i32_0, %c0_i32_1 : i32, i32, i32
  }
  func.func @transform_4(%arg0: i32) -> (i32, i32) {
    %c0_i32 = arith.constant 0 : i32
    %c0_i32_0 = arith.constant 0 : i32
    %c0_i32_1 = arith.constant 0 : i32
    return %c0_i32, %c0_i32_0 : i32, i32
  }
  func.func @transform_5(%arg0: i32) -> (i32, i32) {
    %c0_i32 = arith.constant 0 : i32
    %c0_i32_0 = arith.constant 0 : i32
    %c0_i32_1 = arith.constant 0 : i32
    return %c0_i32, %c0_i32_0 : i32, i32
  }
  func.func @transform_6(%arg0: i32) -> (i32, i32) {
    %c0_i32 = arith.constant 0 : i32
    %c0_i32_0 = arith.constant 0 : i32
    %c0_i32_1 = arith.constant 0 : i32
    return %c0_i32, %c0_i32_0 : i32, i32
  }
  func.func @transform_7(%arg0: i32) -> (i32, i32) {
    %c0_i32 = arith.constant 0 : i32
    %c0_i32_0 = arith.constant 0 : i32
    %c0_i32_1 = arith.constant 0 : i32
    return %c0_i32, %c0_i32_0 : i32, i32
  }
  func.func @transform_8(%arg0: i32) -> (i32, i32) {
    %c0_i32 = arith.constant 0 : i32
    %c0_i32_0 = arith.constant 0 : i32
    %c0_i32_1 = arith.constant 0 : i32
    return %c0_i32, %c0_i32_0 : i32, i32
  }
  func.func @transform_9(%arg0: i32) -> (i32, i32) {
    %c0_i32 = arith.constant 0 : i32
    %c0_i32_0 = arith.constant 0 : i32
    %c0_i32_1 = arith.constant 0 : i32
    return %c0_i32, %c0_i32_0 : i32, i32
  }
  func.func @transform_10(%arg0: i32) -> (i32, i32, i32) {
    %c0_i32 = arith.constant 0 : i32
    %c0_i32_0 = arith.constant 0 : i32
    %c0_i32_1 = arith.constant 0 : i32
    return %arg0, %c0_i32, %c0_i32_0 : i32, i32, i32
  }
  func.func @transform_11(%arg0: i32) -> (i32, i32, i32) {
    %c0_i32 = arith.constant 0 : i32
    %c0_i32_0 = arith.constant 0 : i32
    %c0_i32_1 = arith.constant 0 : i32
    return %arg0, %c0_i32, %c0_i32_0 : i32, i32, i32
  }
}

module attributes {stable_mosaic.version = 11 : i64} {
  func.func @_matmul_kernel(%arg0: i32, %arg1: i32, %arg2: i32, %arg3: memref<8x128xbf16, #tpu.memory_space<vmem>>, %arg4: memref<128x128xbf16, #tpu.memory_space<vmem>>, %arg5: memref<8x128xf32, #tpu.memory_space<vmem>>, %arg6: memref<8x128xf32, #tpu.memory_space<vmem>>) attributes {dimension_semantics = [#tpu.dimension_semantics<parallel>, #tpu.dimension_semantics<parallel>, #tpu.dimension_semantics<arbitrary>], iteration_bounds = array<i64: 1, 1, 1>, scalar_prefetch = 0 : i64, scratch_operands = 1 : i64, tpu.core_type = #tpu.core_type<tc>, window_params = [{transform_indices = @transform_0, window_bounds = array<i64: 8, 128>}, {transform_indices = @transform_1, window_bounds = array<i64: 128, 128>}, {transform_indices = @transform_2, window_bounds = array<i64: 8, 128>}]} {
    %c0_i32 = arith.constant 0 : i32
    %0 = arith.cmpi eq, %arg2, %c0_i32 : i32
    %1 = arith.extui %0 : i1 to i32
    %c0_i32_0 = arith.constant 0 : i32
    %2 = arith.cmpi ne, %1, %c0_i32_0 : i32
    scf.if %2 {
      %cst_10 = arith.constant 0.000000e+00 : f32
      %12 = vector.broadcast %cst_10 : f32 to vector<8x128xf32>
      %c0_11 = arith.constant 0 : index
      %c0_12 = arith.constant 0 : index
      %13 = vector.load %arg6[%c0_11, %c0_12] : memref<8x128xf32, #tpu.memory_space<vmem>>, vector<8x128xf32>
      tpu.vector_store %arg6[%c0_11, %c0_12], %12 {strides = array<i32>} : memref<8x128xf32, #tpu.memory_space<vmem>>, vector<8x128xf32>,
    } else {
    }
    %c0 = arith.constant 0 : index
    %c0_1 = arith.constant 0 : index
    %3 = vector.load %arg6[%c0, %c0_1] : memref<8x128xf32, #tpu.memory_space<vmem>>, vector<8x128xf32>
    %c0_2 = arith.constant 0 : index
    %c0_3 = arith.constant 0 : index
    %4 = vector.load %arg3[%c0_2, %c0_3] : memref<8x128xbf16, #tpu.memory_space<vmem>>, vector<8x128xbf16>
    %c0_4 = arith.constant 0 : index
    %c0_5 = arith.constant 0 : index
    %5 = vector.load %arg4[%c0_4, %c0_5] : memref<128x128xbf16, #tpu.memory_space<vmem>>, vector<128x128xbf16>
    %cst = arith.constant dense<0.000000e+00> : vector<8x128xf32>
    %6 = tpu.matmul %4, %5, %cst {dimension_numbers = #tpu.dot_dimension_numbers<[1], [0], [0], [1], [0, 0, 1, 1], [], []>} : vector<8x128xbf16>, vector<128x128xbf16>, vector<8x128xf32> -> vector<8x128xf32>
    %7 = arith.addf %3, %6 : vector<8x128xf32>
    %c0_6 = arith.constant 0 : index
    %c0_7 = arith.constant 0 : index
    %8 = vector.load %arg6[%c0_6, %c0_7] : memref<8x128xf32, #tpu.memory_space<vmem>>, vector<8x128xf32>
    tpu.vector_store %arg6[%c0_6, %c0_7], %7 {strides = array<i32>} : memref<8x128xf32, #tpu.memory_space<vmem>>, vector<8x128xf32>,
    %c0_i32_8 = arith.constant 0 : i32
    %9 = arith.cmpi eq, %arg2, %c0_i32_8 : i32
    %10 = arith.extui %9 : i1 to i32
    %c0_i32_9 = arith.constant 0 : i32
    %11 = arith.cmpi ne, %10, %c0_i32_9 : i32
    scf.if %11 {
      %c0_10 = arith.constant 0 : index
      %c0_11 = arith.constant 0 : index
      %12 = vector.load %arg6[%c0_10, %c0_11] : memref<8x128xf32, #tpu.memory_space<vmem>>, vector<8x128xf32>
      %c0_12 = arith.constant 0 : index
      %c0_13 = arith.constant 0 : index
      %13 = vector.load %arg5[%c0_12, %c0_13] : memref<8x128xf32, #tpu.memory_space<vmem>>, vector<8x128xf32>
      tpu.vector_store %arg5[%c0_12, %c0_13], %12 {strides = array<i32>} : memref<8x128xf32, #tpu.memory_space<vmem>>, vector<8x128xf32>,
    } else {
    }
    return
  }
  func.func @transform_0(%arg0: i32, %arg1: i32, %arg2: i32) -> (i32, i32) {
    %c0_i32 = arith.constant 0 : i32
    return %arg0, %arg2 : i32, i32
  }
  func.func @transform_1(%arg0: i32, %arg1: i32, %arg2: i32) -> (i32, i32) {
    %c0_i32 = arith.constant 0 : i32
    return %arg2, %arg1 : i32, i32
  }
  func.func @transform_2(%arg0: i32, %arg1: i32, %arg2: i32) -> (i32, i32) {
    %c0_i32 = arith.constant 0 : i32
    return %arg0, %arg1 : i32, i32
  }
}

</mosaic_0001>

<bundles_post_ra>
// kernel: adaptive_pool_attention_forward.6
= control target key start
LH: loop header
LB: loop body
LE: loop exit
PB: predicated region body
PF: predicated region fallthrough
CT: control target
= control target key end

     0   :  { %v1481_v0 = vmov 0.0   ;;  %vm1482_vm0 = vmmov 0   ;;  %s1738_s1 = inlined_call_operand.vmem [shape: bf16[128,128], index: 1, kind: input, shape index: {}]   ;;  %s1739_s0 = inlined_call_operand.vmem [shape: bf16[392,128], index: 0, kind: input, shape index: {}]   ;;  %s1740_s2 = inlined_call_operand.vmem [shape: bf16[392,128], index: 2, kind: output, shape index: {}]  }
   0x1   :  { %1314 = vmatprep.subr.bf16.mxu0 %v1481_v0  ;;  %v1448_v1 = vld [vmem:[%s1738_s1 + $0x38] sm:$0xff]   ;;  %1430 = vmatprep.subr.bf16.mxu1 %v1481_v0  ;;  %v1449_v2 = vld [vmem:[%s1738_s1 + $0x30] sm:$0xff]   ;;  %v1450_v3 = vld [vmem:[%s1738_s1 + $0x28] sm:$0xff]  }
   0x2   :  { %1330 = vmatprep.mubr.msk.bf16.mxu0 %vm1482_vm0, %v1481_v0  ;;  %1382 = vmatprep.mubr.msk.bf16.mxu1 %vm1482_vm0, %v1481_v0  ;;  %v1451_v4 = vld [vmem:[%s1738_s1 + $0x20] sm:$0xff]   ;;  %v1452_v5 = vld [vmem:[%s1738_s1 + $0x18] sm:$0xff]   ;;  %v1453_v6 = vld [vmem:[%s1738_s1 + $0x10] sm:$0xff]  }
   0x3   :  { %1315 = vmatpush3.bf16.msra.mxu0 %v1448_v1  ;;  %1438 = vmatpush3.bf16.msra.mxu1 %v1448_v1  ;;  %v1454_v7 = vld [vmem:[%s1738_s1 + $0x8] sm:$0xff]   ;;  %v1455_v8 = vld [vmem:[%s1738_s1] sm:$0xff]   ;;  %v1459_v12 = vld [vmem:[%s1739_s0 + $0x70] sm:$0xff]  }
   0x4   :  { %1316 = vmatprep.subr.bf16.mxu0 %v1481_v0  ;;  %1431 = vmatprep.subr.bf16.mxu1 %v1481_v0  ;;  %v1456_v9 = vld [vmem:[%s1739_s0] sm:$0xff]   ;;  %v1457_v10 = vld [vmem:[%s1739_s0 + $0x68] sm:$0xff]   ;;  %v1460_v13 = vld [vmem:[%s1739_s0 + $0x10] sm:$0xff]  }
   0x5   :  { %v1458_v11 = vld [vmem:[%s1739_s0 + $0x8] sm:$0xff]   ;;  %v1461_v14 = vld [vmem:[%s1739_s0 + $0x78] sm:$0xff]   ;;  %v1463_v16 = vld [vmem:[%s1739_s0 + $0x80] sm:$0xff]  }
   0x6   :  { %v1462_v15 = vld [vmem:[%s1739_s0 + $0x18] sm:$0xff]   ;;  %v1464_v17 = vld [vmem:[%s1739_s0 + $0x20] sm:$0xff]   ;;  %v1465_v18 = vld [vmem:[%s1739_s0 + $0x88] sm:$0xff]  }
   0x7   :  { %1317 = vmatpush3.bf16.msra.mxu0 %v1449_v2  ;;  %1439 = vmatpush3.bf16.msra.mxu1 %v1449_v2  ;;  %v1466_v19 = vld [vmem:[%s1739_s0 + $0x28] sm:$0xff]   ;;  %v1467_v20 = vld [vmem:[%s1739_s0 + $0x90] sm:$0xff]   ;;  %v1469_v22 = vld [vmem:[%s1739_s0 + $0x98] sm:$0xff]  }
   0x8   :  { %1318 = vmatprep.subr.bf16.mxu0 %v1481_v0  ;;  %1432 = vmatprep.subr.bf16.mxu1 %v1481_v0  ;;  %v1468_v21 = vld [vmem:[%s1739_s0 + $0x30] sm:$0xff]   ;;  %v1470_v23 = vld [vmem:[%s1739_s0 + $0x38] sm:$0xff]   ;;  %v1471_v24 = vld [vmem:[%s1739_s0 + $0xa0] sm:$0xff]  }
   0x9   :  { %v1472_v25 = vld [vmem:[%s1739_s0 + $0x40] sm:$0xff]   ;;  %v1473_v26 = vld [vmem:[%s1739_s0 + $0xa8] sm:$0xff]   ;;  %v1475_v28 = vld [vmem:[%s1739_s0 + $0xb0] sm:$0xff]  }
   0xa   :  { %v1474_v27 = vld [vmem:[%s1739_s0 + $0x48] sm:$0xff]   ;;  %v1476_v29 = vld [vmem:[%s1739_s0 + $0x50] sm:$0xff]   ;;  %v1477_v30 = vld [vmem:[%s1739_s0 + $0xb8] sm:$0xff]  }
   0xb   :  { %1319 = vmatpush3.bf16.msra.mxu0 %v1450_v3  ;;  %1440 = vmatpush3.bf16.msra.mxu1 %v1450_v3  ;;  %v1478_v31 = vld [vmem:[%s1739_s0 + $0x58] sm:$0xff]   ;;  %v1479_v32 = vld [vmem:[%s1739_s0 + $0xc0] ss:$0 sps:$4 sm:$0xff]  }
   0xc   :  { %1320 = vmatprep.subr.bf16.mxu0 %v1481_v0  ;;  %1433 = vmatprep.subr.bf16.mxu1 %v1481_v0  ;;  %v1480_v33 = vld [vmem:[%s1739_s0 + $0x60] sm:$0xff]  }
   0xf   :  { %1321 = vmatpush3.bf16.msra.mxu0 %v1451_v4  ;;  %1441 = vmatpush3.bf16.msra.mxu1 %v1451_v4 }
  0x10   :  { %1322 = vmatprep.subr.bf16.mxu0 %v1481_v0  ;;  %1434 = vmatprep.subr.bf16.mxu1 %v1481_v0 }
  0x13   :  { %1323 = vmatpush3.bf16.msra.mxu0 %v1452_v5  ;;  %1442 = vmatpush3.bf16.msra.mxu1 %v1452_v5 }
  0x14   :  { %1324 = vmatprep.subr.bf16.mxu0 %v1481_v0  ;;  %1435 = vmatprep.subr.bf16.mxu1 %v1481_v0 }
  0x17   :  { %1325 = vmatpush3.bf16.msra.mxu0 %v1453_v6  ;;  %1443 = vmatpush3.bf16.msra.mxu1 %v1453_v6 }
  0x18   :  { %1326 = vmatprep.subr.bf16.mxu0 %v1481_v0  ;;  %1436 = vmatprep.subr.bf16.mxu1 %v1481_v0 }
  0x1b   :  { %1327 = vmatpush3.bf16.msra.mxu0 %v1454_v7  ;;  %1444 = vmatpush3.bf16.msra.mxu1 %v1454_v7 }
  0x1c   :  { %1328 = vmatprep.subr.bf16.mxu0 %v1481_v0  ;;  %1437 = vmatprep.subr.bf16.mxu1 %v1481_v0 }
  0x1f   :  { %1329 = vmatpush3.bf16.msra.mxu0 %v1455_v8  ;;  %1445 = vmatpush3.bf16.msra.mxu1 %v1455_v8 }
  0x22   :  { %1331 = vmatmul.mubr.bf16.vlgmr.msra.gmra.mxu0 %v1456_v9  ;;  %1383 = vmatmul.mubr.bf16.vlgmr.msra.gmra.mxu1 %v1457_v10 }
  0x23   :  { %1334 = vmatprep.mubr.msk.bf16.mxu0 %vm1482_vm0, %v1481_v0  ;;  %1386 = vmatprep.mubr.msk.bf16.mxu1 %vm1482_vm0, %v1481_v0 }
  0x2a   :  { %1335 = vmatmul.mubr.bf16.gmra.mxu0 %v1458_v11  ;;  %1387 = vmatmul.mubr.bf16.gmra.mxu1 %v1459_v12 }
  0x2b   :  { %1338 = vmatprep.mubr.msk.bf16.mxu0 %vm1482_vm0, %v1481_v0  ;;  %1390 = vmatprep.mubr.msk.bf16.mxu1 %vm1482_vm0, %v1481_v0 }
  0x32   :  { %1339 = vmatmul.mubr.bf16.gmra.mxu0 %v1460_v13  ;;  %1391 = vmatmul.mubr.bf16.gmra.mxu1 %v1461_v14 }
  0x33   :  { %1342 = vmatprep.mubr.msk.bf16.mxu0 %vm1482_vm0, %v1481_v0  ;;  %1394 = vmatprep.mubr.msk.bf16.mxu1 %vm1482_vm0, %v1481_v0 }
  0x3a   :  { %1343 = vmatmul.mubr.bf16.gmra.mxu0 %v1462_v15  ;;  %1395 = vmatmul.mubr.bf16.gmra.mxu1 %v1463_v16 }
  0x3b   :  { %1346 = vmatprep.mubr.msk.bf16.mxu0 %vm1482_vm0, %v1481_v0  ;;  %1398 = vmatprep.mubr.msk.bf16.mxu1 %vm1482_vm0, %v1481_v0 }
  0x42   :  { %1347 = vmatmul.mubr.bf16.gmra.mxu0 %v1464_v17  ;;  %1399 = vmatmul.mubr.bf16.gmra.mxu1 %v1465_v18 }
  0x43   :  { %1350 = vmatprep.mubr.msk.bf16.mxu0 %vm1482_vm0, %v1481_v0  ;;  %1402 = vmatprep.mubr.msk.bf16.mxu1 %vm1482_vm0, %v1481_v0 }
  0x4a   :  { %1351 = vmatmul.mubr.bf16.gmra.mxu0 %v1466_v19  ;;  %1403 = vmatmul.mubr.bf16.gmra.mxu1 %v1467_v20 }
  0x4b   :  { %1354 = vmatprep.mubr.msk.bf16.mxu0 %vm1482_vm0, %v1481_v0  ;;  %1406 = vmatprep.mubr.msk.bf16.mxu1 %vm1482_vm0, %v1481_v0 }
  0x52   :  { %1355 = vmatmul.mubr.bf16.gmra.mxu0 %v1468_v21  ;;  %1407 = vmatmul.mubr.bf16.gmra.mxu1 %v1469_v22 }
  0x53   :  { %1358 = vmatprep.mubr.msk.bf16.mxu0 %vm1482_vm0, %v1481_v0  ;;  %1410 = vmatprep.mubr.msk.bf16.mxu1 %vm1482_vm0, %v1481_v0 }
  0x5a   :  { %1359 = vmatmul.mubr.bf16.gmra.mxu0 %v1470_v23  ;;  %1411 = vmatmul.mubr.bf16.gmra.mxu1 %v1471_v24 }
  0x5b   :  { %1362 = vmatprep.mubr.msk.bf16.mxu0 %vm1482_vm0, %v1481_v0  ;;  %1414 = vmatprep.mubr.msk.bf16.mxu1 %vm1482_vm0, %v1481_v0 }
  0x62   :  { %1363 = vmatmul.mubr.bf16.gmra.mxu0 %v1472_v25  ;;  %1415 = vmatmul.mubr.bf16.gmra.mxu1 %v1473_v26 }
  0x63   :  { %1366 = vmatprep.mubr.msk.bf16.mxu0 %vm1482_vm0, %v1481_v0  ;;  %1418 = vmatprep.mubr.msk.bf16.mxu1 %vm1482_vm0, %v1481_v0 }
  0x6a   :  { %1367 = vmatmul.mubr.bf16.gmra.mxu0 %v1474_v27  ;;  %1419 = vmatmul.mubr.bf16.gmra.mxu1 %v1475_v28 }
  0x6b   :  { %1370 = vmatprep.mubr.msk.bf16.mxu0 %vm1482_vm0, %v1481_v0  ;;  %1422 = vmatprep.mubr.msk.bf16.mxu1 %vm1482_vm0, %v1481_v0 }
  0x72   :  { %1371 = vmatmul.mubr.bf16.gmra.mxu0 %v1476_v29  ;;  %1423 = vmatmul.mubr.bf16.gmra.mxu1 %v1477_v30 }
  0x73   :  { %1374 = vmatprep.mubr.msk.bf16.mxu0 %vm1482_vm0, %v1481_v0  ;;  %1426 = vmatprep.mubr.msk.bf16.mxu1 %vm1482_vm0, %v1481_v0 }
  0x7a   :  { %1375 = vmatmul.mubr.bf16.gmra.mxu0 %v1478_v31  ;;  %1427 = vmatmul.mubr.bf16.gmra.mxu1 %v1479_v32 }
  0x7b   :  { %1378 = vmatprep.mubr.msk.bf16.mxu0 %vm1482_vm0, %v1481_v0 }
  0x82   :  { %1379 = vmatmul.mubr.bf16.gmra.mxu0 %v1480_v33 }
  0xe2   :  { %v409_v34 = vpop.f32.mrf.mxu0  ;;  %v513_v35 = vpop.f32.mrf.mxu1 }
  0xe4   :  { %v1332_v36 = vpop.f32.mrf.mxu0  ;;  %v1384_v37 = vpop.f32.mrf.mxu1 }
  0xe6   :  { %v412_v38 = vpop.f32.mrf.mxu0  ;;  %v516_v39 = vpop.f32.mrf.mxu1 }
  0xe7   :  { %v1141_v40 = vpack.c.bf16 %v412_v38, %v409_v34  ;;  %v1206_v41 = vpack.c.bf16 %v516_v39, %v513_v35 }
  0xe8   :  { %v1333_v42 = vpop.f32.mrf.mxu0  ;;  %v1385_v43 = vpop.f32.mrf.mxu1 }
  0xe9   :  { %1142 = vst [vmem:[%s1740_s2] sm:$0xff] %v1141_v40   ;;  %1270 = vst [vmem:[%s1740_s2 + $0x68] sm:$0xff] %v1206_v41  }
  0xea   :  { %v417_v44 = vpop.f32.mrf.mxu0  ;;  %v521_v45 = vpop.f32.mrf.mxu1 }
  0xec   :  { %v1336_v46 = vpop.f32.mrf.mxu0  ;;  %v1388_v47 = vpop.f32.mrf.mxu1 }
  0xee   :  { %v420_v48 = vpop.f32.mrf.mxu0  ;;  %v524_v49 = vpop.f32.mrf.mxu1 }
  0xef   :  { %v1146_v50 = vpack.c.bf16 %v420_v48, %v417_v44  ;;  %v1211_v51 = vpack.c.bf16 %v524_v49, %v521_v45 }
  0xf0   :  { %v1337_v52 = vpop.f32.mrf.mxu0  ;;  %v1389_v53 = vpop.f32.mrf.mxu1 }
  0xf1   :  { %1258 = vst [vmem:[%s1740_s2 + $0x8] sm:$0xff] %v1146_v50   ;;  %1271 = vst [vmem:[%s1740_s2 + $0x70] sm:$0xff] %v1211_v51  }
  0xf2   :  { %v425_v54 = vpop.f32.mrf.mxu0  ;;  %v529_v55 = vpop.f32.mrf.mxu1 }
  0xf4   :  { %v1340_v56 = vpop.f32.mrf.mxu0  ;;  %v1392_v57 = vpop.f32.mrf.mxu1 }
  0xf6   :  { %v428_v58 = vpop.f32.mrf.mxu0  ;;  %v532_v59 = vpop.f32.mrf.mxu1 }
  0xf7   :  { %v1151_v60 = vpack.c.bf16 %v428_v58, %v425_v54  ;;  %v1216_v61 = vpack.c.bf16 %v532_v59, %v529_v55 }
  0xf8   :  { %v1341_v62 = vpop.f32.mrf.mxu0  ;;  %v1393_v63 = vpop.f32.mrf.mxu1 }
  0xf9   :  { %1259 = vst [vmem:[%s1740_s2 + $0x10] sm:$0xff] %v1151_v60   ;;  %1272 = vst [vmem:[%s1740_s2 + $0x78] sm:$0xff] %v1216_v61  }
  0xfa   :  { %v433_v0 = vpop.f32.mrf.mxu0  ;;  %v537_v1 = vpop.f32.mrf.mxu1 }
  0xfc   :  { %v1344_v2 = vpop.f32.mrf.mxu0  ;;  %v1396_v3 = vpop.f32.mrf.mxu1 }
  0xfe   :  { %v436_v4 = vpop.f32.mrf.mxu0  ;;  %v540_v5 = vpop.f32.mrf.mxu1 }
  0xff   :  { %v1156_v6 = vpack.c.bf16 %v436_v4, %v433_v0  ;;  %v1221_v7 = vpack.c.bf16 %v540_v5, %v537_v1 }
 0x100   :  { %v1345_v8 = vpop.f32.mrf.mxu0  ;;  %v1397_v9 = vpop.f32.mrf.mxu1 }
 0x101   :  { %1260 = vst [vmem:[%s1740_s2 + $0x18] sm:$0xff] %v1156_v6   ;;  %1273 = vst [vmem:[%s1740_s2 + $0x80] sm:$0xff] %v1221_v7  }
 0x102   :  { %v441_v10 = vpop.f32.mrf.mxu0  ;;  %v545_v11 = vpop.f32.mrf.mxu1 }
 0x104   :  { %v1348_v12 = vpop.f32.mrf.mxu0  ;;  %v1400_v13 = vpop.f32.mrf.mxu1 }
 0x106   :  { %v444_v14 = vpop.f32.mrf.mxu0  ;;  %v548_v15 = vpop.f32.mrf.mxu1 }
 0x107   :  { %v1161_v16 = vpack.c.bf16 %v444_v14, %v441_v10  ;;  %v1226_v17 = vpack.c.bf16 %v548_v15, %v545_v11 }
 0x108   :  { %v1349_v18 = vpop.f32.mrf.mxu0  ;;  %v1401_v19 = vpop.f32.mrf.mxu1 }
 0x109   :  { %1261 = vst [vmem:[%s1740_s2 + $0x20] sm:$0xff] %v1161_v16   ;;  %1274 = vst [vmem:[%s1740_s2 + $0x88] sm:$0xff] %v1226_v17  }
 0x10a   :  { %v449_v20 = vpop.f32.mrf.mxu0  ;;  %v553_v21 = vpop.f32.mrf.mxu1 }
 0x10c   :  { %v1352_v22 = vpop.f32.mrf.mxu0  ;;  %v1404_v23 = vpop.f32.mrf.mxu1 }
 0x10e   :  { %v452_v24 = vpop.f32.mrf.mxu0  ;;  %v556_v25 = vpop.f32.mrf.mxu1 }
 0x10f   :  { %v1166_v26 = vpack.c.bf16 %v452_v24, %v449_v20  ;;  %v1231_v27 = vpack.c.bf16 %v556_v25, %v553_v21 }
 0x110   :  { %v1353_v28 = vpop.f32.mrf.mxu0  ;;  %v1405_v29 = vpop.f32.mrf.mxu1 }
 0x111   :  { %1262 = vst [vmem:[%s1740_s2 + $0x28] sm:$0xff] %v1166_v26   ;;  %1275 = vst [vmem:[%s1740_s2 + $0x90] sm:$0xff] %v1231_v27  }
 0x112   :  { %v457_v30 = vpop.f32.mrf.mxu0  ;;  %v561_v31 = vpop.f32.mrf.mxu1 }
 0x114   :  { %v1356_v32 = vpop.f32.mrf.mxu0  ;;  %v1408_v33 = vpop.f32.mrf.mxu1 }
 0x116   :  { %v460_v34 = vpop.f32.mrf.mxu0  ;;  %v564_v35 = vpop.f32.mrf.mxu1 }
 0x117   :  { %v1171_v36 = vpack.c.bf16 %v460_v34, %v457_v30  ;;  %v1236_v37 = vpack.c.bf16 %v564_v35, %v561_v31 }
 0x118   :  { %v1357_v38 = vpop.f32.mrf.mxu0  ;;  %v1409_v39 = vpop.f32.mrf.mxu1 }
 0x119   :  { %1263 = vst [vmem:[%s1740_s2 + $0x30] sm:$0xff] %v1171_v36   ;;  %1276 = vst [vmem:[%s1740_s2 + $0x98] sm:$0xff] %v1236_v37  }
 0x11a   :  { %v465_v40 = vpop.f32.mrf.mxu0  ;;  %v569_v41 = vpop.f32.mrf.mxu1 }
 0x11c   :  { %v1360_v42 = vpop.f32.mrf.mxu0  ;;  %v1412_v43 = vpop.f32.mrf.mxu1 }
 0x11e   :  { %v468_v44 = vpop.f32.mrf.mxu0  ;;  %v572_v45 = vpop.f32.mrf.mxu1 }
 0x11f   :  { %v1176_v46 = vpack.c.bf16 %v468_v44, %v465_v40  ;;  %v1241_v47 = vpack.c.bf16 %v572_v45, %v569_v41 }
 0x120   :  { %v1361_v48 = vpop.f32.mrf.mxu0  ;;  %v1413_v49 = vpop.f32.mrf.mxu1 }
 0x121   :  { %1264 = vst [vmem:[%s1740_s2 + $0x38] sm:$0xff] %v1176_v46   ;;  %1277 = vst [vmem:[%s1740_s2 + $0xa0] sm:$0xff] %v1241_v47  }
 0x122   :  { %v473_v50 = vpop.f32.mrf.mxu0  ;;  %v577_v51 = vpop.f32.mrf.mxu1 }
 0x124   :  { %v1364_v52 = vpop.f32.mrf.mxu0  ;;  %v1416_v53 = vpop.f32.mrf.mxu1 }
 0x126   :  { %v476_v54 = vpop.f32.mrf.mxu0  ;;  %v580_v55 = vpop.f32.mrf.mxu1 }
 0x127   :  { %v1181_v56 = vpack.c.bf16 %v476_v54, %v473_v50  ;;  %v1246_v57 = vpack.c.bf16 %v580_v55, %v577_v51 }
 0x128   :  { %v1365_v58 = vpop.f32.mrf.mxu0  ;;  %v1417_v59 = vpop.f32.mrf.mxu1 }
 0x129   :  { %1265 = vst [vmem:[%s1740_s2 + $0x40] sm:$0xff] %v1181_v56   ;;  %1278 = vst [vmem:[%s1740_s2 + $0xa8] sm:$0xff] %v1246_v57  }
 0x12a   :  { %v481_v60 = vpop.f32.mrf.mxu0  ;;  %v585_v61 = vpop.f32.mrf.mxu1 }
 0x12c   :  { %v1368_v62 = vpop.f32.mrf.mxu0  ;;  %v1420_v63 = vpop.f32.mrf.mxu1 }
 0x12e   :  { %v484_v0 = vpop.f32.mrf.mxu0  ;;  %v588_v1 = vpop.f32.mrf.mxu1 }
 0x12f   :  { %v1186_v2 = vpack.c.bf16 %v484_v0, %v481_v60  ;;  %v1251_v3 = vpack.c.bf16 %v588_v1, %v585_v61 }
 0x130   :  { %v1369_v4 = vpop.f32.mrf.mxu0  ;;  %v1421_v5 = vpop.f32.mrf.mxu1 }
 0x131   :  { %1266 = vst [vmem:[%s1740_s2 + $0x48] sm:$0xff] %v1186_v2   ;;  %1279 = vst [vmem:[%s1740_s2 + $0xb0] sm:$0xff] %v1251_v3  }
 0x132   :  { %v489_v6 = vpop.f32.mrf.mxu0  ;;  %v593_v7 = vpop.f32.mrf.mxu1 }
 0x134   :  { %v1372_v8 = vpop.f32.mrf.mxu0  ;;  %v1424_v9 = vpop.f32.mrf.mxu1 }
 0x136   :  { %v492_v10 = vpop.f32.mrf.mxu0  ;;  %v596_v11 = vpop.f32.mrf.mxu1 }
 0x137   :  { %v1191_v12 = vpack.c.bf16 %v492_v10, %v489_v6  ;;  %v1256_v13 = vpack.c.bf16 %v596_v11, %v593_v7 }
 0x138   :  { %v1373_v14 = vpop.f32.mrf.mxu0  ;;  %v1425_v15 = vpop.f32.mrf.mxu1 }
 0x139   :  { %1267 = vst [vmem:[%s1740_s2 + $0x50] sm:$0xff] %v1191_v12   ;;  %1280 = vst [vmem:[%s1740_s2 + $0xb8] sm:$0xff] %v1256_v13  }
 0x13a   :  { %v497_v16 = vpop.f32.mrf.mxu0  ;;  %v601_v17 = vpop.f32.mrf.mxu1 }
 0x13b   :  { %v1137_v18 = vpack.c.bf16 %v601_v17, %v601_v17 }
 0x13c   :  { %v1376_v19 = vpop.f32.mrf.mxu0  ;;  %v1428_v20 = vpop.f32.mrf.mxu1 }
 0x13d   :  { %1002 = vst [vmem:[%s1740_s2 + $0xc0] sm:$0xf] %v1137_v18 }
 0x13e   :  { %v500_v21 = vpop.f32.mrf.mxu0  ;;  %v604_v22 = vpop.f32.mrf.mxu1 }
 0x13f   :  { %v1196_v23 = vpack.c.bf16 %v500_v21, %v497_v16 }
 0x140   :  { %v1377_v24 = vpop.f32.mrf.mxu0  ;;  %v1429_v25 = vpop.f32.mrf.mxu1 }
 0x141   :  { %1268 = vst [vmem:[%s1740_s2 + $0x58] sm:$0xff] %v1196_v23  }
 0x142   :  { %v505_v26 = vpop.f32.mrf.mxu0 }
 0x144   :  { %v1380_v27 = vpop.f32.mrf.mxu0 }
 0x146   :  { %v508_v28 = vpop.f32.mrf.mxu0 }
 0x147   :  { %v1201_v29 = vpack.c.bf16 %v508_v28, %v505_v26 }
 0x148   :  { %v1381_v30 = vpop.f32.mrf.mxu0 }
 0x149   :  { %1269 = vst [vmem:[%s1740_s2 + $0x60] sm:$0xff] %v1201_v29  }

// kernel: adaptive_pool_attention_forward.7
= control target key start
LH: loop header
LB: loop body
LE: loop exit
PB: predicated region body
PF: predicated region fallthrough
CT: control target
= control target key end

     0   :  { %s3706_s9 = smov 0   ;;  %s3708_s10 = smov 0   ;;  %s4234_s0 = inlined_call_operand.vmem [shape: bf16[32,7,7,8], index: 0, kind: input, shape index: {}]   ;;  %s4235_s1 = inlined_call_operand.vmem [shape: bf16[7,7,8,8], index: 1, kind: input, shape index: {}]   ;;  %s4236_s2 = inlined_call_operand.vmem [shape: bf16[32,1,1,8], index: 2, kind: output, shape index: {}]  }
   0x1   :  { %s3710_s11 = smov 0   ;;  %s3712_s12 = smov 0  }
   0x2   :  { %s3714_s13 = smov 0   ;;  %s3716_s14 = smov 0  }
   0x3   :  { %s3718_s15 = smov 0  }
   0x4 LB: > { %s24_s16 = sadd.s32 1, %s3678_s13  ;;  %s31_s17 = sadd.s32 1, %s3682_s14  ;;  %s3686_s15 = sphi %s3718_s15, %s12_s15   ;;  %s3682_s14 = sphi %s3716_s14, %s4244_s14   ;;  %s3678_s13 = sphi %s3714_s13, %s4243_s13   ;;  %s3674_s12 = sphi %s3712_s12, %s4242_s12   ;;  %s3670_s11 = sphi %s3710_s11, %s4241_s11   ;;  %s3666_s10 = sphi %s3708_s10, %s4240_s10   ;;  %s3662_s9 = sphi %s3706_s9, %s4239_s9  }
   0x5   : > { %p25_p0 = scmp.ge.s32.totalorder %s24_s16, 7  ;;  %p49_p1 = scmp.ne.s32.totalorder %s3666_s10, %s3662_s9 }
   0x6   : > { %p50_p2 = scmp.eq.s32.totalorder %s3686_s15, 0  ;;  %s42_s21 = sadd.s32 1, %s3666_s10 }
   0x7   : > { %s4246_s16 = smov (%p25_p0, %s24_s16), 0  ;;  %s4248_s17 = smov (!%p25_p0, %s31_s17), %s3682_s14 }
   0x8   : > { %p51_p3 = por %p50_p2, %p49_p1  ;;  %p33_p4 = scmp.ge.s32.totalorder %s4248_s17, 4 }
   0x9   : > { %s38_s18 = ssub.s32 %s3678_s13, %s4246_s16  ;;  %p3038_p6 = scmp.ge.s32.totalorder %s3686_s15, 28 }
   0xa   : > { %s4250_s17 = smov (%p33_p4, %s4248_s17), 0 }
   0xb   : > { %s37_s19 = ssub.s32 %s3682_s14, %s4250_s17  ;;  %129 = sbr.rel (%p3038_p6) target bundleno = 28 (0x1c), region = 16 }
   0xc   : > { %s39_s20 = sor.u32 %s38_s18, %s37_s19 }
   0xd   : > { %p40_p5 = scmp.eq.s32.totalorder %s39_s20, 0 }
   0xf   : > { %s3757_s22 = scalar_select %p40_p5, %s3666_s10, %s42_s21  }
  0x10   : > { %132 = sbr.rel (!%p51_p3) target bundleno = 28 (0x1c), region = 20  ;;  %s134_s23 = sand.u32 (%p51_p3), 1, %s3666_s10  }
  0x11   : > { %s3563_s24 = smul.u32 (%p51_p3), 56, %s3682_s14  ;;  %s3039_s25 = sshll.u32 (%p51_p3), %s134_s23, 5 }
  0x12   : > { %s136_s3 = scalar_lea.vmem (%p51_p3), [#allocation3], %s3039_s25 }
  0x13   : > { %s140_s26 = sadd.s32 (%p51_p3), %s3678_s13, %s3563_s24 }
  0x14   : > { %s3042_s27 = sshll.u32 (%p51_p3), %s140_s26, 2 }
  0x15   : > { %s142_s30 = scalar_lea.vmem %s4234_s0, %s3042_s27 }
  0x16   : > { %v159_v0 = vld [vmem:[%s142_s30] sm:$0xf]  ;;  %v161_v1 = vld [vmem:[%s142_s30 + $0x1c] sm:$0xf]  ;;  %v163_v2 = vld [vmem:[%s142_s30 + $0x38] sm:$0xf] }
  0x17   : > { %160 = vst [vmem:[%s136_s3] sm:$0xf] %v159_v0  ;;  %162 = vst [vmem:[%s136_s3 + $0x4] sm:$0xf] %v161_v1  ;;  %v165_v3 = vld [vmem:[%s142_s30 + $0x54] sm:$0xf] }
  0x18   : > { %164 = vst [vmem:[%s136_s3 + $0x8] sm:$0xf] %v163_v2  ;;  %v167_v4 = vld [vmem:[%s142_s30 + $0x70] sm:$0xf]  ;;  %v169_v5 = vld [vmem:[%s142_s30 + $0x8c] sm:$0xf] }
  0x19   : > { %166 = vst [vmem:[%s136_s3 + $0xc] sm:$0xf] %v165_v3  ;;  %168 = vst [vmem:[%s136_s3 + $0x10] sm:$0xf] %v167_v4  ;;  %v171_v6 = vld [vmem:[%s142_s30 + $0xa8] sm:$0xf] }
  0x1a   : > { %170 = vst [vmem:[%s136_s3 + $0x14] sm:$0xf] %v169_v5  ;;  %v173_v7 = vld [vmem:[%s142_s30 + $0xc4] sm:$0xf]  ;;  %172 = vst [vmem:[%s136_s3 + $0x18] sm:$0xf] %v171_v6 }
  0x1b   : > { %174 = vst [vmem:[%s136_s3 + $0x1c] sm:$0xf] %v173_v7 }
  0x1c PF: > { %p3043_p7 = scmp.ge.s32.totalorder %s3686_s15, 1  ;;  %p221_p8 = scmp.lt.s32.totalorder %s3686_s15, 29 }
  0x1e   : > { %p222_p9 = pnand %p3043_p7, %p221_p8 }
  0x1f   : > { %s228_s4 = sand.u32 (!%p222_p9), 1, %s3662_s9   ;;  %p258_p10 = scmp.lt.s32.totalorder (!%p222_p9), %s3670_s11, 6 }
  0x20   : > { %225 = sbr.rel (%p222_p9) target bundleno = 479 (0x1df), region = 65  ;;  %s3044_s5 = sshll.u32 (!%p222_p9), %s228_s4, 5 }
  0x21   : > { %s3046_s6 = sshll.u32 (!%p222_p9), %s3674_s12, 3  ;;  %s3782_s25 = scalar_lea.vmem (!%p222_p9), [#allocation3], %s3044_s5 }
  0x22   : > { %p264_p11 = scmp.lt.s32.totalorder (!%p222_p9), %s3046_s6, 31  ;;  %p3047_p12 = scmp.ne.s32.totalorder (!%p222_p9), %s3670_s11, 0 }
  0x25   : > { %s259_s7 = scalar_select %p258_p10, %s3670_s11, 6 }
  0x26   : > { %s4252_s6 = smov (!%p264_p11, %s3046_s6), 31  ;;  %275 = sbr.rel (%p3047_p12) target bundleno = 48 (0x30), region = 73 }
  0x27   : > { %s3564_s8 = smul.u32 28, %s259_s7  ;;  %s3775_s20 = scalar_lea.vmem %s4236_s2, %s4252_s6 }
  0x29   : > { %s3780_s24 = scalar_lea.vmem %s4235_s1, %s3564_s8 }
  0x2b   : > { %vm276_vm0 = vcmask 57344   ;;  %v3688_v8 = vmov 0.0  }
  0x2c   : > { %277 = vst.msk [vmem:[#allocation2] sm:$0x1] %vm276_vm0, %v3688_v8  ;;  %278 = vst.msk [vmem:[#allocation2 + $0x1] sm:$0x1] %vm276_vm0, %v3688_v8 }
  0x2d   : > { %279 = vst.msk [vmem:[#allocation2 + $0x2] sm:$0x1] %vm276_vm0, %v3688_v8  ;;  %280 = vst.msk [vmem:[#allocation2 + $0x3] sm:$0x1] %vm276_vm0, %v3688_v8 }
  0x2e   : > { %281 = vst.msk [vmem:[#allocation2 + $0x4] sm:$0x1] %vm276_vm0, %v3688_v8  ;;  %282 = vst.msk [vmem:[#allocation2 + $0x5] sm:$0x1] %vm276_vm0, %v3688_v8 }
  0x2f   : > { %283 = vst.msk [vmem:[#allocation2 + $0x6] sm:$0x1] %vm276_vm0, %v3688_v8  ;;  %284 = vst.msk [vmem:[#allocation2 + $0x7] sm:$0x1] %vm276_vm0, %v3688_v8 }
  0x30 PF: > { %v293_v9 = vld [vmem:[%s3780_s24] sm:$0xf]  ;;  %vm312_vm1 = vcmask 1043456   ;;  %v3689_v10 = vmov 0.0   ;;  %v285_v12 = vld [vmem:[%s3782_s25] sm:$0xf] }
  0x31   : > { %3227 = vmatprep.subr.bf16.mxu0 %v3689_v10  ;;  %3233 = vmatprep.subr.bf16.mxu1 %v3689_v10  ;;  %v314_v11 = vsel %vm312_vm1, %v293_v9, 0  ;;  %vm308_vm2 = vcmask 64512   ;;  %v286_v13 = vld [vmem:[%s3782_s25 + $0x4] sm:$0xf]  ;;  %vm3690_vm3 = vmmov 0   ;;  %v3829_v22 = vcombine.low %v285_v12, %v285_v12  ;;  %p3112_p13 = scmp.ne.s32.totalorder %s3670_s11, 6 }
  0x32   : > { %3228 = vmatpush3.bf16.msra.mxu0 %v314_v11  ;;  %3234 = vmatpush3.bf16.msra.mxu1 %v314_v11  ;;  %v287_v14 = vld [vmem:[%s3782_s25 + $0x8] sm:$0xf]  ;;  %v288_v15 = vld [vmem:[%s3782_s25 + $0xc] sm:$0xf]  ;;  %v289_v16 = vld [vmem:[%s3782_s25 + $0x10] sm:$0xf]  ;;  %v3831_v23 = vcombine.low %v286_v13, %v286_v13 }
  0x33   : > { %3229 = vmatprep.mubr.msk.bf16.mxu0 %vm3690_vm3, %v3689_v10  ;;  %3235 = vmatprep.mubr.msk.bf16.mxu1 %vm3690_vm3, %v3689_v10  ;;  %v290_v17 = vld [vmem:[%s3782_s25 + $0x14] sm:$0xf]  ;;  %v294_v18 = vld [vmem:[%s3780_s24 + $0x4] sm:$0xf]  ;;  %v291_v19 = vld [vmem:[%s3782_s25 + $0x18] sm:$0xf]  ;;  %v3847_v26 = vcombine.low %v287_v14, %v287_v14  ;;  %v3849_v27 = vcombine.low %v288_v15, %v288_v15  ;;  %v3867_v30 = vcombine.low %v289_v16, %v289_v16 }
  0x34   : > { %3239 = vmatprep.subr.bf16.mxu0 %v3689_v10  ;;  %3245 = vmatprep.subr.bf16.mxu1 %v3689_v10  ;;  %v292_v20 = vld [vmem:[%s3782_s25 + $0x1c] sm:$0xf]  ;;  %v675_v21 = vsel %vm312_vm1, %v294_v18, 0  ;;  %v3842_v24 = vshrl.u32 %v3829_v22, 16  ;;  %v3845_v25 = vshrl.u32 %v3831_v23, 16  ;;  %v3869_v31 = vcombine.low %v290_v17, %v290_v17 }
  0x35   : > { %3230 = vmatmul.mubr.msk.bf16.vlgmr.msra.gmra.mxu0 %vm308_vm2, %v285_v12  ;;  %3236 = vmatmul.mubr.msk.bf16.vlgmr.msra.gmra.mxu1 %vm308_vm2, %v286_v13  ;;  %v3862_v28 = vshrl.u32 %v3847_v26, 16  ;;  %v3865_v29 = vshrl.u32 %v3849_v27, 16  ;;  %v3882_v32 = vshrl.u32 %v3867_v30, 16  ;;  %v3887_v34 = vcombine.low %v291_v19, %v291_v19  ;;  %v295_v36 = vld [vmem:[%s3780_s24 + $0x8] sm:$0xf] }
  0x36   : > { %3240 = vmatpush3.bf16.msra.mxu0 %v314_v11  ;;  %3246 = vmatpush3.bf16.msra.mxu1 %v314_v11  ;;  %v3885_v33 = vshrl.u32 %v3869_v31, 16  ;;  %v3889_v35 = vcombine.low %v292_v20, %v292_v20  ;;  %v1073_v39 = vsel %vm312_vm1, %v295_v36, 0  ;;  %v1068_v40 = vrot.slane %v3829_v22, 1  ;;  %v296_v46 = vld [vmem:[%s3780_s24 + $0xc] sm:$0xf] }
  0x37   : > { %3241 = vmatprep.mubr.msk.bf16.mxu0 %vm3690_vm3, %v3689_v10  ;;  %3247 = vmatprep.mubr.msk.bf16.mxu1 %vm3690_vm3, %v3689_v10  ;;  %v3903_v37 = vshrl.u32 %v3887_v34, 16  ;;  %v1115_v41 = vrot.slane %v3831_v23, 1  ;;  %v1159_v42 = vrot.slane %v3847_v26, 1  ;;  %v1203_v43 = vrot.slane %v3849_v27, 1  ;;  %v297_v56 = vld [vmem:[%s3780_s24 + $0x10] sm:$0xf] }
  0x38   : > { %3251 = vmatprep.subr.bf16.mxu0 %v3689_v10  ;;  %3257 = vmatprep.subr.bf16.mxu1 %v3689_v10  ;;  %v3906_v38 = vshrl.u32 %v3889_v35, 16  ;;  %v1247_v44 = vrot.slane %v3867_v30, 1  ;;  %v1291_v45 = vrot.slane %v3869_v31, 1  ;;  %v1335_v47 = vrot.slane %v3887_v34, 1  ;;  %v298_v2 = vld [vmem:[%s3780_s24 + $0x14] sm:$0xf] }
  0x39   : > { %v1379_v48 = vrot.slane %v3889_v35, 1  ;;  %v1436_v49 = vsel %vm312_vm1, %v296_v46, 0  ;;  %v1431_v50 = vrot.slane %v3842_v24, 1  ;;  %v1478_v51 = vrot.slane %v3845_v25, 1  ;;  %v299_v13 = vld [vmem:[%s3780_s24 + $0x18] sm:$0xf] }
  0x3a   : > { %v1522_v52 = vrot.slane %v3862_v28, 1  ;;  %v1566_v53 = vrot.slane %v3865_v29, 1  ;;  %v1610_v54 = vrot.slane %v3882_v32, 1  ;;  %v1654_v55 = vrot.slane %v3885_v33, 1 }
  0x3b   : > { %v1698_v57 = vrot.slane %v3903_v37, 1  ;;  %v1742_v58 = vrot.slane %v3906_v38, 1  ;;  %v1799_v59 = vsel %vm312_vm1, %v297_v56, 0  ;;  %v1794_v60 = vrot.slane %v3829_v22, 2  ;;  %v301_v56 = vld [vmem:[#allocation2 + $0x1] sm:$0x1] }
  0x3c   : > { %v1841_v61 = vrot.slane %v3831_v23, 2  ;;  %v1885_v62 = vrot.slane %v3847_v26, 2  ;;  %v1929_v63 = vrot.slane %v3849_v27, 2  ;;  %v1973_v0 = vrot.slane %v3867_v30, 2 }
  0x3d   : > { %3242 = vmatmul.mubr.msk.bf16.vlgmr.msra.gmra.mxu0 %vm308_vm2, %v287_v14  ;;  %3248 = vmatmul.mubr.msk.bf16.vlgmr.msra.gmra.mxu1 %vm308_vm2, %v288_v15  ;;  %v2017_v1 = vrot.slane %v3869_v31, 2  ;;  %v2061_v3 = vrot.slane %v3887_v34, 2  ;;  %v2105_v4 = vrot.slane %v3889_v35, 2  ;;  %v2162_v5 = vsel %vm312_vm1, %v298_v2, 0  ;;  %v302_v2 = vld [vmem:[#allocation2 + $0x2] sm:$0x1] }
  0x3e   : > { %3252 = vmatpush3.bf16.msra.mxu0 %v314_v11  ;;  %3258 = vmatpush3.bf16.msra.mxu1 %v314_v11  ;;  %v2157_v6 = vrot.slane %v3842_v24, 2  ;;  %v2204_v7 = vrot.slane %v3845_v25, 2  ;;  %v2248_v8 = vrot.slane %v3862_v28, 2  ;;  %v2292_v9 = vrot.slane %v3865_v29, 2 }
  0x3f   : > { %3253 = vmatprep.mubr.msk.bf16.mxu0 %vm3690_vm3, %v3689_v10  ;;  %3259 = vmatprep.mubr.msk.bf16.mxu1 %vm3690_vm3, %v3689_v10  ;;  %v2380_v12 = vrot.slane %v3885_v33, 2  ;;  %v2424_v14 = vrot.slane %v3903_v37, 2  ;;  %v2468_v15 = vrot.slane %v3906_v38, 2  ;;  %v2567_v18 = vrot.slane %v3831_v23, 3 }
  0x40   : > { %3263 = vmatprep.subr.bf16.mxu0 %v3689_v10  ;;  %3269 = vmatprep.subr.bf16.mxu1 %v3689_v10  ;;  %vm2883_vm4 = vcmask 57344  }
  0x45   : > { %3254 = vmatmul.mubr.msk.bf16.vlgmr.msra.gmra.mxu0 %vm308_vm2, %v289_v16  ;;  %3260 = vmatmul.mubr.msk.bf16.vlgmr.msra.gmra.mxu1 %vm308_vm2, %v290_v17  ;;  %v2525_v16 = vsel %vm312_vm1, %v299_v13, 0  ;;  %v2520_v17 = vrot.slane %v3829_v22, 3 }
  0x46   : > { %3264 = vmatpush3.bf16.msra.mxu0 %v314_v11  ;;  %3270 = vmatpush3.bf16.msra.mxu1 %v314_v11  ;;  %v2336_v11 = vrot.slane %v3882_v32, 2 }
  0x47   : > { %3265 = vmatprep.mubr.msk.bf16.mxu0 %vm3690_vm3, %v3689_v10  ;;  %3271 = vmatprep.mubr.msk.bf16.mxu1 %vm3690_vm3, %v3689_v10 }
  0x48   : > { %3275 = vmatprep.subr.bf16.mxu0 %v3689_v10  ;;  %3281 = vmatprep.subr.bf16.mxu1 %v3689_v10 }
  0x4d   : > { %3266 = vmatmul.mubr.msk.bf16.vlgmr.msra.gmra.mxu0 %vm308_vm2, %v291_v19  ;;  %3272 = vmatmul.mubr.msk.bf16.vlgmr.msra.gmra.mxu1 %vm308_vm2, %v292_v20 }
  0x4e   : > { %3276 = vmatpush3.bf16.msra.mxu0 %v675_v21  ;;  %3282 = vmatpush3.bf16.msra.mxu1 %v675_v21 }
  0x4f   : > { %3277 = vmatprep.mubr.msk.bf16.mxu0 %vm3690_vm3, %v3689_v10  ;;  %3283 = vmatprep.mubr.msk.bf16.mxu1 %vm3690_vm3, %v3689_v10 }
  0x50   : > { %3287 = vmatprep.subr.bf16.mxu0 %v3689_v10  ;;  %3293 = vmatprep.subr.bf16.mxu1 %v3689_v10 }
  0x55   : > { %3278 = vmatmul.mubr.msk.bf16.vlgmr.msra.gmra.mxu0 %vm308_vm2, %v3842_v24  ;;  %3284 = vmatmul.mubr.msk.bf16.vlgmr.msra.gmra.mxu1 %vm308_vm2, %v3845_v25  ;;  %v2611_v25 = vrot.slane %v3847_v26, 3 }
  0x56   : > { %3288 = vmatpush3.bf16.msra.mxu0 %v675_v21  ;;  %3294 = vmatpush3.bf16.msra.mxu1 %v675_v21 }
  0x57   : > { %3289 = vmatprep.mubr.msk.bf16.mxu0 %vm3690_vm3, %v3689_v10  ;;  %3295 = vmatprep.mubr.msk.bf16.mxu1 %vm3690_vm3, %v3689_v10 }
  0x58   : > { %3299 = vmatprep.subr.bf16.mxu0 %v3689_v10  ;;  %3305 = vmatprep.subr.bf16.mxu1 %v3689_v10 }
  0x5d   : > { %3290 = vmatmul.mubr.msk.bf16.vlgmr.msra.gmra.mxu0 %vm308_vm2, %v3862_v28  ;;  %3296 = vmatmul.mubr.msk.bf16.vlgmr.msra.gmra.mxu1 %vm308_vm2, %v3865_v29  ;;  %v2655_v28 = vrot.slane %v3849_v27, 3 }
  0x5e   : > { %3300 = vmatpush3.bf16.msra.mxu0 %v675_v21  ;;  %3306 = vmatpush3.bf16.msra.mxu1 %v675_v21 }
  0x5f   : > { %3301 = vmatprep.mubr.msk.bf16.mxu0 %vm3690_vm3, %v3689_v10  ;;  %3307 = vmatprep.mubr.msk.bf16.mxu1 %vm3690_vm3, %v3689_v10 }
  0x60   : > { %3311 = vmatprep.subr.bf16.mxu0 %v3689_v10  ;;  %3317 = vmatprep.subr.bf16.mxu1 %v3689_v10 }
  0x65   : > { %3302 = vmatmul.mubr.msk.bf16.vlgmr.msra.gmra.mxu0 %vm308_vm2, %v3882_v32  ;;  %3308 = vmatmul.mubr.msk.bf16.vlgmr.msra.gmra.mxu1 %vm308_vm2, %v3885_v33 }
  0x66   : > { %3312 = vmatpush3.bf16.msra.mxu0 %v675_v21  ;;  %3318 = vmatpush3.bf16.msra.mxu1 %v675_v21 }
  0x67   : > { %3313 = vmatprep.mubr.msk.bf16.mxu0 %vm3690_vm3, %v3689_v10  ;;  %3319 = vmatprep.mubr.msk.bf16.mxu1 %vm3690_vm3, %v3689_v10 }
  0x68   : > { %3323 = vmatprep.subr.bf16.mxu0 %v3689_v10  ;;  %3329 = vmatprep.subr.bf16.mxu1 %v3689_v10 }
  0x6d   : > { %3314 = vmatmul.mubr.msk.bf16.vlgmr.msra.gmra.mxu0 %vm308_vm2, %v3903_v37  ;;  %3320 = vmatmul.mubr.msk.bf16.vlgmr.msra.gmra.mxu1 %vm308_vm2, %v3906_v38 }
  0x6e   : > { %3324 = vmatpush3.bf16.msra.mxu0 %v1073_v39  ;;  %3330 = vmatpush3.bf16.msra.mxu1 %v1073_v39 }
  0x6f   : > { %3325 = vmatprep.mubr.msk.bf16.mxu0 %vm3690_vm3, %v3689_v10  ;;  %3331 = vmatprep.mubr.msk.bf16.mxu1 %vm3690_vm3, %v3689_v10 }
  0x70   : > { %3335 = vmatprep.subr.bf16.mxu0 %v3689_v10  ;;  %3341 = vmatprep.subr.bf16.mxu1 %v3689_v10 }
  0x75   : > { %3326 = vmatmul.mubr.msk.bf16.vlgmr.msra.gmra.mxu0 %vm308_vm2, %v1068_v40  ;;  %3332 = vmatmul.mubr.msk.bf16.vlgmr.msra.gmra.mxu1 %vm308_vm2, %v1115_v41  ;;  %v2743_v40 = vrot.slane %v3869_v31, 3 }
  0x76   : > { %3336 = vmatpush3.bf16.msra.mxu0 %v1073_v39  ;;  %3342 = vmatpush3.bf16.msra.mxu1 %v1073_v39 }
  0x77   : > { %3337 = vmatprep.mubr.msk.bf16.mxu0 %vm3690_vm3, %v3689_v10  ;;  %3343 = vmatprep.mubr.msk.bf16.mxu1 %vm3690_vm3, %v3689_v10 }
  0x78   : > { %3347 = vmatprep.subr.bf16.mxu0 %v3689_v10  ;;  %3353 = vmatprep.subr.bf16.mxu1 %v3689_v10 }
  0x7d   : > { %3338 = vmatmul.mubr.msk.bf16.vlgmr.msra.gmra.mxu0 %vm308_vm2, %v1159_v42  ;;  %3344 = vmatmul.mubr.msk.bf16.vlgmr.msra.gmra.mxu1 %vm308_vm2, %v1203_v43 }
  0x7e   : > { %3348 = vmatpush3.bf16.msra.mxu0 %v1073_v39  ;;  %3354 = vmatpush3.bf16.msra.mxu1 %v1073_v39 }
  0x7f   : > { %3349 = vmatprep.mubr.msk.bf16.mxu0 %vm3690_vm3, %v3689_v10  ;;  %3355 = vmatprep.mubr.msk.bf16.mxu1 %vm3690_vm3, %v3689_v10 }
  0x80   : > { %3359 = vmatprep.subr.bf16.mxu0 %v3689_v10  ;;  %3365 = vmatprep.subr.bf16.mxu1 %v3689_v10 }
  0x85   : > { %3350 = vmatmul.mubr.msk.bf16.vlgmr.msra.gmra.mxu0 %vm308_vm2, %v1247_v44  ;;  %3356 = vmatmul.mubr.msk.bf16.vlgmr.msra.gmra.mxu1 %vm308_vm2, %v1291_v45 }
  0x86   : > { %3360 = vmatpush3.bf16.msra.mxu0 %v1073_v39  ;;  %3366 = vmatpush3.bf16.msra.mxu1 %v1073_v39  ;;  %v2699_v39 = vrot.slane %v3867_v30, 3 }
  0x87   : > { %3361 = vmatprep.mubr.msk.bf16.mxu0 %vm3690_vm3, %v3689_v10  ;;  %3367 = vmatprep.mubr.msk.bf16.mxu1 %vm3690_vm3, %v3689_v10 }
  0x88   : > { %3371 = vmatprep.subr.bf16.mxu0 %v3689_v10  ;;  %3377 = vmatprep.subr.bf16.mxu1 %v3689_v10 }
  0x8d   : > { %3362 = vmatmul.mubr.msk.bf16.vlgmr.msra.gmra.mxu0 %vm308_vm2, %v1335_v47  ;;  %3368 = vmatmul.mubr.msk.bf16.vlgmr.msra.gmra.mxu1 %vm308_vm2, %v1379_v48  ;;  %v2787_v47 = vrot.slane %v3887_v34, 3  ;;  %v2831_v48 = vrot.slane %v3889_v35, 3 }
  0x8e   : > { %3372 = vmatpush3.bf16.msra.mxu0 %v1436_v49  ;;  %3378 = vmatpush3.bf16.msra.mxu1 %v1436_v49 }
  0x8f   : > { %3373 = vmatprep.mubr.msk.bf16.mxu0 %vm3690_vm3, %v3689_v10  ;;  %3379 = vmatprep.mubr.msk.bf16.mxu1 %vm3690_vm3, %v3689_v10 }
  0x90   : > { %3383 = vmatprep.subr.bf16.mxu0 %v3689_v10  ;;  %3389 = vmatprep.subr.bf16.mxu1 %v3689_v10 }
  0x95   : > { %3374 = vmatmul.mubr.msk.bf16.vlgmr.msra.gmra.mxu0 %vm308_vm2, %v1431_v50  ;;  %3380 = vmatmul.mubr.msk.bf16.vlgmr.msra.gmra.mxu1 %vm308_vm2, %v1478_v51 }
  0x96   : > { %3384 = vmatpush3.bf16.msra.mxu0 %v1436_v49  ;;  %3390 = vmatpush3.bf16.msra.mxu1 %v1436_v49 }
  0x97   : > { %3385 = vmatprep.mubr.msk.bf16.mxu0 %vm3690_vm3, %v3689_v10  ;;  %3391 = vmatprep.mubr.msk.bf16.mxu1 %vm3690_vm3, %v3689_v10 }
  0x98   : > { %3395 = vmatprep.subr.bf16.mxu0 %v3689_v10  ;;  %3401 = vmatprep.subr.bf16.mxu1 %v3689_v10 }
  0x9d   : > { %3386 = vmatmul.mubr.msk.bf16.vlgmr.msra.gmra.mxu0 %vm308_vm2, %v1522_v52  ;;  %3392 = vmatmul.mubr.msk.bf16.vlgmr.msra.gmra.mxu1 %vm308_vm2, %v1566_v53 }
  0x9e   : > { %3396 = vmatpush3.bf16.msra.mxu0 %v1436_v49  ;;  %3402 = vmatpush3.bf16.msra.mxu1 %v1436_v49 }
  0x9f   : > { %3397 = vmatprep.mubr.msk.bf16.mxu0 %vm3690_vm3, %v3689_v10  ;;  %3403 = vmatprep.mubr.msk.bf16.mxu1 %vm3690_vm3, %v3689_v10 }
  0xa0   : > { %3407 = vmatprep.subr.bf16.mxu0 %v3689_v10  ;;  %3413 = vmatprep.subr.bf16.mxu1 %v3689_v10 }
  0xa5   : > { %3398 = vmatmul.mubr.msk.bf16.vlgmr.msra.gmra.mxu0 %vm308_vm2, %v1610_v54  ;;  %3404 = vmatmul.mubr.msk.bf16.vlgmr.msra.gmra.mxu1 %vm308_vm2, %v1654_v55  ;;  %v300_v55 = vld [vmem:[#allocation2] sm:$0x1] }
  0xa6   : > { %3408 = vmatpush3.bf16.msra.mxu0 %v1436_v49  ;;  %3414 = vmatpush3.bf16.msra.mxu1 %v1436_v49 }
  0xa7   : > { %3409 = vmatprep.mubr.msk.bf16.mxu0 %vm3690_vm3, %v3689_v10  ;;  %3415 = vmatprep.mubr.msk.bf16.mxu1 %vm3690_vm3, %v3689_v10 }
  0xa8   : > { %3419 = vmatprep.subr.bf16.mxu0 %v3689_v10  ;;  %3425 = vmatprep.subr.bf16.mxu1 %v3689_v10 }
  0xad   : > { %3410 = vmatmul.mubr.msk.bf16.vlgmr.msra.gmra.mxu0 %vm308_vm2, %v1698_v57  ;;  %3416 = vmatmul.mubr.msk.bf16.vlgmr.msra.gmra.mxu1 %vm308_vm2, %v1742_v58 }
  0xae   : > { %3420 = vmatpush3.bf16.msra.mxu0 %v1799_v59  ;;  %3426 = vmatpush3.bf16.msra.mxu1 %v1799_v59 }
  0xaf   : > { %3421 = vmatprep.mubr.msk.bf16.mxu0 %vm3690_vm3, %v3689_v10  ;;  %3427 = vmatprep.mubr.msk.bf16.mxu1 %vm3690_vm3, %v3689_v10 }
  0xb0   : > { %3431 = vmatprep.subr.bf16.mxu0 %v3689_v10  ;;  %3437 = vmatprep.subr.bf16.mxu1 %v3689_v10 }
  0xb5   : > { %3422 = vmatmul.mubr.msk.bf16.vlgmr.msra.gmra.mxu0 %vm308_vm2, %v1794_v60  ;;  %3428 = vmatmul.mubr.msk.bf16.vlgmr.msra.gmra.mxu1 %vm308_vm2, %v1841_v61 }
  0xb6   : > { %3432 = vmatpush3.bf16.msra.mxu0 %v1799_v59  ;;  %3438 = vmatpush3.bf16.msra.mxu1 %v1799_v59 }
  0xb7   : > { %3433 = vmatprep.mubr.msk.bf16.mxu0 %vm3690_vm3, %v3689_v10  ;;  %3439 = vmatprep.mubr.msk.bf16.mxu1 %vm3690_vm3, %v3689_v10 }
  0xb8   : > { %3443 = vmatprep.subr.bf16.mxu0 %v3689_v10  ;;  %3449 = vmatprep.subr.bf16.mxu1 %v3689_v10 }
  0xbd   : > { %3434 = vmatmul.mubr.msk.bf16.vlgmr.msra.gmra.mxu0 %vm308_vm2, %v1885_v62  ;;  %3440 = vmatmul.mubr.msk.bf16.vlgmr.msra.gmra.mxu1 %vm308_vm2, %v1929_v63 }
  0xbe   : > { %3444 = vmatpush3.bf16.msra.mxu0 %v1799_v59  ;;  %3450 = vmatpush3.bf16.msra.mxu1 %v1799_v59 }
  0xbf   : > { %3445 = vmatprep.mubr.msk.bf16.mxu0 %vm3690_vm3, %v3689_v10  ;;  %3451 = vmatprep.mubr.msk.bf16.mxu1 %vm3690_vm3, %v3689_v10 }
  0xc0   : > { %3455 = vmatprep.subr.bf16.mxu0 %v3689_v10  ;;  %3461 = vmatprep.subr.bf16.mxu1 %v3689_v10 }
  0xc5   : > { %3446 = vmatmul.mubr.msk.bf16.vlgmr.msra.gmra.mxu0 %vm308_vm2, %v1973_v0  ;;  %3452 = vmatmul.mubr.msk.bf16.vlgmr.msra.gmra.mxu1 %vm308_vm2, %v2017_v1 }
  0xc6   : > { %3456 = vmatpush3.bf16.msra.mxu0 %v1799_v59  ;;  %3462 = vmatpush3.bf16.msra.mxu1 %v1799_v59 }
  0xc7   : > { %3457 = vmatprep.mubr.msk.bf16.mxu0 %vm3690_vm3, %v3689_v10  ;;  %3463 = vmatprep.mubr.msk.bf16.mxu1 %vm3690_vm3, %v3689_v10 }
  0xc8   : > { %3467 = vmatprep.subr.bf16.mxu0 %v3689_v10  ;;  %3473 = vmatprep.subr.bf16.mxu1 %v3689_v10 }
  0xcd   : > { %3458 = vmatmul.mubr.msk.bf16.vlgmr.msra.gmra.mxu0 %vm308_vm2, %v2061_v3  ;;  %3464 = vmatmul.mubr.msk.bf16.vlgmr.msra.gmra.mxu1 %vm308_vm2, %v2105_v4  ;;  %v303_v3 = vld [vmem:[#allocation2 + $0x3] sm:$0x1] }
  0xce   : > { %3468 = vmatpush3.bf16.msra.mxu0 %v2162_v5  ;;  %3474 = vmatpush3.bf16.msra.mxu1 %v2162_v5 }
  0xcf   : > { %3469 = vmatprep.mubr.msk.bf16.mxu0 %vm3690_vm3, %v3689_v10  ;;  %3475 = vmatprep.mubr.msk.bf16.mxu1 %vm3690_vm3, %v3689_v10 }
  0xd0   : > { %3479 = vmatprep.subr.bf16.mxu0 %v3689_v10  ;;  %3485 = vmatprep.subr.bf16.mxu1 %v3689_v10 }
  0xd5   : > { %3470 = vmatmul.mubr.msk.bf16.vlgmr.msra.gmra.mxu0 %vm308_vm2, %v2157_v6  ;;  %3476 = vmatmul.mubr.msk.bf16.vlgmr.msra.gmra.mxu1 %vm308_vm2, %v2204_v7 }
  0xd6   : > { %3480 = vmatpush3.bf16.msra.mxu0 %v2162_v5  ;;  %3486 = vmatpush3.bf16.msra.mxu1 %v2162_v5 }
  0xd7   : > { %3481 = vmatprep.mubr.msk.bf16.mxu0 %vm3690_vm3, %v3689_v10  ;;  %3487 = vmatprep.mubr.msk.bf16.mxu1 %vm3690_vm3, %v3689_v10 }
  0xd8   : > { %3491 = vmatprep.subr.bf16.mxu0 %v3689_v10  ;;  %3497 = vmatprep.subr.bf16.mxu1 %v3689_v10 }
  0xdd   : > { %3482 = vmatmul.mubr.msk.bf16.vlgmr.msra.gmra.mxu0 %vm308_vm2, %v2248_v8  ;;  %3488 = vmatmul.mubr.msk.bf16.vlgmr.msra.gmra.mxu1 %vm308_vm2, %v2292_v9 }
  0xde   : > { %3492 = vmatpush3.bf16.msra.mxu0 %v2162_v5  ;;  %3498 = vmatpush3.bf16.msra.mxu1 %v2162_v5 }
  0xdf   : > { %3493 = vmatprep.mubr.msk.bf16.mxu0 %vm3690_vm3, %v3689_v10  ;;  %3499 = vmatprep.mubr.msk.bf16.mxu1 %vm3690_vm3, %v3689_v10 }
  0xe0   : > { %3503 = vmatprep.subr.bf16.mxu0 %v3689_v10  ;;  %3509 = vmatprep.subr.bf16.mxu1 %v3689_v10 }
  0xe5   : > { %3494 = vmatmul.mubr.msk.bf16.vlgmr.msra.gmra.mxu0 %vm308_vm2, %v2336_v11  ;;  %3500 = vmatmul.mubr.msk.bf16.vlgmr.msra.gmra.mxu1 %vm308_vm2, %v2380_v12 }
  0xe6   : > { %3504 = vmatpush3.bf16.msra.mxu0 %v2162_v5  ;;  %3510 = vmatpush3.bf16.msra.mxu1 %v2162_v5 }
  0xe7   : > { %3505 = vmatprep.mubr.msk.bf16.mxu0 %vm3690_vm3, %v3689_v10  ;;  %3511 = vmatprep.mubr.msk.bf16.mxu1 %vm3690_vm3, %v3689_v10 }
  0xe8   : > { %3515 = vmatprep.subr.bf16.mxu0 %v3689_v10  ;;  %3521 = vmatprep.subr.bf16.mxu1 %v3689_v10 }
  0xed   : > { %3506 = vmatmul.mubr.msk.bf16.vlgmr.msra.gmra.mxu0 %vm308_vm2, %v2424_v14  ;;  %3512 = vmatmul.mubr.msk.bf16.vlgmr.msra.gmra.mxu1 %vm308_vm2, %v2468_v15 }
  0xee   : > { %3516 = vmatpush3.bf16.msra.mxu0 %v2525_v16  ;;  %3522 = vmatpush3.bf16.msra.mxu1 %v2525_v16 }
  0xef   : > { %3517 = vmatprep.mubr.msk.bf16.mxu0 %vm3690_vm3, %v3689_v10  ;;  %3523 = vmatprep.mubr.msk.bf16.mxu1 %vm3690_vm3, %v3689_v10 }
  0xf0   : > { %3527 = vmatprep.subr.bf16.mxu0 %v3689_v10  ;;  %3533 = vmatprep.subr.bf16.mxu1 %v3689_v10 }
  0xf5   : > { %v4089_v19 = vpop.f32.mrf.mxu0  ;;  %v4091_v20 = vpop.f32.mrf.mxu1  ;;  %3518 = vmatmul.mubr.msk.bf16.vlgmr.msra.gmra.mxu0 %vm308_vm2, %v2520_v17  ;;  %3524 = vmatmul.mubr.msk.bf16.vlgmr.msra.gmra.mxu1 %vm308_vm2, %v2567_v18  ;;  %v304_v17 = vld [vmem:[#allocation2 + $0x4] sm:$0x1]  ;;  %v305_v18 = vld [vmem:[#allocation2 + $0x5] sm:$0x1] }
  0xf6   : > { %3528 = vmatpush3.bf16.msra.mxu0 %v2525_v16  ;;  %3534 = vmatpush3.bf16.msra.mxu1 %v2525_v16  ;;  %v657_v34 = vadd.f32 %v4089_v19, %v300_v55  ;;  %v658_v35 = vadd.f32 %v4091_v20, %v301_v56 }
  0xf7   : > { %v3231_v21 = vpop.f32.mrf.mxu0  ;;  %v3237_v24 = vpop.f32.mrf.mxu1  ;;  %3529 = vmatprep.mubr.msk.bf16.mxu0 %vm3690_vm3, %v3689_v10  ;;  %3535 = vmatprep.mubr.msk.bf16.mxu1 %vm3690_vm3, %v3689_v10 }
  0xf8   : > { %3539 = vmatprep.subr.bf16.mxu0 %v3689_v10  ;;  %3545 = vmatprep.subr.bf16.mxu1 %v3689_v10 }
  0xf9   : > { %v353_v22 = vpop.f32.mrf.mxu0  ;;  %v396_v23 = vpop.f32.mrf.mxu1 }
  0xfb   : > { %v3232_v29 = vpop.f32.mrf.mxu0  ;;  %v3238_v32 = vpop.f32.mrf.mxu1 }
  0xfd   : > { %v436_v33 = vpop.f32.mrf.mxu0  ;;  %v479_v36 = vpop.f32.mrf.mxu1  ;;  %3530 = vmatmul.mubr.msk.bf16.vlgmr.msra.gmra.mxu0 %vm308_vm2, %v2611_v25  ;;  %3536 = vmatmul.mubr.msk.bf16.vlgmr.msra.gmra.mxu1 %vm308_vm2, %v2655_v28 }
  0xfe   : > { %3540 = vmatpush3.bf16.msra.mxu0 %v2525_v16  ;;  %3546 = vmatpush3.bf16.msra.mxu1 %v2525_v16  ;;  %v659_v8 = vadd.f32 %v436_v33, %v302_v2  ;;  %v660_v9 = vadd.f32 %v479_v36, %v303_v3 }
  0xff   : > { %v3243_v37 = vpop.f32.mrf.mxu0  ;;  %v3249_v38 = vpop.f32.mrf.mxu1  ;;  %3541 = vmatprep.mubr.msk.bf16.mxu0 %vm3690_vm3, %v3689_v10  ;;  %3547 = vmatprep.mubr.msk.bf16.mxu1 %vm3690_vm3, %v3689_v10 }
 0x100   : > { %3551 = vmatprep.subr.bf16.mxu0 %v3689_v10  ;;  %3557 = vmatprep.subr.bf16.mxu1 %v3689_v10  ;;  %v306_v37 = vld [vmem:[#allocation2 + $0x6] sm:$0x1]  ;;  %v307_v38 = vld [vmem:[#allocation2 + $0x7] sm:$0x1] }
 0x101   : > { %v439_v26 = vpop.f32.mrf.mxu0  ;;  %v482_v27 = vpop.f32.mrf.mxu1 }
 0x103   : > { %v3244_v41 = vpop.f32.mrf.mxu0  ;;  %v3250_v42 = vpop.f32.mrf.mxu1 }
 0x105   : > { %v522_v43 = vpop.f32.mrf.mxu0  ;;  %v565_v44 = vpop.f32.mrf.mxu1  ;;  %3542 = vmatmul.mubr.msk.bf16.vlgmr.msra.gmra.mxu0 %vm308_vm2, %v2699_v39  ;;  %3548 = vmatmul.mubr.msk.bf16.vlgmr.msra.gmra.mxu1 %vm308_vm2, %v2743_v40 }
 0x106   : > { %3552 = vmatpush3.bf16.msra.mxu0 %v2525_v16  ;;  %3558 = vmatpush3.bf16.msra.mxu1 %v2525_v16  ;;  %v661_v22 = vadd.f32 %v522_v43, %v304_v17  ;;  %v662_v23 = vadd.f32 %v565_v44, %v305_v18 }
 0x107   : > { %v3255_v45 = vpop.f32.mrf.mxu0  ;;  %v3261_v46 = vpop.f32.mrf.mxu1  ;;  %3553 = vmatprep.mubr.msk.bf16.mxu0 %vm3690_vm3, %v3689_v10  ;;  %3559 = vmatprep.mubr.msk.bf16.mxu1 %vm3690_vm3, %v3689_v10 }
 0x109   : > { %v525_v30 = vpop.f32.mrf.mxu0  ;;  %v568_v31 = vpop.f32.mrf.mxu1 }
 0x10b   : > { %v3256_v49 = vpop.f32.mrf.mxu0  ;;  %v3262_v50 = vpop.f32.mrf.mxu1 }
 0x10d   : > { %v608_v51 = vpop.f32.mrf.mxu0  ;;  %v651_v52 = vpop.f32.mrf.mxu1  ;;  %3554 = vmatmul.mubr.msk.bf16.vlgmr.msra.gmra.mxu0 %vm308_vm2, %v2787_v47  ;;  %3560 = vmatmul.mubr.msk.bf16.vlgmr.msra.gmra.mxu1 %vm308_vm2, %v2831_v48 }
 0x10e   : > { %v663_v41 = vadd.f32 %v608_v51, %v306_v37  ;;  %v664_v42 = vadd.f32 %v651_v52, %v307_v38 }
 0x10f   : > { %v3267_v53 = vpop.f32.mrf.mxu0  ;;  %v3273_v54 = vpop.f32.mrf.mxu1 }
 0x111   : > { %v611_v57 = vpop.f32.mrf.mxu0  ;;  %v654_v10 = vpop.f32.mrf.mxu1 }
 0x113   : > { %v3268_v58 = vpop.f32.mrf.mxu0  ;;  %v3274_v59 = vpop.f32.mrf.mxu1 }
 0x115   : > { %v711_v60 = vpop.f32.mrf.mxu0  ;;  %v760_v61 = vpop.f32.mrf.mxu1 }
 0x116   : > { %v1060_v62 = vadd.f32 %v711_v60, %v657_v34  ;;  %v1061_v63 = vadd.f32 %v760_v61, %v658_v35 }
 0x117   : > { %v3279_v0 = vpop.f32.mrf.mxu0  ;;  %v3285_v1 = vpop.f32.mrf.mxu1 }
 0x119   : > { %v714_v4 = vpop.f32.mrf.mxu0  ;;  %v763_v5 = vpop.f32.mrf.mxu1 }
 0x11b   : > { %v3280_v6 = vpop.f32.mrf.mxu0  ;;  %v3286_v7 = vpop.f32.mrf.mxu1 }
 0x11d   : > { %v809_v11 = vpop.f32.mrf.mxu0  ;;  %v858_v12 = vpop.f32.mrf.mxu1 }
 0x11e   : > { %v1062_v13 = vadd.f32 %v809_v11, %v659_v8  ;;  %v1063_v14 = vadd.f32 %v858_v12, %v660_v9 }
 0x11f   : > { %v3291_v15 = vpop.f32.mrf.mxu0  ;;  %v3297_v16 = vpop.f32.mrf.mxu1 }
 0x121   : > { %v812_v19 = vpop.f32.mrf.mxu0  ;;  %v861_v20 = vpop.f32.mrf.mxu1 }
 0x123   : > { %v3292_v21 = vpop.f32.mrf.mxu0  ;;  %v3298_v24 = vpop.f32.mrf.mxu1 }
 0x125   : > { %v907_v25 = vpop.f32.mrf.mxu0  ;;  %v956_v28 = vpop.f32.mrf.mxu1 }
 0x126   : > { %v1064_v29 = vadd.f32 %v907_v25, %v661_v22  ;;  %v1065_v32 = vadd.f32 %v956_v28, %v662_v23 }
 0x127   : > { %v3303_v33 = vpop.f32.mrf.mxu0  ;;  %v3309_v36 = vpop.f32.mrf.mxu1 }
 0x129   : > { %v910_v26 = vpop.f32.mrf.mxu0  ;;  %v959_v27 = vpop.f32.mrf.mxu1 }
 0x12b   : > { %v3304_v39 = vpop.f32.mrf.mxu0  ;;  %v3310_v40 = vpop.f32.mrf.mxu1 }
 0x12d   : > { %v1005_v45 = vpop.f32.mrf.mxu0  ;;  %v1054_v46 = vpop.f32.mrf.mxu1 }
 0x12e   : > { %v1066_v30 = vadd.f32 %v1005_v45, %v663_v41  ;;  %v1067_v31 = vadd.f32 %v1054_v46, %v664_v42 }
 0x12f   : > { %v3315_v43 = vpop.f32.mrf.mxu0  ;;  %v3321_v44 = vpop.f32.mrf.mxu1 }
 0x131   : > { %v1008_v47 = vpop.f32.mrf.mxu0  ;;  %v1057_v48 = vpop.f32.mrf.mxu1 }
 0x133   : > { %v3316_v49 = vpop.f32.mrf.mxu0  ;;  %v3322_v50 = vpop.f32.mrf.mxu1 }
 0x135   : > { %v1109_v53 = vpop.f32.mrf.mxu0  ;;  %v1153_v54 = vpop.f32.mrf.mxu1 }
 0x136   : > { %v1423_v55 = vadd.f32 %v1109_v53, %v1060_v62  ;;  %v1424_v56 = vadd.f32 %v1153_v54, %v1061_v63 }
 0x137   : > { %v3327_v57 = vpop.f32.mrf.mxu0  ;;  %v3333_v10 = vpop.f32.mrf.mxu1 }
 0x139   : > { %v1112_v58 = vpop.f32.mrf.mxu0  ;;  %v1156_v59 = vpop.f32.mrf.mxu1 }
 0x13b   : > { %v3328_v51 = vpop.f32.mrf.mxu0  ;;  %v3334_v52 = vpop.f32.mrf.mxu1 }
 0x13d   : > { %v1197_v34 = vpop.f32.mrf.mxu0  ;;  %v1241_v35 = vpop.f32.mrf.mxu1 }
 0x13e   : > { %v1425_v60 = vadd.f32 %v1197_v34, %v1062_v13  ;;  %v1426_v61 = vadd.f32 %v1241_v35, %v1063_v14 }
 0x13f   : > { %v3339_v0 = vpop.f32.mrf.mxu0  ;;  %v3345_v1 = vpop.f32.mrf.mxu1 }
 0x141   : > { %v1200_v2 = vpop.f32.mrf.mxu0  ;;  %v1244_v3 = vpop.f32.mrf.mxu1 }
 0x143   : > { %v3340_v4 = vpop.f32.mrf.mxu0  ;;  %v3346_v5 = vpop.f32.mrf.mxu1 }
 0x145   : > { %v1285_v6 = vpop.f32.mrf.mxu0  ;;  %v1329_v7 = vpop.f32.mrf.mxu1 }
 0x146   : > { %v1427_v62 = vadd.f32 %v1285_v6, %v1064_v29  ;;  %v1428_v63 = vadd.f32 %v1329_v7, %v1065_v32 }
 0x147   : > { %v3351_v8 = vpop.f32.mrf.mxu0  ;;  %v3357_v9 = vpop.f32.mrf.mxu1 }
 0x149   : > { %v1288_v11 = vpop.f32.mrf.mxu0  ;;  %v1332_v12 = vpop.f32.mrf.mxu1 }
 0x14b   : > { %v3352_v15 = vpop.f32.mrf.mxu0  ;;  %v3358_v16 = vpop.f32.mrf.mxu1 }
 0x14d   : > { %v1373_v17 = vpop.f32.mrf.mxu0  ;;  %v1417_v18 = vpop.f32.mrf.mxu1 }
 0x14e   : > { %v1429_v13 = vadd.f32 %v1373_v17, %v1066_v30  ;;  %v1430_v14 = vadd.f32 %v1417_v18, %v1067_v31 }
 0x14f   : > { %v3363_v19 = vpop.f32.mrf.mxu0  ;;  %v3369_v20 = vpop.f32.mrf.mxu1 }
 0x151   : > { %v1376_v21 = vpop.f32.mrf.mxu0  ;;  %v1420_v24 = vpop.f32.mrf.mxu1 }
 0x153   : > { %v3364_v22 = vpop.f32.mrf.mxu0  ;;  %v3370_v23 = vpop.f32.mrf.mxu1 }
 0x155   : > { %v1472_v25 = vpop.f32.mrf.mxu0  ;;  %v1516_v28 = vpop.f32.mrf.mxu1 }
 0x156   : > { %v4125_v29 = vadd.f32 %v1472_v25, %v1423_v55  ;;  %v4127_v32 = vadd.f32 %v1516_v28, %v1424_v56 }
 0x157   : > { %v3375_v33 = vpop.f32.mrf.mxu0  ;;  %v3381_v36 = vpop.f32.mrf.mxu1 }
 0x159   : > { %v1475_v37 = vpop.f32.mrf.mxu0  ;;  %v1519_v38 = vpop.f32.mrf.mxu1 }
 0x15b   : > { %v3376_v26 = vpop.f32.mrf.mxu0  ;;  %v3382_v27 = vpop.f32.mrf.mxu1 }
 0x15d   : > { %v1560_v39 = vpop.f32.mrf.mxu0  ;;  %v1604_v40 = vpop.f32.mrf.mxu1 }
 0x15e   : > { %v4129_v41 = vadd.f32 %v1560_v39, %v1425_v60  ;;  %v4131_v42 = vadd.f32 %v1604_v40, %v1426_v61 }
 0x15f   : > { %v3387_v45 = vpop.f32.mrf.mxu0  ;;  %v3393_v46 = vpop.f32.mrf.mxu1 }
 0x161   : > { %v1563_v30 = vpop.f32.mrf.mxu0  ;;  %v1607_v31 = vpop.f32.mrf.mxu1 }
 0x163   : > { %v3388_v43 = vpop.f32.mrf.mxu0  ;;  %v3394_v44 = vpop.f32.mrf.mxu1 }
 0x165   : > { %v1648_v47 = vpop.f32.mrf.mxu0  ;;  %v1692_v48 = vpop.f32.mrf.mxu1 }
 0x166   : > { %v4133_v49 = vadd.f32 %v1648_v47, %v1427_v62  ;;  %v4135_v50 = vadd.f32 %v1692_v48, %v1428_v63 }
 0x167   : > { %v3399_v53 = vpop.f32.mrf.mxu0  ;;  %v3405_v54 = vpop.f32.mrf.mxu1 }
 0x169   : > { %v1651_v55 = vpop.f32.mrf.mxu0  ;;  %v1695_v56 = vpop.f32.mrf.mxu1 }
 0x16b   : > { %v3400_v57 = vpop.f32.mrf.mxu0  ;;  %v3406_v10 = vpop.f32.mrf.mxu1 }
 0x16d   : > { %v1736_v58 = vpop.f32.mrf.mxu0  ;;  %v1780_v59 = vpop.f32.mrf.mxu1 }
 0x16e   : > { %v4137_v51 = vadd.f32 %v1736_v58, %v1429_v13  ;;  %v4139_v52 = vadd.f32 %v1780_v59, %v1430_v14 }
 0x16f   : > { %v3411_v34 = vpop.f32.mrf.mxu0  ;;  %v3417_v35 = vpop.f32.mrf.mxu1 }
 0x171   : > { %v1739_v60 = vpop.f32.mrf.mxu0  ;;  %v1783_v61 = vpop.f32.mrf.mxu1 }
 0x173   : > { %v3412_v0 = vpop.f32.mrf.mxu0  ;;  %v3418_v1 = vpop.f32.mrf.mxu1 }
 0x175   : > { %v1835_v2 = vpop.f32.mrf.mxu0  ;;  %v1879_v3 = vpop.f32.mrf.mxu1 }
 0x177   : > { %v3423_v4 = vpop.f32.mrf.mxu0  ;;  %v3429_v5 = vpop.f32.mrf.mxu1 }
 0x179   : > { %v1838_v6 = vpop.f32.mrf.mxu0  ;;  %v1882_v7 = vpop.f32.mrf.mxu1 }
 0x17b   : > { %v3424_v62 = vpop.f32.mrf.mxu0  ;;  %v3430_v63 = vpop.f32.mrf.mxu1 }
 0x17d   : > { %v4141_v8 = vpop.f32.mrf.mxu0  ;;  %v4143_v9 = vpop.f32.mrf.mxu1 }
 0x17f   : > { %v3435_v11 = vpop.f32.mrf.mxu0  ;;  %v3441_v12 = vpop.f32.mrf.mxu1 }
 0x180   : > { %v2149_v11 = vadd.f32 %v1835_v2, %v4125_v29  ;;  %v2150_v12 = vadd.f32 %v1879_v3, %v4127_v32  ;;  %v2151_v29 = vadd.f32 %v4141_v8, %v4129_v41  ;;  %v2152_v32 = vadd.f32 %v4143_v9, %v4131_v42 }
 0x181   : > { %v1926_v15 = vpop.f32.mrf.mxu0  ;;  %v1970_v16 = vpop.f32.mrf.mxu1 }
 0x183   : > { %v3436_v17 = vpop.f32.mrf.mxu0  ;;  %v3442_v18 = vpop.f32.mrf.mxu1 }
 0x185   : > { %v4145_v13 = vpop.f32.mrf.mxu0  ;;  %v4147_v14 = vpop.f32.mrf.mxu1 }
 0x186   : > { %v2153_v41 = vadd.f32 %v4145_v13, %v4133_v49  ;;  %v2154_v42 = vadd.f32 %v4147_v14, %v4135_v50 }
 0x187   : > { %v3447_v19 = vpop.f32.mrf.mxu0  ;;  %v3453_v20 = vpop.f32.mrf.mxu1 }
 0x189   : > { %v2014_v21 = vpop.f32.mrf.mxu0  ;;  %v2058_v24 = vpop.f32.mrf.mxu1 }
 0x18b   : > { %v3448_v22 = vpop.f32.mrf.mxu0  ;;  %v3454_v23 = vpop.f32.mrf.mxu1 }
 0x18d   : > { %v4149_v25 = vpop.f32.mrf.mxu0  ;;  %v4151_v28 = vpop.f32.mrf.mxu1 }
 0x18e   : > { %v2155_v49 = vadd.f32 %v4149_v25, %v4137_v51  ;;  %v2156_v50 = vadd.f32 %v4151_v28, %v4139_v52 }
 0x18f   : > { %v3459_v33 = vpop.f32.mrf.mxu0  ;;  %v3465_v36 = vpop.f32.mrf.mxu1 }
 0x191   : > { %v2102_v37 = vpop.f32.mrf.mxu0  ;;  %v2146_v38 = vpop.f32.mrf.mxu1 }
 0x193   : > { %v3460_v26 = vpop.f32.mrf.mxu0  ;;  %v3466_v27 = vpop.f32.mrf.mxu1 }
 0x195   : > { %v2198_v39 = vpop.f32.mrf.mxu0  ;;  %v2242_v40 = vpop.f32.mrf.mxu1 }
 0x196   : > { %v2512_v17 = vadd.f32 %v2198_v39, %v2149_v11  ;;  %v2513_v18 = vadd.f32 %v2242_v40, %v2150_v12 }
 0x197   : > { %v3471_v45 = vpop.f32.mrf.mxu0  ;;  %v3477_v46 = vpop.f32.mrf.mxu1 }
 0x199   : > { %v2201_v30 = vpop.f32.mrf.mxu0  ;;  %v2245_v31 = vpop.f32.mrf.mxu1 }
 0x19b   : > { %v3472_v43 = vpop.f32.mrf.mxu0  ;;  %v3478_v44 = vpop.f32.mrf.mxu1 }
 0x19d   : > { %v2286_v47 = vpop.f32.mrf.mxu0  ;;  %v2330_v48 = vpop.f32.mrf.mxu1 }
 0x19e   : > { %v2514_v37 = vadd.f32 %v2286_v47, %v2151_v29  ;;  %v2515_v38 = vadd.f32 %v2330_v48, %v2152_v32 }
 0x19f   : > { %v3483_v53 = vpop.f32.mrf.mxu0  ;;  %v3489_v54 = vpop.f32.mrf.mxu1 }
 0x1a1   : > { %v2289_v55 = vpop.f32.mrf.mxu0  ;;  %v2333_v56 = vpop.f32.mrf.mxu1 }
 0x1a3   : > { %v3484_v57 = vpop.f32.mrf.mxu0  ;;  %v3490_v10 = vpop.f32.mrf.mxu1 }
 0x1a5   : > { %v2374_v58 = vpop.f32.mrf.mxu0  ;;  %v2418_v59 = vpop.f32.mrf.mxu1 }
 0x1a6   : > { %v2516_v43 = vadd.f32 %v2374_v58, %v2153_v41  ;;  %v2517_v44 = vadd.f32 %v2418_v59, %v2154_v42 }
 0x1a7   : > { %v3495_v34 = vpop.f32.mrf.mxu0  ;;  %v3501_v35 = vpop.f32.mrf.mxu1 }
 0x1a9   : > { %v2377_v60 = vpop.f32.mrf.mxu0  ;;  %v2421_v61 = vpop.f32.mrf.mxu1 }
 0x1ab   : > { %v3496_v0 = vpop.f32.mrf.mxu0  ;;  %v3502_v1 = vpop.f32.mrf.mxu1 }
 0x1ad   : > { %v2462_v4 = vpop.f32.mrf.mxu0  ;;  %v2506_v5 = vpop.f32.mrf.mxu1 }
 0x1ae   : > { %v2518_v58 = vadd.f32 %v2462_v4, %v2155_v49  ;;  %v2519_v59 = vadd.f32 %v2506_v5, %v2156_v50 }
 0x1af   : > { %v3507_v6 = vpop.f32.mrf.mxu0  ;;  %v3513_v7 = vpop.f32.mrf.mxu1 }
 0x1b1   : > { %v2465_v62 = vpop.f32.mrf.mxu0  ;;  %v2509_v63 = vpop.f32.mrf.mxu1 }
 0x1b3   : > { %v3508_v15 = vpop.f32.mrf.mxu0  ;;  %v3514_v16 = vpop.f32.mrf.mxu1 }
 0x1b5   : > { %v2561_v19 = vpop.f32.mrf.mxu0  ;;  %v2605_v20 = vpop.f32.mrf.mxu1 }
 0x1b6   : > { %v2875_v21 = vadd.f32 %v2561_v19, %v2512_v17  ;;  %v2876_v24 = vadd.f32 %v2605_v20, %v2513_v18 }
 0x1b7   : > { %v3519_v22 = vpop.f32.mrf.mxu0  ;;  %v3525_v23 = vpop.f32.mrf.mxu1 }
 0x1b8   : > { %2884 = vst.msk [vmem:[#allocation2] sm:$0x1] %vm2883_vm4, %v2875_v21  ;;  %2885 = vst.msk [vmem:[#allocation2 + $0x1] sm:$0x1] %vm2883_vm4, %v2876_v24 }
 0x1b9   : > { %v2564_v33 = vpop.f32.mrf.mxu0  ;;  %v2608_v36 = vpop.f32.mrf.mxu1 }
 0x1bb   : > { %v3520_v2 = vpop.f32.mrf.mxu0  ;;  %v3526_v3 = vpop.f32.mrf.mxu1 }
 0x1bd   : > { %v2649_v26 = vpop.f32.mrf.mxu0  ;;  %v2693_v27 = vpop.f32.mrf.mxu1 }
 0x1be   : > { %v2877_v39 = vadd.f32 %v2649_v26, %v2514_v37  ;;  %v2878_v40 = vadd.f32 %v2693_v27, %v2515_v38 }
 0x1bf   : > { %v3531_v45 = vpop.f32.mrf.mxu0  ;;  %v3537_v46 = vpop.f32.mrf.mxu1 }
 0x1c0   : > { %2886 = vst.msk [vmem:[#allocation2 + $0x2] sm:$0x1] %vm2883_vm4, %v2877_v39  ;;  %2887 = vst.msk [vmem:[#allocation2 + $0x3] sm:$0x1] %vm2883_vm4, %v2878_v40 }
 0x1c1   : > { %v2652_v30 = vpop.f32.mrf.mxu0  ;;  %v2696_v31 = vpop.f32.mrf.mxu1 }
 0x1c3   : > { %v3532_v8 = vpop.f32.mrf.mxu0  ;;  %v3538_v9 = vpop.f32.mrf.mxu1 }
 0x1c5   : > { %v2737_v47 = vpop.f32.mrf.mxu0  ;;  %v2781_v48 = vpop.f32.mrf.mxu1 }
 0x1c6   : > { %v2879_v53 = vadd.f32 %v2737_v47, %v2516_v43  ;;  %v2880_v54 = vadd.f32 %v2781_v48, %v2517_v44 }
 0x1c7   : > { %v3543_v55 = vpop.f32.mrf.mxu0  ;;  %v3549_v56 = vpop.f32.mrf.mxu1 }
 0x1c8   : > { %2888 = vst.msk [vmem:[#allocation2 + $0x4] sm:$0x1] %vm2883_vm4, %v2879_v53  ;;  %2889 = vst.msk [vmem:[#allocation2 + $0x5] sm:$0x1] %vm2883_vm4, %v2880_v54 }
 0x1c9   : > { %v2740_v57 = vpop.f32.mrf.mxu0  ;;  %v2784_v10 = vpop.f32.mrf.mxu1 }
 0x1cb   : > { %v3544_v13 = vpop.f32.mrf.mxu0  ;;  %v3550_v14 = vpop.f32.mrf.mxu1 }
 0x1cd   : > { %v2825_v34 = vpop.f32.mrf.mxu0  ;;  %v2869_v35 = vpop.f32.mrf.mxu1 }
 0x1ce   : > { %v2881_v60 = vadd.f32 %v2825_v34, %v2518_v58  ;;  %v2882_v61 = vadd.f32 %v2869_v35, %v2519_v59 }
 0x1cf   : > { %v3555_v0 = vpop.f32.mrf.mxu0  ;;  %v3561_v1 = vpop.f32.mrf.mxu1  ;;  %2895 = sbr.rel (%p3112_p13) target bundleno = 479 (0x1df), region = 77 }
 0x1d0   : > { %2890 = vst.msk [vmem:[#allocation2 + $0x6] sm:$0x1] %vm2883_vm4, %v2881_v60  ;;  %2891 = vst.msk [vmem:[#allocation2 + $0x7] sm:$0x1] %vm2883_vm4, %v2882_v61 }
 0x1d1   : > { %v2828_v6 = vpop.f32.mrf.mxu0  ;;  %v2872_v7 = vpop.f32.mrf.mxu1 }
 0x1d3   : > { %v3556_v51 = vpop.f32.mrf.mxu0  ;;  %v3562_v25 = vpop.f32.mrf.mxu1 }
 0x1d4   : > { %v2896_v52 = vld [vmem:[#allocation2] sm:$0x1]  ;;  %vm2913_vm5 = vsmask.f32 256  ;;  %v2897_v62 = vld [vmem:[#allocation2 + $0x1] sm:$0x1] }
 0x1d5   : > { %v2915_v28 = vld [vmem:[%s3775_s20] sm:$0x1]  ;;  %v2904_v4 = vpack.c.bf16 %v2896_v52, %v2896_v52  ;;  %vm4178_vm6 = vmand %vm2883_vm4, %vm2913_vm5  ;;  %v2918_v63 = vld [vmem:[%s3775_s20 + $0x1] sm:$0x1]  ;;  %v2905_v11 = vpack.c.bf16 %v2897_v62, %v2897_v62 }
 0x1d6   : > { %v2898_v12 = vld [vmem:[#allocation2 + $0x2] sm:$0x1]  ;;  %v2899_v16 = vld [vmem:[#allocation2 + $0x3] sm:$0x1]  ;;  %v2900_v21 = vld [vmem:[#allocation2 + $0x4] sm:$0x1] }
 0x1d7   : > { %v2921_v15 = vld [vmem:[%s3775_s20 + $0x2] sm:$0x1]  ;;  %v2916_v17 = vsel %vm4178_vm6, %v2904_v4, %v2915_v28  ;;  %v2906_v18 = vpack.c.bf16 %v2898_v12, %v2898_v12  ;;  %v2907_v19 = vpack.c.bf16 %v2899_v16, %v2899_v16  ;;  %v2924_v20 = vld [vmem:[%s3775_s20 + $0x3] sm:$0x1]  ;;  %v2927_v24 = vld [vmem:[%s3775_s20 + $0x4] sm:$0x1]  ;;  %v2919_v22 = vsel %vm4178_vm6, %v2905_v11, %v2918_v63 }
 0x1d8   : > { %2917 = vst [vmem:[%s3775_s20] sm:$0x1] %v2916_v17  ;;  %v2908_v23 = vpack.c.bf16 %v2900_v21, %v2900_v21  ;;  %v2901_v33 = vld [vmem:[#allocation2 + $0x5] sm:$0x1]  ;;  %v2902_v29 = vld [vmem:[#allocation2 + $0x6] sm:$0x1] }
 0x1d9   : > { %v2930_v36 = vld [vmem:[%s3775_s20 + $0x5] sm:$0x1]  ;;  %2920 = vst [vmem:[%s3775_s20 + $0x1] sm:$0x1] %v2919_v22  ;;  %v2922_v32 = vsel %vm4178_vm6, %v2906_v18, %v2921_v15  ;;  %v2925_v2 = vsel %vm4178_vm6, %v2907_v19, %v2924_v20  ;;  %v2909_v3 = vpack.c.bf16 %v2901_v33, %v2901_v33  ;;  %v2910_v37 = vpack.c.bf16 %v2902_v29, %v2902_v29  ;;  %v2933_v38 = vld [vmem:[%s3775_s20 + $0x6] sm:$0x1] }
 0x1da   : > { %v2903_v26 = vld [vmem:[#allocation2 + $0x7] sm:$0x1]  ;;  %2923 = vst [vmem:[%s3775_s20 + $0x2] sm:$0x1] %v2922_v32  ;;  %2926 = vst [vmem:[%s3775_s20 + $0x3] sm:$0x1] %v2925_v2  ;;  %v2928_v39 = vsel %vm4178_vm6, %v2908_v23, %v2927_v24 }
 0x1db   : > { %v2936_v27 = vld [vmem:[%s3775_s20 + $0x7] sm:$0x1]  ;;  %v2911_v40 = vpack.c.bf16 %v2903_v26, %v2903_v26  ;;  %2929 = vst [vmem:[%s3775_s20 + $0x4] sm:$0x1] %v2928_v39  ;;  %v2931_v45 = vsel %vm4178_vm6, %v2909_v3, %v2930_v36  ;;  %v2934_v46 = vsel %vm4178_vm6, %v2910_v37, %v2933_v38 }
 0x1dc   : > { %2932 = vst [vmem:[%s3775_s20 + $0x5] sm:$0x1] %v2931_v45  ;;  %2935 = vst [vmem:[%s3775_s20 + $0x6] sm:$0x1] %v2934_v46 }
 0x1dd   : > { %v2937_v30 = vsel %vm4178_vm6, %v2911_v40, %v2936_v27 }
 0x1de   : > { %2938 = vst [vmem:[%s3775_s20 + $0x7] sm:$0x1] %v2937_v30 }
 0x1df PF: > { %s12_s15 = sadd.s32 1, %s3686_s15   ;;  %s4239_s9 = smov %s3666_s10 }
 0x1e0   : > { %p9_p0 = scmp.ge.s32.totalorder %s12_s15, 30   ;;  %s4240_s10 = smov %s3757_s22 }
 0x1e1   : > { %s4241_s11 = smov %s3678_s13  ;;  %s4242_s12 = smov %s3682_s14 }
 0x1e2   : > { %s4243_s13 = smov %s4246_s16  ;;  %s4244_s14 = smov %s4250_s17 }
 0x1e3   :  { %11 = sbr.rel (!%p9_p0) target bundleno = 4 (0x4), region = 115 }

// kernel: adaptive_pool_attention_forward.11
= control target key start
LH: loop header
LB: loop body
LE: loop exit
PB: predicated region body
PF: predicated region fallthrough
CT: control target
= control target key end

     0   :  { %v181_v0 = vmov 0.0   ;;  %vm182_vm0 = vmmov 0   ;;  %s228_s1 = inlined_call_operand.vmem [shape: bf16[128,128], index: 1, kind: input, shape index: {}]   ;;  %s229_s0 = inlined_call_operand.vmem [shape: bf16[8,128], index: 0, kind: input, shape index: {}]   ;;  %s230_s2 = inlined_call_operand.vmem [shape: f32[8,128], index: 2, kind: output, shape index: {}]  }
   0x1   :  { %151 = vmatprep.subr.bf16.mxu0 %v181_v0  ;;  %v173_v1 = vld [vmem:[%s228_s1 + $0x38] sm:$0xff]   ;;  %167 = vmatprep.mubr.msk.bf16.mxu0 %vm182_vm0, %v181_v0  ;;  %v174_v2 = vld [vmem:[%s228_s1 + $0x30] sm:$0xff]   ;;  %v175_v3 = vld [vmem:[%s228_s1 + $0x28] sm:$0xff]  }
   0x2   :  { %152 = vmatpush3.bf16.msra.mxu0 %v173_v1  ;;  %v176_v4 = vld [vmem:[%s228_s1 + $0x20] sm:$0xff]   ;;  %v177_v5 = vld [vmem:[%s228_s1 + $0x18] sm:$0xff]   ;;  %v178_v6 = vld [vmem:[%s228_s1 + $0x10] sm:$0xff]  }
   0x3   :  { %153 = vmatprep.subr.bf16.mxu0 %v181_v0  ;;  %v179_v7 = vld [vmem:[%s228_s1 + $0x8] sm:$0xff]   ;;  %v180_v8 = vld [vmem:[%s228_s1] sm:$0xff]  }
   0x4   :  { %v18_v9 = vld [vmem:[%s229_s0] sm:$0xf] }
   0x6   :  { %154 = vmatpush3.bf16.msra.mxu0 %v174_v2 }
   0x7   :  { %155 = vmatprep.subr.bf16.mxu0 %v181_v0 }
   0xa   :  { %156 = vmatpush3.bf16.msra.mxu0 %v175_v3 }
   0xb   :  { %157 = vmatprep.subr.bf16.mxu0 %v181_v0 }
   0xe   :  { %158 = vmatpush3.bf16.msra.mxu0 %v176_v4 }
   0xf   :  { %159 = vmatprep.subr.bf16.mxu0 %v181_v0 }
  0x12   :  { %160 = vmatpush3.bf16.msra.mxu0 %v177_v5 }
  0x13   :  { %161 = vmatprep.subr.bf16.mxu0 %v181_v0 }
  0x16   :  { %162 = vmatpush3.bf16.msra.mxu0 %v178_v6 }
  0x17   :  { %163 = vmatprep.subr.bf16.mxu0 %v181_v0 }
  0x1a   :  { %164 = vmatpush3.bf16.msra.mxu0 %v179_v7 }
  0x1b   :  { %165 = vmatprep.subr.bf16.mxu0 %v181_v0 }
  0x1e   :  { %166 = vmatpush3.bf16.msra.mxu0 %v180_v8 }
  0x21   :  { %168 = vmatmul.mubr.bf16.vlgmr.msra.gmra.mxu0 %v18_v9 }
  0xe1   :  { %v117_v10 = vpop.f32.mrf.mxu0 }
  0xe2   :  { %129 = vst [vmem:[%s230_s2] sm:$0xff] %v117_v10 }
  0xe3   :  { %v169_v11 = vpop.f32.mrf.mxu0 }
  0xe5   :  { %v120_v12 = vpop.f32.mrf.mxu0 }
  0xe7   :  { %v170_v13 = vpop.f32.mrf.mxu0 }

// kernel: adaptive_pool_attention_forward.10
= control target key start
LH: loop header
LB: loop body
LE: loop exit
PB: predicated region body
PF: predicated region fallthrough
CT: control target
= control target key end

     0   :  { %vm55_vm0 = vcmask 60416   ;;  %s3453_s0 = inlined_call_operand.vmem [shape: bf16[8,4,8], index: 0, kind: input, shape index: {}]   ;;  %s3454_s1 = inlined_call_operand.vmem [shape: bf16[8,4,8], index: 1, kind: input, shape index: {}]   ;;  %s3455_s2 = inlined_call_operand.vmem [shape: bf16[8,4,8], index: 2, kind: input, shape index: {}]   ;;  %s3456_s3 = inlined_call_operand.vmem [shape: bf16[4,4,8], index: 3, kind: input, shape index: {}]   ;;  %s3457_s4 = inlined_call_operand.vmem [shape: f32[1,8], index: 4, kind: input, shape index: {}]   ;;  %s3458_s5 = inlined_call_operand.vmem [shape: f32[1,8], index: 5, kind: input, shape index: {}]   ;;  %s3459_s6 = inlined_call_operand.vmem [shape: f32[1,8], index: 6, kind: input, shape index: {}]   ;;  %s3460_s7 = inlined_call_operand.vmem [shape: f32[1,8], index: 7, kind: input, shape index: {}]   ;;  %s3461_s8 = inlined_call_operand.vmem [shape: f32[1,8], index: 8, kind: input, shape index: {}]   ;;  %s3462_s9 = inlined_call_operand.vmem [shape: f32[1,8], index: 9, kind: input, shape index: {}]   ;;  %s3463_s10 = inlined_call_operand.vmem [shape: bf16[8,4,8], index: 10, kind: output, shape index: {0}]   ;;  %s3464_s11 = inlined_call_operand.hbm [shape: f32[8,4,4], index: 11, kind: output, shape index: {1}]  }
   0x1   :  { %v2416_v0 = vld [vmem:[%s3454_s1] sm:$0x3]  ;;  %v2421_v1 = vld [vmem:[%s3454_s1 + $0x2] sm:$0x3]  ;;  %v2439_v7 = vld [vmem:[%s3454_s1 + $0x4] sm:$0x3] }
   0x2   :  { %v199_v2 = vunpack.c.l.bf16 %v2416_v0  ;;  %v200_v3 = vunpack.c.l.bf16 %v2421_v1  ;;  %v2428_v4 = vld [vmem:[%s3453_s0] sm:$0x3]  ;;  %v2433_v5 = vld [vmem:[%s3453_s0 + $0x2] sm:$0x3]  ;;  %v2448_v10 = vld [vmem:[%s3454_s1 + $0x6] sm:$0x3]  ;;  %v201_v13 = vunpack.c.l.bf16 %v2439_v7 }
   0x3   :  { %v47_v6 = vunpack.c.l.bf16 %v2428_v4  ;;  %v48_v8 = vunpack.c.l.bf16 %v2433_v5  ;;  %v2463_v15 = vld [vmem:[%s3453_s0 + $0x4] sm:$0x3]  ;;  %v202_v16 = vunpack.c.l.bf16 %v2448_v10  ;;  %v2469_v17 = vld [vmem:[%s3453_s0 + $0x6] sm:$0x3] }
   0x4   :  { %v207_v9 = vsel %vm55_vm0, %v199_v2, 0.0  ;;  %v210_v12 = vsel %vm55_vm0, %v200_v3, 0.0 }
   0x5   :  { %208 = vadd.xlane.f32.xlu0 %v207_v9  ;;  %v56_v11 = vsel %vm55_vm0, %v47_v6, 0.0  ;;  %v59_v14 = vsel %vm55_vm0, %v48_v8, 0.0 }
   0x6   :  { %57 = vadd.xlane.f32.xlu1 %v56_v11 }
   0x7   :  { %17 = vsyncpa [#allocation3], 0  ;;  %v213_v18 = vsel %vm55_vm0, %v201_v13, 0.0  ;;  %v49_v19 = vunpack.c.l.bf16 %v2463_v15  ;;  %v216_v20 = vsel %vm55_vm0, %v202_v16, 0.0  ;;  %v2481_v21 = vld [vmem:[%s3454_s1 + $0x8] sm:$0x3]  ;;  %v50_v22 = vunpack.c.l.bf16 %v2469_v17 }
   0x8   :  { %v2487_v23 = vld [vmem:[%s3454_s1 + $0xa] sm:$0x3]  ;;  %v203_v25 = vunpack.c.l.bf16 %v2481_v21  ;;  %v2499_v27 = vld [vmem:[%s3453_s0 + $0x8] sm:$0x3]  ;;  %v2517_v33 = vld [vmem:[%s3454_s1 + $0xc] sm:$0x3] }
   0x9   :  { %211 = vadd.xlane.f32.xlu0 %v210_v12  ;;  %v62_v24 = vsel %vm55_vm0, %v49_v19, 0.0  ;;  %v65_v26 = vsel %vm55_vm0, %v50_v22, 0.0  ;;  %v204_v28 = vunpack.c.l.bf16 %v2487_v23  ;;  %v2505_v29 = vld [vmem:[%s3453_s0 + $0xa] sm:$0x3]  ;;  %v51_v31 = vunpack.c.l.bf16 %v2499_v27  ;;  %v2523_v35 = vld [vmem:[%s3454_s1 + $0xe] sm:$0x3] }
   0xa   :  { %60 = vadd.xlane.f32.xlu1 %v59_v14  ;;  %v219_v30 = vsel %vm55_vm0, %v203_v25, 0.0  ;;  %v52_v34 = vunpack.c.l.bf16 %v2505_v29  ;;  %v205_v37 = vunpack.c.l.bf16 %v2517_v33  ;;  %v2535_v39 = vld [vmem:[%s3453_s0 + $0xc] sm:$0x3]  ;;  %v206_v40 = vunpack.c.l.bf16 %v2523_v35  ;;  %v2541_v41 = vld [vmem:[%s3453_s0 + $0xe] sm:$0x3] }
   0xb   :  { %v222_v32 = vsel %vm55_vm0, %v204_v28, 0.0  ;;  %v68_v36 = vsel %vm55_vm0, %v51_v31, 0.0  ;;  %v53_v43 = vunpack.c.l.bf16 %v2535_v39  ;;  %v54_v45 = vunpack.c.l.bf16 %v2541_v41 }
   0xc   :  { %v71_v38 = vsel %vm55_vm0, %v52_v34, 0.0  ;;  %v225_v42 = vsel %vm55_vm0, %v205_v37, 0.0  ;;  %v228_v44 = vsel %vm55_vm0, %v206_v40, 0.0  ;;  %vm2348_vm1 = vmmov 0  }
   0xd   :  { %214 = vadd.xlane.f32.xlu0 %v213_v18  ;;  %v74_v46 = vsel %vm55_vm0, %v53_v43, 0.0  ;;  %v77_v47 = vsel %vm55_vm0, %v54_v45, 0.0  ;;  %v526_v41 = vlaneseq  ;;  %vm1032_vm2 = vcmask 64512  }
   0xe   :  { %217 = vadd.xlane.f32.xlu1 %v216_v20  ;;  %vm1025_vm3 = vcmask 1041409   ;;  %vm1029_vm4 = vcmask 1043459   ;;  %vm1027_vm5 = vcmask 1042434   ;;  %vm1569_vm6 = vcmask 27648  }
   0xf   :  { %vm1678_vm7 = vcmask 1041408   ;;  %vm1674_vm8 = vcmask 31744  }
  0x11   :  { %63 = vadd.xlane.f32.xlu0 %v62_v24 }
  0x12   :  { %66 = vadd.xlane.f32.xlu1 %v65_v26 }
  0x15   :  { %220 = vadd.xlane.f32.xlu0 %v219_v30 }
  0x16   :  { %223 = vadd.xlane.f32.xlu1 %v222_v32 }
  0x19   :  { %69 = vadd.xlane.f32.xlu0 %v68_v36 }
  0x1a   :  { %72 = vadd.xlane.f32.xlu1 %v71_v38 }
  0x1d   :  { %226 = vadd.xlane.f32.xlu0 %v225_v42 }
  0x1e   :  { %229 = vadd.xlane.f32.xlu1 %v228_v44 }
  0x21   :  { %75 = vadd.xlane.f32.xlu0 %v74_v46 }
  0x22   :  { %78 = vadd.xlane.f32.xlu1 %v77_v47 }
  0x8e   :  { %v209_v48 = vpop.xlane.xlu0 %208 }
  0x8f   :  { %v231_v49 = vmul.f32 0.125, %v209_v48  ;;  %v58_v50 = vpop.xlane.xlu1 %57 }
  0x90   :  { %v81_v51 = vmul.f32 0.125, %v58_v50 }
  0x91   :  { %v2559_v52 = vsub.f32 %v199_v2, %v231_v49 }
  0x92   :  { %v212_v53 = vpop.xlane.xlu0 %211  ;;  %v2563_v54 = vsub.f32 %v47_v6, %v81_v51 }
  0x93   :  { %v232_v55 = vmul.f32 0.125, %v212_v53  ;;  %v247_v56 = vmul.f32 %v2559_v52, %v2559_v52  ;;  %v61_v57 = vpop.xlane.xlu1 %60 }
  0x94   :  { %v82_v58 = vmul.f32 0.125, %v61_v57  ;;  %v97_v59 = vmul.f32 %v2563_v54, %v2563_v54 }
  0x95   :  { %v2571_v60 = vsub.f32 %v200_v3, %v232_v55  ;;  %v255_v61 = vsel %vm55_vm0, %v247_v56, 0.0 }
  0x96   :  { %v215_v62 = vpop.xlane.xlu0 %214  ;;  %256 = vadd.xlane.f32.xlu0 %v255_v61  ;;  %v2576_v63 = vsub.f32 %v48_v8, %v82_v58  ;;  %v105_v4 = vsel %vm55_vm0, %v97_v59, 0.0 }
  0x97   :  { %v233_v0 = vmul.f32 0.125, %v215_v62  ;;  %v248_v2 = vmul.f32 %v2571_v60, %v2571_v60  ;;  %v218_v6 = vpop.xlane.xlu1 %217 }
  0x98   :  { %v234_v9 = vmul.f32 0.125, %v218_v6  ;;  %v98_v1 = vmul.f32 %v2576_v63, %v2576_v63 }
  0x99   :  { %v2585_v3 = vsub.f32 %v201_v13, %v233_v0  ;;  %v258_v11 = vsel %vm55_vm0, %v248_v2, 0.0 }
  0x9a   :  { %v64_v5 = vpop.xlane.xlu0 %63  ;;  %259 = vadd.xlane.f32.xlu1 %v258_v11  ;;  %106 = vadd.xlane.f32.xlu0 %v105_v4  ;;  %v2590_v8 = vsub.f32 %v202_v16, %v234_v9  ;;  %v108_v18 = vsel %vm55_vm0, %v98_v1, 0.0  ;;  %v2347_v11 = vmov 0.0  }
  0x9b   :  { %v83_v12 = vmul.f32 0.125, %v64_v5  ;;  %v249_v14 = vmul.f32 %v2585_v3, %v2585_v3  ;;  %v67_v20 = vpop.xlane.xlu1 %66  ;;  %2143 = vmatprep.subr.bf16.mxu0 %v2347_v11  ;;  %2149 = vmatprep.subr.bf16.mxu1 %v2347_v11  ;;  %v1008_v5 = vand.u32 127, %v526_v41 }
  0x9c   :  { %v84_v24 = vmul.f32 0.125, %v67_v20  ;;  %v250_v7 = vmul.f32 %v2590_v8, %v2590_v8  ;;  %2145 = vmatprep.mubr.msk.bf16.mxu0 %vm2348_vm1, %v2347_v11  ;;  %2151 = vmatprep.mubr.msk.bf16.mxu1 %vm2348_vm1, %v2347_v11 }
  0x9d   :  { %v2599_v13 = vsub.f32 %v49_v19, %v83_v12  ;;  %v261_v26 = vsel %vm55_vm0, %v249_v14, 0.0 }
  0x9e   :  { %v221_v10 = vpop.xlane.xlu0 %220  ;;  %262 = vadd.xlane.f32.xlu0 %v261_v26  ;;  %109 = vadd.xlane.f32.xlu1 %v108_v18  ;;  %v2604_v16 = vsub.f32 %v50_v22, %v84_v24  ;;  %v264_v36 = vsel %vm55_vm0, %v250_v7, 0.0 }
  0x9f   :  { %v235_v30 = vmul.f32 0.125, %v221_v10  ;;  %v99_v32 = vmul.f32 %v2599_v13, %v2599_v13  ;;  %v224_v38 = vpop.xlane.xlu1 %223 }
  0xa0   :  { %v236_v42 = vmul.f32 0.125, %v224_v38  ;;  %v100_v15 = vmul.f32 %v2604_v16, %v2604_v16 }
  0xa1   :  { %v2613_v19 = vsub.f32 %v203_v25, %v235_v30  ;;  %v111_v44 = vsel %vm55_vm0, %v99_v32, 0.0 }
  0xa2   :  { %v70_v17 = vpop.xlane.xlu0 %69  ;;  %112 = vadd.xlane.f32.xlu0 %v111_v44  ;;  %265 = vadd.xlane.f32.xlu1 %v264_v36  ;;  %v2618_v22 = vsub.f32 %v204_v28, %v236_v42  ;;  %v114_v48 = vsel %vm55_vm0, %v100_v15, 0.0 }
  0xa3   :  { %v85_v46 = vmul.f32 0.125, %v70_v17  ;;  %v251_v47 = vmul.f32 %v2613_v19, %v2613_v19  ;;  %v73_v49 = vpop.xlane.xlu1 %72 }
  0xa4   :  { %v86_v50 = vmul.f32 0.125, %v73_v49  ;;  %v252_v21 = vmul.f32 %v2618_v22, %v2618_v22 }
  0xa5   :  { %v2627_v25 = vsub.f32 %v51_v31, %v85_v46  ;;  %v267_v51 = vsel %vm55_vm0, %v251_v47, 0.0 }
  0xa6   :  { %v227_v23 = vpop.xlane.xlu0 %226  ;;  %268 = vadd.xlane.f32.xlu0 %v267_v51  ;;  %115 = vadd.xlane.f32.xlu1 %v114_v48  ;;  %v2632_v28 = vsub.f32 %v52_v34, %v86_v50  ;;  %v270_v56 = vsel %vm55_vm0, %v252_v21, 0.0 }
  0xa7   :  { %v237_v53 = vmul.f32 0.125, %v227_v23  ;;  %v101_v55 = vmul.f32 %v2627_v25, %v2627_v25  ;;  %v230_v57 = vpop.xlane.xlu1 %229 }
  0xa8   :  { %v238_v58 = vmul.f32 0.125, %v230_v57  ;;  %v102_v27 = vmul.f32 %v2632_v28, %v2632_v28 }
  0xa9   :  { %v2641_v31 = vsub.f32 %v205_v37, %v237_v53  ;;  %v117_v59 = vsel %vm55_vm0, %v101_v55, 0.0  ;;  %v2349_v53 = vmov 1966171168  }
  0xaa   :  { %v76_v29 = vpop.xlane.xlu0 %75  ;;  %118 = vadd.xlane.f32.xlu0 %v117_v59  ;;  %271 = vadd.xlane.f32.xlu1 %v270_v56  ;;  %v2646_v34 = vsub.f32 %v206_v40, %v238_v58  ;;  %v120_v0 = vsel %vm55_vm0, %v102_v27, 0.0  ;;  %v524_v55 = vunpack.c.l.s4 %v2349_v53  ;;  %v2683_v27 = vld [vmem:[%s3459_s6] ss:$0 sm:$0xff] }
  0xab   :  { %v87_v61 = vmul.f32 0.125, %v76_v29  ;;  %v253_v62 = vmul.f32 %v2641_v31, %v2641_v31  ;;  %v79_v2 = vpop.xlane.xlu1 %78 }
  0xac   :  { %v88_v4 = vmul.f32 0.125, %v79_v2  ;;  %v254_v33 = vmul.f32 %v2646_v34, %v2646_v34  ;;  %v2689_v2 = vld [vmem:[%s3460_s7] ss:$0 sm:$0xff] }
  0xad   :  { %v2655_v37 = vsub.f32 %v53_v43, %v87_v61  ;;  %v273_v6 = vsel %vm55_vm0, %v253_v62, 0.0 }
  0xae   :  { %274 = vadd.xlane.f32.xlu0 %v273_v6  ;;  %121 = vadd.xlane.f32.xlu1 %v120_v0  ;;  %v2660_v35 = vsub.f32 %v54_v45, %v88_v4  ;;  %v276_v9 = vsel %vm55_vm0, %v254_v33, 0.0  ;;  %v2675_v45 = vshrl.u32 %v526_v41, 7  ;;  %v525_v4 = vunpack.c.0.s8 %v524_v55 }
  0xaf   :  { %v103_v40 = vmul.f32 %v2655_v37, %v2655_v37 }
  0xb0   :  { %v104_v1 = vmul.f32 %v2660_v35, %v2660_v35  ;;  %v2678_v12 = vsub.s32 %v1008_v5, %v2675_v45 }
  0xb1   :  { %v123_v39 = vsel %vm55_vm0, %v103_v40, 0.0 }
  0xb2   :  { %124 = vadd.xlane.f32.xlu0 %v123_v39  ;;  %277 = vadd.xlane.f32.xlu1 %v276_v9  ;;  %v126_v43 = vsel %vm55_vm0, %v104_v1, 0.0  ;;  %v2695_v1 = vld [vmem:[%s3457_s4] ss:$0 sm:$0xff] }
  0xb6   :  { %127 = vadd.xlane.f32.xlu1 %v126_v43 }
 0x11f   :  { %v257_v14 = vpop.xlane.xlu0 %256 }
 0x120   :  { %v279_v18 = vmul.f32 0.125, %v257_v14  ;;  %v507_v14 = vld [vmem:[%s3456_s3] sm:$0x3] }
 0x122   :  { %v287_v20 = vadd.f32 1e-05, %v279_v18 }
 0x123   :  { %v107_v24 = vpop.xlane.xlu0 %106  ;;  %v260_v7 = vpop.xlane.xlu1 %259 }
 0x124   :  { %2245 = vrsqrt.f32 %v287_v20  ;;  %v129_v26 = vmul.f32 0.125, %v107_v24  ;;  %v280_v10 = vmul.f32 0.125, %v260_v7  ;;  %v2704_v7 = vsub.s32 %v525_v4, %v2675_v45 }
 0x126   :  { %v137_v30 = vadd.f32 1e-05, %v129_v26  ;;  %v288_v32 = vadd.f32 1e-05, %v280_v10  ;;  %v2707_v26 = vsub.s32 0, %v2675_v45 }
 0x127   :  { %v263_v36 = vpop.xlane.xlu0 %262  ;;  %v110_v38 = vpop.xlane.xlu1 %109 }
 0x128   :  { %2247 = vrsqrt.f32 %v137_v30  ;;  %v281_v42 = vmul.f32 0.125, %v263_v36  ;;  %v130_v15 = vmul.f32 0.125, %v110_v38  ;;  %v508_v36 = vld [vmem:[%s3456_s3 + $0x2] sm:$0x3] }
 0x129   :  { %2249 = vrsqrt.f32 %v288_v32  ;;  %v2712_v32 = vld [vmem:[%s3458_s5] ss:$0 sm:$0xff] }
 0x12a   :  { %v289_v44 = vadd.f32 1e-05, %v281_v42  ;;  %v138_v17 = vadd.f32 1e-05, %v130_v15  ;;  %v2719_v42 = vunpack.c.l.bf16 %v507_v14 }
 0x12b   :  { %v113_v46 = vpop.xlane.xlu0 %112  ;;  %v266_v47 = vpop.xlane.xlu1 %265 }
 0x12c   :  { %2251 = vrsqrt.f32 %v289_v44  ;;  %v131_v48 = vmul.f32 0.125, %v113_v46  ;;  %v282_v49 = vmul.f32 0.125, %v266_v47 }
 0x12d   :  { %2253 = vrsqrt.f32 %v138_v17 }
 0x12e   :  { %v139_v50 = vadd.f32 1e-05, %v131_v48  ;;  %v290_v21 = vadd.f32 1e-05, %v282_v49 }
 0x12f   :  { %v269_v51 = vpop.xlane.xlu0 %268  ;;  %v116_v23 = vpop.xlane.xlu1 %115 }
 0x130   :  { %2255 = vrsqrt.f32 %v139_v50  ;;  %v283_v56 = vmul.f32 0.125, %v269_v51  ;;  %v132_v57 = vmul.f32 0.125, %v116_v23  ;;  %v2728_v23 = vunpack.c.l.bf16 %v508_v36 }
 0x131   :  { %v2246_v58 = vpop.eup %2245  ;;  %2257 = vrsqrt.f32 %v290_v21 }
 0x132   :  { %v291_v59 = vadd.f32 1e-05, %v283_v56  ;;  %v140_v29 = vadd.f32 1e-05, %v132_v57  ;;  %v303_v61 = vmul.f32 %v2246_v58, %v2559_v52 }
 0x133   :  { %v119_v62 = vpop.xlane.xlu0 %118  ;;  %v272_v0 = vpop.xlane.xlu1 %271 }
 0x134   :  { %2259 = vrsqrt.f32 %v291_v59  ;;  %v133_v33 = vmul.f32 0.125, %v119_v62  ;;  %v284_v6 = vmul.f32 0.125, %v272_v0  ;;  %v318_v40 = vmul.f32 %v2683_v27, %v303_v61  ;;  %v509_v0 = vld [vmem:[%s3456_s3 + $0x4] sm:$0x3] }
 0x135   :  { %v2248_v9 = vpop.eup %2247  ;;  %2261 = vrsqrt.f32 %v140_v29 }
 0x136   :  { %v2250_v52 = vpop.eup %2249  ;;  %v153_v39 = vmul.f32 %v2248_v9, %v2563_v54  ;;  %v141_v43 = vadd.f32 1e-05, %v133_v33  ;;  %v292_v41 = vadd.f32 1e-05, %v284_v6  ;;  %v333_v5 = vadd.f32 %v2689_v2, %v318_v40 }
 0x137   :  { %v275_v18 = vpop.xlane.xlu0 %274  ;;  %v122_v20 = vpop.xlane.xlu1 %121  ;;  %v304_v24 = vmul.f32 %v2250_v52, %v2571_v60 }
 0x138   :  { %2263 = vrsqrt.f32 %v141_v43  ;;  %v285_v54 = vmul.f32 0.125, %v275_v18  ;;  %v134_v10 = vmul.f32 0.125, %v122_v20  ;;  %v499_v30 = vpack.c.bf16 %v333_v5, %v333_v5 }
 0x139   :  { %v2252_v60 = vpop.eup %2251  ;;  %2265 = vrsqrt.f32 %v292_v41  ;;  %v319_v38 = vmul.f32 %v2683_v27, %v304_v24  ;;  %v168_v45 = vmul.f32 %v2695_v1, %v153_v39  ;;  %v2756_v20 = vunpack.c.l.bf16 %v509_v0 }
 0x13a   :  { %v2254_v15 = vpop.eup %2253  ;;  %v293_v44 = vadd.f32 1e-05, %v285_v54  ;;  %v142_v17 = vadd.f32 1e-05, %v134_v10  ;;  %v1037_v46 = vsel %vm1032_vm2, %v499_v30, 0  ;;  %v305_v47 = vmul.f32 %v2252_v60, %v2585_v3 }
 0x13b   :  { %v154_v48 = vmul.f32 %v2254_v15, %v2576_v63  ;;  %2144 = vmatpush3.bf16.xpose.msra.mxu0 %v1037_v46  ;;  %v125_v49 = vpop.xlane.xlu0 %124  ;;  %v278_v50 = vpop.xlane.xlu1 %277  ;;  %v334_v21 = vadd.f32 %v2689_v2, %v319_v38  ;;  %v2726_v51 = vadd.f32 %v2712_v32, %v168_v45 }
 0x13c   :  { %2267 = vrsqrt.f32 %v293_v44  ;;  %v135_v53 = vmul.f32 0.125, %v125_v49  ;;  %v286_v55 = vmul.f32 0.125, %v278_v50  ;;  %2155 = vmatprep.subr.bf16.mxu0 %v2347_v11  ;;  %v320_v56 = vmul.f32 %v2683_v27, %v305_v47 }
 0x13d   :  { %v2256_v3 = vpop.eup %2255  ;;  %2269 = vrsqrt.f32 %v142_v17  ;;  %v500_v63 = vpack.c.bf16 %v334_v21, %v334_v21  ;;  %v491_v57 = vpack.c.bf16 %v2726_v51, %v2726_v51  ;;  %v529_v58 = vrot.slane %v2726_v51, %v2704_v7 }
 0x13e   :  { %v155_v59 = vmul.f32 %v2256_v3, %v2599_v13  ;;  %v143_v29 = vadd.f32 1e-05, %v135_v53  ;;  %v294_v61 = vadd.f32 1e-05, %v286_v55  ;;  %v335_v62 = vadd.f32 %v2689_v2, %v320_v56  ;;  %v2258_v4 = vpop.eup %2257 }
 0x13f   :  { %v1107_v33 = vsel %vm1032_vm2, %v500_v63, 0  ;;  %v128_v6 = vpop.xlane.xlu1 %127  ;;  %v2743_v40 = vrot.slane %v529_v58, %v2704_v7  ;;  %v169_v9 = vmul.f32 %v2695_v1, %v154_v48  ;;  %v530_v52 = vcombine.high %v529_v58, %v529_v58 }
 0x140   :  { %v170_v13 = vmul.f32 %v2695_v1, %v155_v59  ;;  %2271 = vrsqrt.f32 %v143_v29  ;;  %2150 = vmatpush3.bf16.xpose.msra.mxu1 %v1107_v33  ;;  %v136_v39 = vmul.f32 0.125, %v128_v6  ;;  %v501_v43 = vpack.c.bf16 %v335_v62, %v335_v62 }
 0x141   :  { %v2260_v41 = vpop.eup %2259  ;;  %v718_v5 = vrot.slane %v2743_v40, %v2707_v26  ;;  %v2750_v14 = vadd.f32 %v2712_v32, %v169_v9  ;;  %2161 = vmatprep.subr.bf16.mxu1 %v2347_v11  ;;  %v2754_v18 = vrot.slane %v530_v52, %v2704_v7  ;;  %2273 = vrsqrt.f32 %v294_v61 }
 0x142   :  { %v2262_v24 = vpop.eup %2261  ;;  %v144_v54 = vadd.f32 1e-05, %v136_v39  ;;  %2146 = vmatmul.mubr.msk.bf16.vlgmr.msra.gmra.mxu0 %vm1032_vm2, %v491_v57  ;;  %v1177_v10 = vsel %vm1032_vm2, %v501_v43, 0  ;;  %v306_v30 = vmul.f32 %v2258_v4, %v2590_v8  ;;  %v2766_v45 = vadd.f32 %v2712_v32, %v170_v13 }
 0x143   :  { %v156_v36 = vmul.f32 %v2262_v24, %v2604_v16  ;;  %2156 = vmatpush3.bf16.xpose.msra.mxu0 %v1177_v10  ;;  %v875_v60 = vmul.f32 %v718_v5, %v2719_v42  ;;  %v722_v38 = vrot.slane %v2754_v18, %v2707_v26  ;;  %v492_v15 = vpack.c.bf16 %v2750_v14, %v2750_v14 }
 0x144   :  { %2275 = vrsqrt.f32 %v144_v54  ;;  %v321_v44 = vmul.f32 %v2683_v27, %v306_v30  ;;  %2157 = vmatprep.mubr.msk.bf16.mxu0 %vm2348_vm1, %v2347_v11  ;;  %v553_v8 = vrot.slane %v2750_v14, %v2704_v7  ;;  %2167 = vmatprep.subr.bf16.mxu0 %v2347_v11  ;;  %v307_v48 = vmul.f32 %v2260_v41, %v2613_v19 }
 0x145   :  { %v2264_v16 = vpop.eup %2263  ;;  %v171_v17 = vmul.f32 %v2695_v1, %v156_v36  ;;  %v907_v46 = vsel %vm55_vm0, %v875_v60, 0.0  ;;  %v876_v47 = vmul.f32 %v722_v38, %v2728_v23  ;;  %v493_v3 = vpack.c.bf16 %v2766_v45, %v2766_v45 }
 0x146   :  { %v2266_v49 = vpop.eup %2265  ;;  %v157_v50 = vmul.f32 %v2264_v16, %v2627_v25  ;;  %908 = vadd.xlane.f32.xlu0 %v907_v46  ;;  %v336_v21 = vadd.f32 %v2689_v2, %v321_v44  ;;  %v561_v53 = vrot.slane %v553_v8, %v2704_v7  ;;  %v554_v55 = vcombine.high %v553_v8, %v553_v8 }
 0x147   :  { %2152 = vmatmul.mubr.msk.bf16.vlgmr.msra.gmra.mxu1 %vm1032_vm2, %v492_v15  ;;  %v910_v56 = vsel %vm55_vm0, %v876_v47, 0.0  ;;  %v322_v63 = vmul.f32 %v2683_v27, %v307_v48  ;;  %v577_v19 = vrot.slane %v2766_v45, %v2704_v7  ;;  %v2795_v59 = vadd.f32 %v2712_v32, %v171_v17 }
 0x148   :  { %911 = vadd.xlane.f32.xlu1 %v910_v56  ;;  %v502_v25 = vpack.c.bf16 %v336_v21, %v336_v21  ;;  %v734_v57 = vrot.slane %v561_v53, %v2707_v26  ;;  %v2792_v58 = vrot.slane %v554_v55, %v2704_v7  ;;  %v172_v61 = vmul.f32 %v2695_v1, %v157_v50 }
 0x149   :  { %v2268_v29 = vpop.eup %2267  ;;  %v337_v62 = vadd.f32 %v2689_v2, %v322_v63  ;;  %v2800_v0 = vrot.slane %v577_v19, %v2704_v7  ;;  %2163 = vmatprep.mubr.msk.bf16.mxu1 %vm2348_vm1, %v2347_v11  ;;  %v569_v4 = vcombine.high %v561_v53, %v561_v53  ;;  %v308_v13 = vmul.f32 %v2266_v49, %v2618_v22 }
 0x14a   :  { %v2270_v33 = vpop.eup %2269  ;;  %v1247_v6 = vsel %vm1032_vm2, %v502_v25, 0  ;;  %v879_v9 = vmul.f32 %v734_v57, %v2719_v42  ;;  %2158 = vmatmul.mubr.msk.bf16.vlgmr.msra.gmra.mxu0 %vm1032_vm2, %v493_v3  ;;  %v738_v52 = vrot.slane %v2792_v58, %v2707_v26  ;;  %v601_v22 = vrot.slane %v2795_v59, %v2704_v7 }
 0x14b   :  { %v158_v39 = vmul.f32 %v2270_v33, %v2632_v28  ;;  %2162 = vmatpush3.bf16.xpose.msra.mxu1 %v1247_v6  ;;  %v503_v43 = vpack.c.bf16 %v337_v62, %v337_v62  ;;  %v750_v41 = vrot.slane %v2800_v0, %v2707_v26  ;;  %v742_v5 = vrot.slane %v569_v4, %v2707_v26 }
 0x14c   :  { %v919_v24 = vsel %vm55_vm0, %v879_v9, 0.0  ;;  %v880_v54 = vmul.f32 %v738_v52, %v2728_v23  ;;  %2173 = vmatprep.subr.bf16.mxu1 %v2347_v11  ;;  %v323_v10 = vmul.f32 %v2683_v27, %v308_v13  ;;  %2169 = vmatprep.mubr.msk.bf16.mxu0 %vm2348_vm1, %v2347_v11  ;;  %v609_v16 = vrot.slane %v601_v22, %v2704_v7 }
 0x14d   :  { %v2272_v28 = vpop.eup %2271  ;;  %v173_v30 = vmul.f32 %v2695_v1, %v158_v39  ;;  %920 = vadd.xlane.f32.xlu0 %v919_v24  ;;  %v1317_v36 = vsel %vm1032_vm2, %v503_v43, 0  ;;  %v883_v60 = vmul.f32 %v750_v41, %v2719_v42  ;;  %v881_v38 = vmul.f32 %v742_v5, %v2756_v20 }
 0x14e   :  { %v159_v15 = vmul.f32 %v2272_v28, %v2655_v37  ;;  %2168 = vmatpush3.bf16.xpose.msra.mxu0 %v1317_v36  ;;  %v922_v44 = vsel %vm55_vm0, %v880_v54, 0.0  ;;  %v338_v8 = vadd.f32 %v2689_v2, %v323_v10  ;;  %v2274_v17 = vpop.eup %2273  ;;  %v2832_v47 = vadd.f32 %v2712_v32, %v172_v61 }
 0x14f   :  { %923 = vadd.xlane.f32.xlu1 %v922_v44  ;;  %v931_v46 = vsel %vm55_vm0, %v883_v60, 0.0  ;;  %2179 = vmatprep.subr.bf16.mxu0 %v2347_v11  ;;  %v309_v48 = vmul.f32 %v2268_v29, %v2641_v31  ;;  %v494_v37 = vpack.c.bf16 %v2795_v59, %v2795_v59  ;;  %v766_v50 = vrot.slane %v609_v16, %v2707_v26 }
 0x150   :  { %v504_v49 = vpack.c.bf16 %v338_v8, %v338_v8  ;;  %v578_v21 = vcombine.high %v577_v19, %v577_v19  ;;  %v174_v55 = vmul.f32 %v2695_v1, %v159_v15  ;;  %v925_v56 = vsel %vm55_vm0, %v881_v38, 0.0 }
 0x151   :  { %v2276_v53 = vpop.eup %2275  ;;  %932 = vadd.xlane.f32.xlu0 %v931_v46  ;;  %v324_v3 = vmul.f32 %v2683_v27, %v309_v48  ;;  %v625_v63 = vrot.slane %v2832_v47, %v2704_v7  ;;  %v887_v25 = vmul.f32 %v766_v50, %v2719_v42  ;;  %v2851_v19 = vadd.f32 %v2712_v32, %v173_v30 }
 0x152   :  { %2164 = vmatmul.mubr.msk.bf16.vlgmr.msra.gmra.mxu1 %vm1032_vm2, %v494_v37  ;;  %v1387_v31 = vsel %vm1032_vm2, %v504_v49, 0  ;;  %v2848_v57 = vrot.slane %v578_v21, %v2704_v7  ;;  %v495_v29 = vpack.c.bf16 %v2832_v47, %v2832_v47  ;;  %v160_v4 = vmul.f32 %v2276_v53, %v2660_v35 }
 0x153   :  { %926 = vadd.xlane.f32.xlu1 %v925_v56  ;;  %2174 = vmatpush3.bf16.xpose.msra.mxu1 %v1387_v31  ;;  %v339_v61 = vadd.f32 %v2689_v2, %v324_v3  ;;  %v2857_v62 = vrot.slane %v625_v63, %v2704_v7  ;;  %v943_v33 = vsel %vm55_vm0, %v887_v25, 0.0  ;;  %v602_v9 = vcombine.high %v601_v22, %v601_v22 }
 0x154   :  { %v754_v6 = vrot.slane %v2848_v57, %v2707_v26  ;;  %2175 = vmatprep.mubr.msk.bf16.mxu1 %vm2348_vm1, %v2347_v11  ;;  %2185 = vmatprep.subr.bf16.mxu1 %v2347_v11  ;;  %v310_v35 = vmul.f32 %v2274_v17, %v2646_v34  ;;  %v496_v43 = vpack.c.bf16 %v2851_v19, %v2851_v19 }
 0x155   :  { %944 = vadd.xlane.f32.xlu0 %v943_v33  ;;  %2170 = vmatmul.mubr.msk.bf16.vlgmr.msra.gmra.mxu0 %vm1032_vm2, %v495_v29  ;;  %v505_v52 = vpack.c.bf16 %v339_v61, %v339_v61  ;;  %v782_v13 = vrot.slane %v2857_v62, %v2707_v26  ;;  %v2874_v41 = vrot.slane %v602_v9, %v2704_v7 }
 0x156   :  { %v884_v39 = vmul.f32 %v754_v6, %v2728_v23  ;;  %2181 = vmatprep.mubr.msk.bf16.mxu0 %vm2348_vm1, %v2347_v11  ;;  %v649_v5 = vrot.slane %v2851_v19, %v2704_v7  ;;  %v325_v34 = vmul.f32 %v2683_v27, %v310_v35  ;;  %v617_v10 = vcombine.high %v609_v16, %v609_v16 }
 0x157   :  { %v1457_v24 = vsel %vm1032_vm2, %v505_v52, 0  ;;  %v891_v54 = vmul.f32 %v782_v13, %v2719_v42  ;;  %v770_v28 = vrot.slane %v2874_v41, %v2707_v26  ;;  %v2888_v36 = vadd.f32 %v2712_v32, %v174_v55  ;;  %v510_v52 = vld [vmem:[%s3456_s3 + $0x6] sm:$0x3] }
 0x158   :  { %2180 = vmatpush3.bf16.xpose.msra.mxu0 %v1457_v24  ;;  %v934_v22 = vsel %vm55_vm0, %v884_v39, 0.0  ;;  %v657_v30 = vrot.slane %v649_v5, %v2704_v7  ;;  %v340_v38 = vadd.f32 %v2689_v2, %v325_v34  ;;  %v774_v15 = vrot.slane %v617_v10, %v2707_v26 }
 0x159   :  { %935 = vadd.xlane.f32.xlu1 %v934_v22  ;;  %v955_v60 = vsel %vm55_vm0, %v891_v54, 0.0  ;;  %v545_v27 = vcombine.high %v2743_v40, %v2743_v40  ;;  %2191 = vmatprep.subr.bf16.mxu0 %v2347_v11  ;;  %v888_v44 = vmul.f32 %v770_v28, %v2728_v23  ;;  %v175_v16 = vmul.f32 %v2695_v1, %v160_v4 }
 0x15a   :  { %956 = vadd.xlane.f32.xlu0 %v955_v60  ;;  %2176 = vmatmul.mubr.msk.bf16.vlgmr.msra.gmra.mxu1 %vm1032_vm2, %v496_v43  ;;  %v798_v8 = vrot.slane %v657_v30, %v2707_v26  ;;  %v506_v17 = vpack.c.bf16 %v340_v38, %v340_v38  ;;  %v626_v2 = vcombine.high %v625_v63, %v625_v63 }
 0x15b   :  { %v726_v46 = vrot.slane %v545_v27, %v2707_v26  ;;  %2187 = vmatprep.mubr.msk.bf16.mxu1 %vm2348_vm1, %v2347_v11  ;;  %v946_v40 = vsel %vm55_vm0, %v888_v44, 0.0  ;;  %v889_v37 = vmul.f32 %v774_v15, %v2756_v20  ;;  %v593_v49 = vcombine.high %v2800_v0, %v2800_v0 }
 0x15c   :  { %v895_v48 = vmul.f32 %v798_v8, %v2719_v42  ;;  %v1527_v50 = vsel %vm1032_vm2, %v506_v17, 0  ;;  %v497_v1 = vpack.c.bf16 %v2888_v36, %v2888_v36  ;;  %v2913_v53 = vrot.slane %v626_v2, %v2704_v7 }
 0x15d   :  { %947 = vadd.xlane.f32.xlu1 %v946_v40  ;;  %v877_v21 = vmul.f32 %v726_v46, %v2756_v20  ;;  %2186 = vmatpush3.bf16.xpose.msra.mxu1 %v1527_v50  ;;  %v758_v56 = vrot.slane %v593_v49, %v2707_v26  ;;  %v650_v3 = vcombine.high %v649_v5, %v649_v5  ;;  %v949_v25 = vsel %vm55_vm0, %v889_v37, 0.0 }
 0x15e   :  { %v967_v55 = vsel %vm55_vm0, %v895_v48, 0.0  ;;  %v641_v0 = vcombine.high %v2857_v62, %v2857_v62  ;;  %v2921_v63 = vadd.f32 %v2712_v32, %v175_v16  ;;  %v786_v31 = vrot.slane %v2913_v53, %v2707_v26  ;;  %2197 = vmatprep.subr.bf16.mxu1 %v2347_v11 }
 0x15f   :  { %968 = vadd.xlane.f32.xlu0 %v967_v55  ;;  %2182 = vmatmul.mubr.msk.bf16.vlgmr.msra.gmra.mxu0 %vm1032_vm2, %v497_v1  ;;  %v2927_v29 = vrot.slane %v650_v3, %v2704_v7  ;;  %v665_v61 = vcombine.high %v657_v30, %v657_v30  ;;  %v913_v62 = vsel %vm55_vm0, %v877_v21, 0.0  ;;  %v673_v32 = vrot.slane %v2888_v36, %v2704_v7 }
 0x160   :  { %v892_v4 = vmul.f32 %v786_v31, %v2728_v23  ;;  %v885_v33 = vmul.f32 %v758_v56, %v2756_v20  ;;  %v790_v9 = vrot.slane %v641_v0, %v2707_v26  ;;  %v546_v13 = vcombine.high %v2754_v18, %v2754_v18  ;;  %2193 = vmatprep.mubr.msk.bf16.mxu0 %vm2348_vm1, %v2347_v11 }
 0x161   :  { %950 = vadd.xlane.f32.xlu1 %v949_v25  ;;  %v802_v6 = vrot.slane %v2927_v29, %v2707_v26  ;;  %v498_v35 = vpack.c.bf16 %v2921_v63, %v2921_v63  ;;  %v570_v39 = vcombine.high %v2792_v58, %v2792_v58  ;;  %v806_v24 = vrot.slane %v665_v61, %v2707_v26 }
 0x162   :  { %v958_v43 = vsel %vm55_vm0, %v892_v4, 0.0  ;;  %v674_v54 = vcombine.high %v673_v32, %v673_v32  ;;  %v2953_v18 = vunpack.c.l.bf16 %v510_v52  ;;  %v937_v34 = vsel %vm55_vm0, %v885_v33, 0.0 }
 0x163   :  { %914 = vadd.xlane.f32.xlu0 %v913_v62  ;;  %v896_v5 = vmul.f32 %v802_v6, %v2728_v23  ;;  %v893_v10 = vmul.f32 %v790_v9, %v2756_v20  ;;  %v730_v22 = vrot.slane %v546_v13, %v2707_v26  ;;  %v681_v58 = vrot.slane %v673_v32, %v2704_v7 }
 0x164   :  { %2188 = vmatmul.mubr.msk.bf16.vlgmr.msra.gmra.mxu1 %vm1032_vm2, %v498_v35  ;;  %v746_v28 = vrot.slane %v570_v39, %v2707_v26  ;;  %v897_v60 = vmul.f32 %v806_v24, %v2756_v20  ;;  %v688_v38 = vrot.slane %v674_v54, %v2704_v7  ;;  %v697_v15 = vrot.slane %v2921_v63, %v2704_v7 }
 0x165   :  { %959 = vadd.xlane.f32.xlu1 %v958_v43  ;;  %2199 = vmatprep.mubr.msk.bf16.mxu1 %vm2348_vm1, %v2347_v11  ;;  %v970_v30 = vsel %vm55_vm0, %v896_v5, 0.0  ;;  %v961_v27 = vsel %vm55_vm0, %v893_v10, 0.0  ;;  %v878_v44 = vmul.f32 %v730_v22, %v2953_v18  ;;  %v814_v8 = vrot.slane %v681_v58, %v2707_v26 }
 0x166   :  { %v594_v16 = vcombine.high %v2848_v57, %v2848_v57  ;;  %v882_v17 = vmul.f32 %v746_v28, %v2953_v18  ;;  %v973_v46 = vsel %vm55_vm0, %v897_v60, 0.0  ;;  %v818_v2 = vrot.slane %v688_v38, %v2707_v26 }
 0x167   :  { %938 = vadd.xlane.f32.xlu0 %v937_v34  ;;  %v618_v40 = vcombine.high %v2874_v41, %v2874_v41  ;;  %v698_v48 = vcombine.high %v697_v15, %v697_v15  ;;  %v916_v37 = vsel %vm55_vm0, %v878_v44, 0.0  ;;  %v899_v49 = vmul.f32 %v814_v8, %v2719_v42 }
 0x168   :  { %v762_v50 = vrot.slane %v594_v16, %v2707_v26  ;;  %v705_v57 = vrot.slane %v697_v15, %v2704_v7  ;;  %v928_v1 = vsel %vm55_vm0, %v882_v17, 0.0  ;;  %v900_v21 = vmul.f32 %v818_v2, %v2728_v23  ;;  %v3023_v15 = vld [vmem:[%s3455_s2 + $0x2] sm:$0x3] }
 0x169   :  { %971 = vadd.xlane.f32.xlu1 %v970_v30  ;;  %v778_v55 = vrot.slane %v618_v40, %v2707_v26  ;;  %v712_v56 = vrot.slane %v698_v48, %v2704_v7  ;;  %v979_v41 = vsel %vm55_vm0, %v899_v49, 0.0  ;;  %v642_v31 = vcombine.high %v2913_v53, %v2913_v53  ;;  %v3016_v30 = vld [vmem:[%s3455_s2] sm:$0x3] }
 0x16a   :  { %v886_v3 = vmul.f32 %v762_v50, %v2953_v18  ;;  %v830_v0 = vrot.slane %v705_v57, %v2707_v26  ;;  %v982_v25 = vsel %vm55_vm0, %v900_v21, 0.0  ;;  %v666_v7 = vcombine.high %v2927_v29, %v2927_v29 }
 0x16b   :  { %962 = vadd.xlane.f32.xlu0 %v961_v27  ;;  %v890_v61 = vmul.f32 %v778_v55, %v2953_v18  ;;  %v834_v62 = vrot.slane %v712_v56, %v2707_v26  ;;  %v794_v33 = vrot.slane %v642_v31, %v2707_v26  ;;  %v689_v6 = vcombine.high %v681_v58, %v681_v58 }
 0x16c   :  { %v940_v4 = vsel %vm55_vm0, %v886_v3, 0.0  ;;  %v903_v32 = vmul.f32 %v830_v0, %v2719_v42  ;;  %v810_v52 = vrot.slane %v666_v7, %v2707_v26  ;;  %v713_v13 = vcombine.high %v705_v57, %v705_v57 }
 0x16d   :  { %974 = vadd.xlane.f32.xlu1 %v973_v46  ;;  %v952_v53 = vsel %vm55_vm0, %v890_v61, 0.0  ;;  %v904_v9 = vmul.f32 %v834_v62, %v2728_v23  ;;  %v894_v29 = vmul.f32 %v794_v33, %v2953_v18  ;;  %v822_v39 = vrot.slane %v689_v6, %v2707_v26 }
 0x16e   :  { %v991_v35 = vsel %vm55_vm0, %v903_v32, 0.0  ;;  %v690_v43 = vcombine.high %v688_v38, %v688_v38  ;;  %v898_v5 = vmul.f32 %v810_v52, %v2953_v18  ;;  %v838_v24 = vrot.slane %v713_v13, %v2707_v26 }
 0x16f   :  { %917 = vadd.xlane.f32.xlu0 %v916_v37  ;;  %v994_v42 = vsel %vm55_vm0, %v904_v9, 0.0  ;;  %v714_v54 = vcombine.high %v712_v56, %v712_v56  ;;  %v964_v23 = vsel %vm55_vm0, %v894_v29, 0.0  ;;  %v901_v34 = vmul.f32 %v822_v39, %v2756_v20 }
 0x170   :  { %v826_v10 = vrot.slane %v690_v43, %v2707_v26  ;;  %v976_v22 = vsel %vm55_vm0, %v898_v5, 0.0  ;;  %v905_v58 = vmul.f32 %v838_v24, %v2756_v20  ;;  %v349_v27 = vunpack.c.l.bf16 %v3016_v30 }
 0x171   :  { %929 = vadd.xlane.f32.xlu1 %v928_v1  ;;  %v842_v28 = vrot.slane %v714_v54, %v2707_v26  ;;  %v985_v60 = vsel %vm55_vm0, %v901_v34, 0.0  ;;  %v350_v8 = vunpack.c.l.bf16 %v3023_v15 }
 0x172   :  { %v902_v38 = vmul.f32 %v826_v10, %v2953_v18  ;;  %v997_v20 = vsel %vm55_vm0, %v905_v58, 0.0  ;;  %v357_v17 = vsel %vm55_vm0, %v349_v27, 0.0 }
 0x173   :  { %980 = vadd.xlane.f32.xlu0 %v979_v41  ;;  %v906_v26 = vmul.f32 %v842_v28, %v2953_v18  ;;  %v360_v46 = vsel %vm55_vm0, %v350_v8, 0.0 }
 0x174   :  { %v988_v44 = vsel %vm55_vm0, %v902_v38, 0.0 }
 0x175   :  { %983 = vadd.xlane.f32.xlu1 %v982_v25  ;;  %v1000_v16 = vsel %vm55_vm0, %v906_v26, 0.0  ;;  %v3090_v26 = vld [vmem:[%s3455_s2 + $0x6] sm:$0x3] }
 0x177   :  { %941 = vadd.xlane.f32.xlu0 %v940_v4 }
 0x179   :  { %953 = vadd.xlane.f32.xlu1 %v952_v53 }
 0x17b   :  { %992 = vadd.xlane.f32.xlu0 %v991_v35  ;;  %v3067_v35 = vld [vmem:[%s3455_s2 + $0x4] sm:$0x3] }
 0x17c   :  { %v351_v10 = vunpack.c.l.bf16 %v3067_v35 }
 0x17d   :  { %995 = vadd.xlane.f32.xlu1 %v994_v42 }
 0x17f   :  { %965 = vadd.xlane.f32.xlu0 %v964_v23 }
 0x181   :  { %977 = vadd.xlane.f32.xlu1 %v976_v22 }
 0x183   :  { %986 = vadd.xlane.f32.xlu0 %v985_v60 }
 0x185   :  { %998 = vadd.xlane.f32.xlu1 %v997_v20 }
 0x187   :  { %989 = vadd.xlane.f32.xlu0 %v988_v44 }
 0x189   :  { %1001 = vadd.xlane.f32.xlu1 %v1000_v16 }
 0x18b   :  { %358 = vadd.xlane.f32.xlu0 %v357_v17 }
 0x18d   :  { %361 = vadd.xlane.f32.xlu1 %v360_v46 }
 0x1cf   :  { %v909_v18 = vpop.xlane.xlu0 %908 }
 0x1d0   :  { %v1012_v6 = vrot.slane %v909_v18, %v2678_v12 }
 0x1d1   :  { %v912_v2 = vpop.xlane.xlu1 %911 }
 0x1d2   :  { %v1016_v4 = vrot.slane %v912_v2, %v2678_v12 }
 0x1d4   :  { %v1026_v52 = vsel %vm1025_vm3, %v1016_v4, %v1012_v6 }
 0x1d6   :  { %v921_v40 = vpop.xlane.xlu0 %920 }
 0x1d7   :  { %v1086_v54 = vrot.slane %v921_v40, %v2678_v12 }
 0x1d8   :  { %v924_v48 = vpop.xlane.xlu1 %923 }
 0x1d9   :  { %v1090_v29 = vrot.slane %v924_v48, %v2678_v12  ;;  %v363_v48 = vsel %vm55_vm0, %v351_v10, 0.0 }
 0x1da   :  { %v933_v37 = vpop.xlane.xlu0 %932 }
 0x1db   :  { %v1099_v60 = vsel %vm1025_vm3, %v1090_v29, %v1086_v54  ;;  %v1156_v44 = vrot.slane %v933_v37, %v2678_v12 }
 0x1dc   :  { %v927_v49 = vpop.xlane.xlu1 %926 }
 0x1dd   :  { %v1094_v43 = vrot.slane %v927_v49, %v2678_v12 }
 0x1de   :  { %v3037_v50 = vpop.xlane.xlu0 %944 }
 0x1df   :  { %v1100_v18 = vsel %vm1027_vm5, %v1094_v43, %v1099_v60  ;;  %v1226_v60 = vrot.slane %v3037_v50, %v2678_v12  ;;  %v3145_v50 = vld [vmem:[%s3455_s2 + $0xa] sm:$0x3] }
 0x1e2   :  { %v936_v57 = vpop.xlane.xlu1 %935 }
 0x1e3   :  { %v3039_v1 = vpop.xlane.xlu0 %956  ;;  %v1160_v22 = vrot.slane %v936_v57, %v2678_v12 }
 0x1e5   :  { %v1169_v49 = vsel %vm1025_vm3, %v1160_v22, %v1156_v44 }
 0x1e6   :  { %v3041_v21 = vpop.xlane.xlu1 %947 }
 0x1e7   :  { %v1230_v43 = vrot.slane %v3041_v21, %v2678_v12 }
 0x1e8   :  { %v3043_v55 = vpop.xlane.xlu0 %968 }
 0x1e9   :  { %v1239_v44 = vsel %vm1025_vm3, %v1230_v43, %v1226_v60 }
 0x1ea   :  { %v3045_v56 = vpop.xlane.xlu1 %950 }
 0x1ec   :  { %v915_v41 = vpop.xlane.xlu0 %914 }
 0x1ed   :  { %v1020_v33 = vrot.slane %v915_v41, %v2678_v12 }
 0x1ee   :  { %v3047_v3 = vpop.xlane.xlu1 %959 }
 0x1ef   :  { %v1028_v39 = vsel %vm1027_vm5, %v1020_v33, %v1026_v52 }
 0x1f0   :  { %v939_v0 = vpop.xlane.xlu0 %938 }
 0x1f1   :  { %v1164_v38 = vrot.slane %v939_v0, %v2678_v12  ;;  %v352_v0 = vunpack.c.l.bf16 %v3090_v26 }
 0x1f2   :  { %v3049_v31 = vpop.xlane.xlu1 %971 }
 0x1f3   :  { %v1170_v4 = vsel %vm1027_vm5, %v1164_v38, %v1169_v49  ;;  %v366_v54 = vsel %vm55_vm0, %v352_v0, 0.0 }
 0x1f4   :  { %v3051_v25 = vpop.xlane.xlu0 %962 }
 0x1f6   :  { %v3053_v61 = vpop.xlane.xlu1 %974 }
 0x1f8   :  { %v918_v62 = vpop.xlane.xlu0 %917 }
 0x1f9   :  { %v1024_v53 = vrot.slane %v918_v62, %v2678_v12  ;;  %v3108_v62 = vld [vmem:[%s3455_s2 + $0x8] sm:$0x3] }
 0x1fa   :  { %v930_v7 = vpop.xlane.xlu1 %929 }
 0x1fb   :  { %v1030_v5 = vsel %vm1029_vm4, %v1024_v53, %v1028_v39  ;;  %v1098_v23 = vrot.slane %v930_v7, %v2678_v12  ;;  %v353_v39 = vunpack.c.l.bf16 %v3108_v62 }
 0x1fc   :  { %v3056_v32 = vpop.xlane.xlu0 %980 }
 0x1fd   :  { %v1101_v2 = vsel %vm1029_vm4, %v1098_v23, %v1100_v18  ;;  %v1234_v23 = vrot.slane %v3045_v56, %v2678_v12  ;;  %v369_v56 = vsel %vm55_vm0, %v353_v39, 0.0 }
 0x1fe   :  { %v3061_v9 = vpop.xlane.xlu1 %983 }
 0x200   :  { %v942_v13 = vpop.xlane.xlu0 %941 }
 0x201   :  { %v1168_v16 = vrot.slane %v942_v13, %v2678_v12 }
 0x202   :  { %v3072_v42 = vpop.xlane.xlu1 %953  ;;  %v1073_v24 = vpop.f32.mrf.mxu0 }
 0x203   :  { %v3077_v34 = vadd.f32 %v1073_v24, %v1030_v5  ;;  %v1171_v33 = vsel %vm1029_vm4, %v1168_v16, %v1170_v4  ;;  %v1238_v21 = vrot.slane %v3072_v42, %v2678_v12  ;;  %v1304_v16 = vrot.slane %v3051_v25, %v2678_v12 }
 0x204   :  { %v3081_v58 = vpop.xlane.xlu0 %992  ;;  %v2147_v28 = vpop.f32.mrf.mxu0  ;;  %v1296_v42 = vrot.slane %v3039_v1, %v2678_v12  ;;  %v3161_v1 = vld [vmem:[%s3455_s2 + $0xc] sm:$0x3] }
 0x205   :  { %v1570_v20 = vsel %vm1569_vm6, %v3077_v34, -inf }
 0x206   :  { %v3094_v17 = vpop.xlane.xlu1 %995  ;;  %v1076_v46 = vpop.f32.mrf.mxu0  ;;  %1571 = vmax.xlane.f32.xlu0 %v1570_v20  ;;  %v1300_v20 = vrot.slane %v3047_v3, %v2678_v12 }
 0x207   :  { %v1143_v40 = vpop.f32.mrf.mxu1 }
 0x208   :  { %v966_v57 = vpop.xlane.xlu0 %965  ;;  %v3102_v41 = vadd.f32 %v1143_v40, %v1101_v2  ;;  %v2148_v37 = vpop.f32.mrf.mxu0  ;;  %v1240_v40 = vsel %vm1027_vm5, %v1234_v23, %v1239_v44  ;;  %v1309_v25 = vsel %vm1025_vm3, %v1300_v20, %v1296_v42  ;;  %v1440_v44 = vrot.slane %v3061_v9, %v2678_v12 }
 0x209   :  { %v2153_v7 = vpop.f32.mrf.mxu1  ;;  %v1308_v3 = vrot.slane %v966_v57, %v2678_v12  ;;  %v1370_v57 = vrot.slane %v3049_v31, %v2678_v12 }
 0x20a   :  { %v1213_v6 = vpop.f32.mrf.mxu0  ;;  %364 = vadd.xlane.f32.xlu0 %v363_v48  ;;  %v1573_v53 = vsel %vm1569_vm6, %v3102_v41, -inf  ;;  %v3114_v52 = vpop.xlane.xlu1 %977  ;;  %v1241_v48 = vsel %vm1029_vm4, %v1238_v21, %v1240_v40  ;;  %v354_v7 = vunpack.c.l.bf16 %v3145_v50 }
 0x20b   :  { %v1146_v13 = vpop.f32.mrf.mxu1  ;;  %v3116_v29 = vadd.f32 %v1213_v6, %v1171_v33  ;;  %1574 = vmax.xlane.f32.xlu1 %v1573_v53  ;;  %v1310_v33 = vsel %vm1027_vm5, %v1304_v16, %v1309_v25  ;;  %v1374_v6 = vrot.slane %v3053_v61, %v2678_v12  ;;  %v1378_v23 = vrot.slane %v3114_v52, %v2678_v12  ;;  %v3187_v52 = vld [vmem:[%s3455_s2 + $0xe] sm:$0x3] }
 0x20c   :  { %v3121_v5 = vpop.xlane.xlu0 %986  ;;  %v2159_v24 = vpop.f32.mrf.mxu0  ;;  %v1311_v53 = vsel %vm1029_vm4, %v1308_v3, %v1310_v33  ;;  %v372_v21 = vsel %vm55_vm0, %v354_v7, 0.0 }
 0x20d   :  { %v2154_v22 = vpop.f32.mrf.mxu1  ;;  %v1576_v28 = vsel %vm1569_vm6, %v3116_v29, -inf  ;;  %v1444_v42 = vrot.slane %v3121_v5, %v2678_v12 }
 0x20e   :  { %v1216_v38 = vpop.f32.mrf.mxu0  ;;  %1577 = vmax.xlane.f32.xlu0 %v1576_v28  ;;  %v3150_v18 = vpop.xlane.xlu1 %998  ;;  %v355_v28 = vunpack.c.l.bf16 %v3161_v1 }
 0x20f   :  { %367 = vadd.xlane.f32.xlu1 %v366_v54  ;;  %v1366_v54 = vrot.slane %v3043_v55, %v2678_v12 }
 0x210   :  { %v2160_v46 = vpop.f32.mrf.mxu0  ;;  %v990_v2 = vpop.xlane.xlu0 %989 }
 0x211   :  { %v1379_v38 = vsel %vm1025_vm3, %v1370_v57, %v1366_v54  ;;  %v1448_v9 = vrot.slane %v990_v2, %v2678_v12 }
 0x212   :  { %v1283_v49 = vpop.f32.mrf.mxu1  ;;  %370 = vadd.xlane.f32.xlu0 %v369_v56  ;;  %v1002_v61 = vpop.xlane.xlu1 %1001  ;;  %v1380_v46 = vsel %vm1027_vm5, %v1374_v6, %v1379_v38  ;;  %v1506_v38 = vrot.slane %v3081_v58, %v2678_v12 }
 0x213   :  { %v3155_v37 = vadd.f32 %v1283_v49, %v1241_v48  ;;  %v1381_v3 = vsel %vm1029_vm4, %v1378_v23, %v1380_v46  ;;  %v375_v48 = vsel %vm55_vm0, %v355_v28, 0.0  ;;  %v1436_v49 = vrot.slane %v3056_v32, %v2678_v12 }
 0x214   :  { %v2165_v4 = vpop.f32.mrf.mxu1  ;;  %v359_v24 = vpop.xlane.xlu0 %358 }
 0x215   :  { %v1353_v13 = vpop.f32.mrf.mxu0  ;;  %v1579_v43 = vsel %vm1569_vm6, %v3155_v37, -inf  ;;  %v381_v56 = vmul.f32 0.125, %v359_v24  ;;  %v356_v4 = vunpack.c.l.bf16 %v3187_v52  ;;  %v1510_v24 = vrot.slane %v3094_v17, %v2678_v12 }
 0x216   :  { %v1286_v31 = vpop.f32.mrf.mxu1  ;;  %v3175_v22 = vadd.f32 %v1353_v13, %v1311_v53  ;;  %1580 = vmax.xlane.f32.xlu1 %v1579_v43  ;;  %v362_v33 = vpop.xlane.xlu1 %361  ;;  %v1449_v53 = vsel %vm1025_vm3, %v1440_v44, %v1436_v49  ;;  %v1518_v17 = vrot.slane %v1002_v61, %v2678_v12 }
 0x217   :  { %v2171_v60 = vpop.f32.mrf.mxu0  ;;  %v3206_v6 = vsub.f32 %v349_v27, %v381_v56  ;;  %v1450_v2 = vsel %vm1027_vm5, %v1444_v42, %v1449_v53  ;;  %v382_v43 = vmul.f32 0.125, %v362_v33  ;;  %v378_v30 = vsel %vm55_vm0, %v356_v4, 0.0 }
 0x218   :  { %v2166_v20 = vpop.f32.mrf.mxu1  ;;  %v1582_v55 = vsel %vm1569_vm6, %v3175_v22, -inf  ;;  %v1451_v54 = vsel %vm1029_vm4, %v1448_v9, %v1450_v2  ;;  %v1514_v27 = vrot.slane %v3150_v18, %v2678_v12  ;;  %v1519_v18 = vsel %vm1025_vm3, %v1510_v24, %v1506_v38 }
 0x219   :  { %v1356_v16 = vpop.f32.mrf.mxu0  ;;  %1583 = vmax.xlane.f32.xlu0 %v1582_v55  ;;  %v3231_v56 = vsub.f32 %v350_v8, %v382_v43 }
 0x21a   :  { %v1423_v40 = vpop.f32.mrf.mxu1  ;;  %373 = vadd.xlane.f32.xlu1 %v372_v21  ;;  %v397_v21 = vmul.f32 %v3206_v6, %v3206_v6  ;;  %v1520_v16 = vsel %vm1027_vm5, %v1514_v27, %v1519_v18 }
 0x21b   :  { %v3201_v25 = vadd.f32 %v1423_v40, %v1381_v3  ;;  %v2172_v57 = vpop.f32.mrf.mxu0  ;;  %v1521_v58 = vsel %vm1029_vm4, %v1518_v17, %v1520_v16  ;;  %v398_v3 = vmul.f32 %v3231_v56, %v3231_v56 }
 0x21c   :  { %v2177_v5 = vpop.f32.mrf.mxu1  ;;  %v405_v46 = vsel %vm55_vm0, %v397_v21, 0.0 }
 0x21d   :  { %376 = vadd.xlane.f32.xlu0 %v375_v48  ;;  %v1585_v13 = vsel %vm1569_vm6, %v3201_v25, -inf  ;;  %v408_v48 = vsel %vm55_vm0, %v398_v3, 0.0 }
 0x21e   :  { %v1426_v32 = vpop.f32.mrf.mxu1  ;;  %1586 = vmax.xlane.f32.xlu1 %v1585_v13 }
 0x21f   :  { %v1493_v23 = vpop.f32.mrf.mxu0 }
 0x220   :  { %v3220_v31 = vadd.f32 %v1493_v23, %v1451_v54  ;;  %v2178_v60 = vpop.f32.mrf.mxu1 }
 0x221   :  { %v2183_v20 = vpop.f32.mrf.mxu0 }
 0x222   :  { %v1588_v55 = vsel %vm1569_vm6, %v3220_v31, -inf  ;;  %379 = vadd.xlane.f32.xlu1 %v378_v30 }
 0x223   :  { %v1496_v44 = vpop.f32.mrf.mxu0  ;;  %1589 = vmax.xlane.f32.xlu0 %v1588_v55 }
 0x224   :  { %v1563_v12 = vpop.f32.mrf.mxu1 }
 0x225   :  { %v2184_v61 = vpop.f32.mrf.mxu0  ;;  %v3237_v42 = vadd.f32 %v1563_v12, %v1521_v58 }
 0x226   :  { %v2189_v15 = vpop.f32.mrf.mxu1 }
 0x227   :  { %406 = vadd.xlane.f32.xlu0 %v405_v46  ;;  %v1591_v8 = vsel %vm1569_vm6, %v3237_v42, -inf }
 0x228   :  { %v1566_v40 = vpop.f32.mrf.mxu1  ;;  %1592 = vmax.xlane.f32.xlu1 %v1591_v8 }
 0x22a   :  { %v2190_v49 = vpop.f32.mrf.mxu1 }
 0x22c   :  { %409 = vadd.xlane.f32.xlu1 %v408_v48 }
 0x28f   :  { %v1572_v9 = vpop.xlane.xlu0 %1571 }
 0x290   :  { %v1594_v57 = vsub.f32 %v3077_v34, %v1572_v9 }
 0x292   :  { %v1602_v33 = vmul.f32 1.442695, %v1594_v57 }
 0x293   :  { %v365_v5 = vpop.xlane.xlu0 %364 }
 0x294   :  { %2277 = vpow2.f32 %v1602_v33  ;;  %v383_v53 = vmul.f32 0.125, %v365_v5  ;;  %v1575_v13 = vpop.xlane.xlu1 %1574 }
 0x295   :  { %v1595_v32 = vsub.f32 %v3102_v41, %v1575_v13 }
 0x296   :  { %v3248_v2 = vsub.f32 %v351_v10, %v383_v53 }
 0x297   :  { %v1604_v43 = vmul.f32 1.442695, %v1595_v32  ;;  %v1578_v24 = vpop.xlane.xlu0 %1577 }
 0x298   :  { %v1596_v54 = vsub.f32 %v3116_v29, %v1578_v24  ;;  %v368_v23 = vpop.xlane.xlu1 %367  ;;  %v399_v30 = vmul.f32 %v3248_v2, %v3248_v2 }
 0x299   :  { %2279 = vpow2.f32 %v1604_v43  ;;  %v384_v34 = vmul.f32 0.125, %v368_v23 }
 0x29a   :  { %v1606_v27 = vmul.f32 1.442695, %v1596_v54  ;;  %v411_v60 = vsel %vm55_vm0, %v399_v30, 0.0 }
 0x29b   :  { %v3256_v41 = vsub.f32 %v352_v0, %v384_v34  ;;  %v371_v35 = vpop.xlane.xlu0 %370  ;;  %412 = vadd.xlane.f32.xlu0 %v411_v60 }
 0x29c   :  { %2281 = vpow2.f32 %v1606_v27  ;;  %v385_v10 = vmul.f32 0.125, %v371_v35 }
 0x29d   :  { %v400_v29 = vmul.f32 %v3256_v41, %v3256_v41 }
 0x29e   :  { %v3262_v21 = vsub.f32 %v353_v39, %v385_v10 }
 0x29f   :  { %v1581_v38 = vpop.xlane.xlu1 %1580  ;;  %v414_v17 = vsel %vm55_vm0, %v400_v29, 0.0 }
 0x2a0   :  { %v1597_v20 = vsub.f32 %v3155_v37, %v1581_v38  ;;  %415 = vadd.xlane.f32.xlu1 %v414_v17  ;;  %v401_v26 = vmul.f32 %v3262_v21, %v3262_v21 }
 0x2a1   :  { %v3268_v0 = vpop.eup %2277 }
 0x2a2   :  { %v1608_v55 = vmul.f32 1.442695, %v1597_v20  ;;  %v1584_v18 = vpop.xlane.xlu0 %1583  ;;  %v1618_v44 = vsel %vm1569_vm6, %v3268_v0, 0.0  ;;  %v417_v46 = vsel %vm55_vm0, %v401_v26, 0.0 }
 0x2a3   :  { %v1598_v62 = vsub.f32 %v3175_v22, %v1584_v18  ;;  %v374_v39 = vpop.xlane.xlu1 %373  ;;  %1619 = vadd.xlane.f32.xlu0 %v1618_v44 }
 0x2a4   :  { %2283 = vpow2.f32 %v1608_v55  ;;  %v386_v16 = vmul.f32 0.125, %v374_v39  ;;  %v3325_v55 = vld [vmem:[%s3461_s8] ss:$0 sm:$0xff]  ;;  %s2350_s8 = smov [#allocation2]  }
 0x2a5   :  { %v1610_v37 = vmul.f32 1.442695, %v1598_v62  ;;  %v3333_v62 = vld [vmem:[%s3462_s9] ss:$0 sm:$0xff]  ;;  %s2076_s9 = sshll.u32 %s2350_s8, 4  ;;  %s2077_s9 = int_to_ptr.vmem [resolvable:$true] %s2076_s9 }
 0x2a6   :  { %v3274_v58 = vpop.eup %2279  ;;  %v3278_v12 = vsub.f32 %v354_v7, %v386_v16  ;;  %v377_v61 = vpop.xlane.xlu0 %376  ;;  %s2325_s15 = scalar_lea.vmem %s2077_s9, 512  ;;  %p2330_p1 = scmp.lt.s32.totalorder %s2077_s9, %s2077_s9 }
 0x2a7   :  { %2285 = vpow2.f32 %v1610_v37  ;;  %v387_v3 = vmul.f32 0.125, %v377_v61  ;;  %v1587_v15 = vpop.xlane.xlu1 %1586  ;;  %418 = vadd.xlane.f32.xlu0 %v417_v46  ;;  %v1621_v22 = vsel %vm1569_vm6, %v3274_v58, 0.0  ;;  %p2326_p0 = scmp.ne.s32.totalorder %s2077_s9, %s2325_s15  ;;  %p2331_p2 = scmp.lt.s32.totalorder %s2325_s15, %s2325_s15 }
 0x2a8   :  { %v1599_v8 = vsub.f32 %v3201_v25, %v1587_v15  ;;  %1622 = vadd.xlane.f32.xlu1 %v1621_v22  ;;  %v402_v40 = vmul.f32 %v3278_v12, %v3278_v12 }
 0x2a9   :  { %v3285_v48 = vpop.eup %2281  ;;  %v3289_v50 = vsub.f32 %v355_v28, %v387_v3  ;;  %p2332_p3 = por %p2331_p2, %p2330_p1 }
 0x2aa   :  { %v1612_v7 = vmul.f32 1.442695, %v1599_v8  ;;  %v1624_v49 = vsel %vm1569_vm6, %v3285_v48, 0.0  ;;  %v420_v57 = vsel %vm55_vm0, %v402_v40, 0.0 }
 0x2ab   :  { %v380_v9 = vpop.xlane.xlu1 %379  ;;  %1625 = vadd.xlane.f32.xlu0 %v1624_v49  ;;  %v403_v25 = vmul.f32 %v3289_v50, %v3289_v50  ;;  %p2333_p4 = pnand %p2332_p3, %p2326_p0 }
 0x2ac   :  { %2287 = vpow2.f32 %v1612_v7  ;;  %v1590_v33 = vpop.xlane.xlu0 %1589  ;;  %v388_v5 = vmul.f32 0.125, %v380_v9  ;;  %421 = vadd.xlane.f32.xlu1 %v420_v57 }
 0x2ad   :  { %v1600_v53 = vsub.f32 %v3220_v31, %v1590_v33  ;;  %v423_v1 = vsel %vm55_vm0, %v403_v25, 0.0 }
 0x2ae   :  { %v3300_v28 = vsub.f32 %v356_v4, %v388_v5 }
 0x2af   :  { %v1614_v13 = vmul.f32 1.442695, %v1600_v53  ;;  %424 = vadd.xlane.f32.xlu0 %v423_v1 }
 0x2b0   :  { %v407_v32 = vpop.xlane.xlu0 %406  ;;  %v404_v31 = vmul.f32 %v3300_v28, %v3300_v28 }
 0x2b1   :  { %v3302_v43 = vpop.eup %2283  ;;  %2289 = vpow2.f32 %v1614_v13  ;;  %v429_v24 = vmul.f32 0.125, %v407_v32  ;;  %v1593_v54 = vpop.xlane.xlu1 %1592 }
 0x2b2   :  { %v1627_v23 = vsel %vm1569_vm6, %v3302_v43, 0.0  ;;  %v1601_v34 = vsub.f32 %v3237_v42, %v1593_v54  ;;  %v426_v35 = vsel %vm55_vm0, %v404_v31, 0.0 }
 0x2b3   :  { %v437_v30 = vadd.f32 1e-05, %v429_v24  ;;  %1628 = vadd.xlane.f32.xlu1 %v1627_v23 }
 0x2b4   :  { %v3309_v52 = vpop.eup %2285  ;;  %v1616_v4 = vmul.f32 1.442695, %v1601_v34 }
 0x2b5   :  { %2291 = vrsqrt.f32 %v437_v30  ;;  %v1630_v27 = vsel %vm1569_vm6, %v3309_v52, 0.0  ;;  %v410_v60 = vpop.xlane.xlu1 %409 }
 0x2b6   :  { %1631 = vadd.xlane.f32.xlu0 %v1630_v27  ;;  %2293 = vpow2.f32 %v1616_v4  ;;  %v430_v10 = vmul.f32 0.125, %v410_v60 }
 0x2b7   :  { %427 = vadd.xlane.f32.xlu1 %v426_v35 }
 0x2b8   :  { %v438_v38 = vadd.f32 1e-05, %v430_v10 }
 0x2b9   :  { %v3314_v29 = vpop.eup %2287 }
 0x2ba   :  { %v1633_v42 = vsel %vm1569_vm6, %v3314_v29, 0.0  ;;  %2295 = vrsqrt.f32 %v438_v38 }
 0x2bb   :  { %1634 = vadd.xlane.f32.xlu1 %v1633_v42 }
 0x2be   :  { %v3318_v17 = vpop.eup %2289 }
 0x2bf   :  { %v1636_v20 = vsel %vm1569_vm6, %v3318_v17, 0.0 }
 0x2c0   :  { %1637 = vadd.xlane.f32.xlu0 %v1636_v20 }
 0x2c2   :  { %v2292_v26 = vpop.eup %2291 }
 0x2c3   :  { %v453_v18 = vmul.f32 %v2292_v26, %v3206_v6  ;;  %v3328_v44 = vpop.eup %2293 }
 0x2c4   :  { %v1639_v39 = vsel %vm1569_vm6, %v3328_v44, 0.0 }
 0x2c5   :  { %v468_v16 = vmul.f32 %v3325_v55, %v453_v18  ;;  %1640 = vadd.xlane.f32.xlu1 %v1639_v39 }
 0x2c7   :  { %v483_v46 = vadd.f32 %v3333_v62, %v468_v16  ;;  %v2296_v37 = vpop.eup %2295 }
 0x2c8   :  { %v454_v6 = vmul.f32 %v2296_v37, %v3231_v56 }
 0x2c9   :  { %v1666_v61 = vpack.c.bf16 %v483_v46, %v483_v46 }
 0x2ca   :  { %v469_v15 = vmul.f32 %v3325_v55, %v454_v6 }
 0x2cb   :  { %v1680_v3 = vsel %vm1678_vm7, %v1666_v61, 0 }
 0x2cc   :  { %2192 = vmatpush3.bf16.msra.mxu0 %v1680_v3  ;;  %v484_v22 = vadd.f32 %v3333_v62, %v469_v15 }
 0x2cd   :  { %2203 = vmatprep.subr.bf16.mxu0 %v2347_v11 }
 0x2ce   :  { %v1667_v8 = vpack.c.bf16 %v484_v22, %v484_v22 }
 0x2d0   :  { %v1726_v40 = vsel %vm1678_vm7, %v1667_v8, 0 }
 0x2d1   :  { %2198 = vmatpush3.bf16.msra.mxu1 %v1726_v40 }
 0x2d2   :  { %2209 = vmatprep.subr.bf16.mxu1 %v2347_v11 }
 0x324   :  { %v413_v7 = vpop.xlane.xlu0 %412 }
 0x325   :  { %v431_v49 = vmul.f32 0.125, %v413_v7 }
 0x327   :  { %v439_v9 = vadd.f32 1e-05, %v431_v49 }
 0x329   :  { %2297 = vrsqrt.f32 %v439_v9  ;;  %v416_v56 = vpop.xlane.xlu1 %415 }
 0x32a   :  { %v432_v57 = vmul.f32 0.125, %v416_v56 }
 0x32c   :  { %v440_v25 = vadd.f32 1e-05, %v432_v57  ;;  %v1620_v33 = vpop.xlane.xlu0 %1619 }
 0x32d   :  { %2299 = vrcp.f32 %v1620_v33 }
 0x32e   :  { %2301 = vrsqrt.f32 %v440_v25 }
 0x330   :  { %v419_v5 = vpop.xlane.xlu0 %418 }
 0x331   :  { %v433_v53 = vmul.f32 0.125, %v419_v5  ;;  %v1623_v1 = vpop.xlane.xlu1 %1622 }
 0x332   :  { %2303 = vrcp.f32 %v1623_v1 }
 0x333   :  { %v441_v13 = vadd.f32 1e-05, %v433_v53 }
 0x334   :  { %v1626_v32 = vpop.xlane.xlu0 %1625 }
 0x335   :  { %2305 = vrsqrt.f32 %v441_v13  ;;  %v422_v24 = vpop.xlane.xlu1 %421 }
 0x336   :  { %v2298_v54 = vpop.eup %2297  ;;  %2307 = vrcp.f32 %v1626_v32  ;;  %v434_v23 = vmul.f32 0.125, %v422_v24 }
 0x337   :  { %v455_v31 = vmul.f32 %v2298_v54, %v3248_v2 }
 0x338   :  { %v442_v30 = vadd.f32 1e-05, %v434_v23  ;;  %v425_v34 = vpop.xlane.xlu0 %424 }
 0x339   :  { %v435_v4 = vmul.f32 0.125, %v425_v34  ;;  %v470_v27 = vmul.f32 %v3325_v55, %v455_v31 }
 0x33a   :  { %v2300_v60 = vpop.eup %2299  ;;  %2309 = vrsqrt.f32 %v442_v30 }
 0x33b   :  { %v2302_v35 = vpop.eup %2301  ;;  %v443_v10 = vadd.f32 1e-05, %v435_v4  ;;  %v1650_v38 = vmul.f32 %v2300_v60, %v3268_v0  ;;  %v485_v42 = vadd.f32 %v3333_v62, %v470_v27 }
 0x33c   :  { %v1629_v20 = vpop.xlane.xlu1 %1628  ;;  %v456_v26 = vmul.f32 %v2302_v35, %v3256_v41 }
 0x33d   :  { %2311 = vrsqrt.f32 %v443_v10  ;;  %v1658_v18 = vpack.c.bf16 %v1650_v38, %v1650_v38  ;;  %2061 = vst.msk [vmem:[#allocation2] sm:$0xf] %vm1569_vm6, %v1650_v38  ;;  %v1668_v2 = vpack.c.bf16 %v485_v42, %v485_v42 }
 0x33e   :  { %2313 = vrcp.f32 %v1629_v20  ;;  %v471_v39 = vmul.f32 %v3325_v55, %v456_v26 }
 0x33f   :  { %v2304_v16 = vpop.eup %2303  ;;  %v1632_v46 = vpop.xlane.xlu0 %1631  ;;  %2194 = vmatmul.mubr.msk.bf16.vlgmr.msra.gmra.mxu0 %vm1674_vm8, %v1658_v18  ;;  %v1772_v0 = vsel %vm1678_vm7, %v1668_v2, 0 }
 0x340   :  { %2315 = vrcp.f32 %v1632_v46  ;;  %v428_v37 = vpop.xlane.xlu1 %427  ;;  %2204 = vmatpush3.bf16.msra.mxu0 %v1772_v0  ;;  %v1651_v61 = vmul.f32 %v2304_v16, %v3274_v58  ;;  %v486_v41 = vadd.f32 %v3333_v62, %v471_v39  ;;  %2205 = vmatprep.mubr.msk.bf16.mxu0 %vm2348_vm1, %v2347_v11 }
 0x341   :  { %v436_v6 = vmul.f32 0.125, %v428_v37  ;;  %2215 = vmatprep.subr.bf16.mxu0 %v2347_v11 }
 0x342   :  { %v2306_v3 = vpop.eup %2305  ;;  %v1659_v15 = vpack.c.bf16 %v1651_v61, %v1651_v61  ;;  %2062 = vst.msk [vmem:[#allocation2 + $0x4] sm:$0xf] %vm1569_vm6, %v1651_v61  ;;  %v1669_v22 = vpack.c.bf16 %v486_v41, %v486_v41 }
 0x343   :  { %v2308_v8 = vpop.eup %2307  ;;  %v444_v40 = vadd.f32 1e-05, %v436_v6  ;;  %v457_v7 = vmul.f32 %v2306_v3, %v3262_v21 }
 0x344   :  { %v1635_v49 = vpop.xlane.xlu1 %1634  ;;  %2200 = vmatmul.mubr.msk.bf16.vlgmr.msra.gmra.mxu1 %vm1674_vm8, %v1659_v15  ;;  %v1818_v58 = vsel %vm1678_vm7, %v1669_v22, 0  ;;  %v1652_v9 = vmul.f32 %v2308_v8, %v3285_v48 }
 0x345   :  { %2317 = vrsqrt.f32 %v444_v40  ;;  %2210 = vmatpush3.bf16.msra.mxu1 %v1818_v58  ;;  %2211 = vmatprep.mubr.msk.bf16.mxu1 %vm2348_vm1, %v2347_v11  ;;  %v472_v56 = vmul.f32 %v3325_v55, %v457_v7 }
 0x346   :  { %2319 = vrcp.f32 %v1635_v49  ;;  %v1660_v57 = vpack.c.bf16 %v1652_v9, %v1652_v9  ;;  %2063 = vst.msk [vmem:[#allocation2 + $0x8] sm:$0xf] %vm1569_vm6, %v1652_v9  ;;  %2221 = vmatprep.subr.bf16.mxu1 %v2347_v11 }
 0x347   :  { %v2310_v21 = vpop.eup %2309  ;;  %v487_v25 = vadd.f32 %v3333_v62, %v472_v56 }
 0x348   :  { %2206 = vmatmul.mubr.msk.bf16.vlgmr.msra.gmra.mxu0 %vm1674_vm8, %v1660_v57  ;;  %v458_v48 = vmul.f32 %v2310_v21, %v3278_v12 }
 0x349   :  { %v1638_v33 = vpop.xlane.xlu0 %1637  ;;  %v1670_v5 = vpack.c.bf16 %v487_v25, %v487_v25  ;;  %2217 = vmatprep.mubr.msk.bf16.mxu0 %vm2348_vm1, %v2347_v11 }
 0x34a   :  { %v2312_v53 = vpop.eup %2311  ;;  %2321 = vrcp.f32 %v1638_v33  ;;  %v473_v1 = vmul.f32 %v3325_v55, %v458_v48 }
 0x34b   :  { %v2314_v13 = vpop.eup %2313  ;;  %v1864_v32 = vsel %vm1678_vm7, %v1670_v5, 0  ;;  %v459_v24 = vmul.f32 %v2312_v53, %v3289_v50 }
 0x34c   :  { %v1653_v54 = vmul.f32 %v2314_v13, %v3302_v43  ;;  %2216 = vmatpush3.bf16.msra.mxu0 %v1864_v32  ;;  %v488_v23 = vadd.f32 %v3333_v62, %v473_v1 }
 0x34d   :  { %v2316_v12 = vpop.eup %2315  ;;  %2227 = vmatprep.subr.bf16.mxu0 %v2347_v11  ;;  %v474_v31 = vmul.f32 %v3325_v55, %v459_v24 }
 0x34e   :  { %v1661_v30 = vpack.c.bf16 %v1653_v54, %v1653_v54  ;;  %2064 = vst.msk [vmem:[#allocation2 + $0xc] sm:$0xf] %vm1569_vm6, %v1653_v54  ;;  %v1654_v34 = vmul.f32 %v2316_v12, %v3309_v52  ;;  %v1671_v4 = vpack.c.bf16 %v488_v23, %v488_v23  ;;  %v1641_v27 = vpop.xlane.xlu1 %1640 }
 0x34f   :  { %v489_v60 = vadd.f32 %v3333_v62, %v474_v31  ;;  %2323 = vrcp.f32 %v1641_v27 }
 0x350   :  { %2212 = vmatmul.mubr.msk.bf16.vlgmr.msra.gmra.mxu1 %vm1674_vm8, %v1661_v30  ;;  %v1662_v50 = vpack.c.bf16 %v1654_v34, %v1654_v34  ;;  %2065 = vst.msk [vmem:[#allocation2 + $0x10] sm:$0xf] %vm1569_vm6, %v1654_v34  ;;  %v1910_v43 = vsel %vm1678_vm7, %v1671_v4, 0 }
 0x351   :  { %2222 = vmatpush3.bf16.msra.mxu1 %v1910_v43  ;;  %2223 = vmatprep.mubr.msk.bf16.mxu1 %vm2348_vm1, %v2347_v11  ;;  %v1672_v35 = vpack.c.bf16 %v489_v60, %v489_v60 }
 0x352   :  { %v2318_v10 = vpop.eup %2317  ;;  %2218 = vmatmul.mubr.msk.bf16.vlgmr.msra.gmra.mxu0 %vm1674_vm8, %v1662_v50  ;;  %2233 = vmatprep.subr.bf16.mxu1 %v2347_v11 }
 0x353   :  { %v2320_v52 = vpop.eup %2319  ;;  %v1956_v38 = vsel %vm1678_vm7, %v1672_v35, 0  ;;  %2229 = vmatprep.mubr.msk.bf16.mxu0 %vm2348_vm1, %v2347_v11  ;;  %v460_v42 = vmul.f32 %v2318_v10, %v3300_v28 }
 0x354   :  { %v1655_v20 = vmul.f32 %v2320_v52, %v3314_v29  ;;  %2228 = vmatpush3.bf16.msra.mxu0 %v1956_v38 }
 0x355   :  { %v475_v26 = vmul.f32 %v3325_v55, %v460_v42 }
 0x356   :  { %v1663_v18 = vpack.c.bf16 %v1655_v20, %v1655_v20  ;;  %2066 = vst.msk [vmem:[#allocation2 + $0x14] sm:$0xf] %vm1569_vm6, %v1655_v20 }
 0x357   :  { %v2322_v2 = vpop.eup %2321  ;;  %v490_v39 = vadd.f32 %v3333_v62, %v475_v26 }
 0x358   :  { %v1656_v16 = vmul.f32 %v2322_v2, %v3318_v17  ;;  %2224 = vmatmul.mubr.msk.bf16.vlgmr.msra.gmra.mxu1 %vm1674_vm8, %v1663_v18 }
 0x359   :  { %v1673_v46 = vpack.c.bf16 %v490_v39, %v490_v39  ;;  %2235 = vmatprep.mubr.msk.bf16.mxu1 %vm2348_vm1, %v2347_v11 }
 0x35a   :  { %2067 = vst.msk [vmem:[#allocation2 + $0x18] sm:$0xf] %vm1569_vm6, %v1656_v16  ;;  %v1664_v28 = vpack.c.bf16 %v1656_v16, %v1656_v16 }
 0x35b   :  { %v2002_v29 = vsel %vm1678_vm7, %v1673_v46, 0 }
 0x35c   :  { %2230 = vmatmul.mubr.msk.bf16.vlgmr.msra.gmra.mxu0 %vm1674_vm8, %v1664_v28  ;;  %2234 = vmatpush3.bf16.msra.mxu1 %v2002_v29  ;;  %v2324_v55 = vpop.eup %2323 }
 0x35d   :  { %v1657_v0 = vmul.f32 %v2324_v55, %v3328_v44 }
 0x35f   :  { %2068 = vst.msk [vmem:[#allocation2 + $0x1c] sm:$0xf] %vm1569_vm6, %v1657_v0  ;;  %v1665_v17 = vpack.c.bf16 %v1657_v0, %v1657_v0 }
 0x361   :  { %2236 = vmatmul.mubr.msk.bf16.vlgmr.msra.gmra.mxu1 %vm1674_vm8, %v1665_v17 }
 0x362   :  { %2336 = shalt.err (!%p2333_p4)
}
 0x363   :  { %s2351_s16 = smov 64   ;;  %s2352_s17 = smov 4   ;;  %vm2052_vm9 = vcmask 58368  }
 0x364   :  { %2082 = dma.vmem_to_hbm [thread:$0]  %s2077_s9, 512, %s3464_s11, [#allocation3], %s2351_s16, %s2351_s16, %s2352_s17  }
 0x3ff   :  { %v1716_v11 = vpop.f32.mrf.mxu0 }
 0x400   :  { %v1717_v44 = vadd.f32 %v1716_v11, %v2726_v51 }
 0x401   :  { %v2195_v62 = vpop.f32.mrf.mxu0 }
 0x402   :  { %v2044_v37 = vpack.c.bf16 %v1717_v44, %v1717_v44 }
 0x403   :  { %v1719_v61 = vpop.f32.mrf.mxu0 }
 0x404   :  { %2053 = vst.msk [vmem:[%s3463_s10] sm:$0x3] %vm2052_vm9, %v2044_v37  ;;  %v1762_v41 = vpop.f32.mrf.mxu1 }
 0x405   :  { %v1763_v6 = vadd.f32 %v1762_v41, %v2750_v14  ;;  %v2196_v3 = vpop.f32.mrf.mxu0 }
 0x406   :  { %v2201_v15 = vpop.f32.mrf.mxu1 }
 0x407   :  { %v2045_v22 = vpack.c.bf16 %v1763_v6, %v1763_v6 }
 0x408   :  { %v1765_v8 = vpop.f32.mrf.mxu1  ;;  %v1808_v40 = vpop.f32.mrf.mxu0 }
 0x409   :  { %2054 = vst.msk [vmem:[%s3463_s10 + $0x2] sm:$0x3] %vm2052_vm9, %v2045_v22  ;;  %v1809_v51 = vadd.f32 %v1808_v40, %v2766_v45 }
 0x40a   :  { %v2202_v7 = vpop.f32.mrf.mxu1  ;;  %v2207_v49 = vpop.f32.mrf.mxu0 }
 0x40b   :  { %v2046_v58 = vpack.c.bf16 %v1809_v51, %v1809_v51 }
 0x40c   :  { %v1811_v9 = vpop.f32.mrf.mxu0 }
 0x40d   :  { %2055 = vst.msk [vmem:[%s3463_s10 + $0x4] sm:$0x3] %vm2052_vm9, %v2046_v58 }
 0x40e   :  { %v2208_v14 = vpop.f32.mrf.mxu0 }
 0x410   :  { %v1854_v56 = vpop.f32.mrf.mxu1 }
 0x411   :  { %v1855_v57 = vadd.f32 %v1854_v56, %v2795_v59 }
 0x412   :  { %v2213_v21 = vpop.f32.mrf.mxu1  ;;  %v1900_v25 = vpop.f32.mrf.mxu0 }
 0x413   :  { %v2047_v48 = vpack.c.bf16 %v1855_v57, %v1855_v57  ;;  %v1901_v33 = vadd.f32 %v1900_v25, %v2832_v47 }
 0x414   :  { %v1857_v5 = vpop.f32.mrf.mxu1  ;;  %v2219_v45 = vpop.f32.mrf.mxu0 }
 0x415   :  { %2056 = vst.msk [vmem:[%s3463_s10 + $0x6] sm:$0x3] %vm2052_vm9, %v2047_v48  ;;  %v2048_v53 = vpack.c.bf16 %v1901_v33, %v1901_v33 }
 0x416   :  { %v2214_v1 = vpop.f32.mrf.mxu1  ;;  %v1903_v13 = vpop.f32.mrf.mxu0 }
 0x417   :  { %2057 = vst.msk [vmem:[%s3463_s10 + $0x8] sm:$0x3] %vm2052_vm9, %v2048_v53 }
 0x418   :  { %v1946_v59 = vpop.f32.mrf.mxu1  ;;  %v2220_v32 = vpop.f32.mrf.mxu0 }
 0x419   :  { %v1947_v24 = vadd.f32 %v1946_v59, %v2851_v19 }
 0x41a   :  { %v2225_v47 = vpop.f32.mrf.mxu1 }
 0x41b   :  { %v2049_v54 = vpack.c.bf16 %v1947_v24, %v1947_v24 }
 0x41c   :  { %v1949_v23 = vpop.f32.mrf.mxu1  ;;  %v1992_v12 = vpop.f32.mrf.mxu0 }
 0x41d   :  { %2058 = vst.msk [vmem:[%s3463_s10 + $0xa] sm:$0x3] %vm2052_vm9, %v2049_v54  ;;  %v1993_v31 = vadd.f32 %v1992_v12, %v2888_v36 }
 0x41e   :  { %v2226_v30 = vpop.f32.mrf.mxu1  ;;  %v2231_v34 = vpop.f32.mrf.mxu0 }
 0x41f   :  { %v2050_v4 = vpack.c.bf16 %v1993_v31, %v1993_v31 }
 0x420   :  { %v1995_v27 = vpop.f32.mrf.mxu0 }
 0x421   :  { %2059 = vst.msk [vmem:[%s3463_s10 + $0xc] sm:$0x3] %vm2052_vm9, %v2050_v4  ;;  %v2038_v19 = vpop.f32.mrf.mxu1 }
 0x422   :  { %v2232_v60 = vpop.f32.mrf.mxu0  ;;  %v2039_v50 = vadd.f32 %v2038_v19, %v2921_v63 }
 0x423   :  { %v2237_v43 = vpop.f32.mrf.mxu1 }
 0x424   :  { %v2051_v35 = vpack.c.bf16 %v2039_v50, %v2039_v50 }
 0x425   :  { %v2041_v10 = vpop.f32.mrf.mxu1 }
 0x426   :  { %2060 = vst.msk [vmem:[%s3463_s10 + $0xe] sm:$0x3] %vm2052_vm9, %v2051_v35 }
 0x427   :  { %v2238_v36 = vpop.f32.mrf.mxu1 }
 0x428   :  { %2345 = dma.done.wait [#allocation3], 512  }
 0x429   :  { %2346 = vsyncadd [#allocation3], 4294966784 }
 0x42a   :  { %2088 = vsyncpa [#allocation3], 1 }

</bundles_post_ra>
